<compile_context>
chip_gen: v7x
topology: tpu7x:2x2x1
jax: 0.10.0
libtpu: 0.0.40
codegen_flags: <defaults>
</compile_context>

<pallas_src>
import jax
import jax.numpy as jnp
from jax.experimental import pallas as pl
from jax.experimental.pallas import tpu as pltpu

# High matmul precision so the Pallas kernel and the pure-JAX reference agree tightly in f32.
jax.config.update("jax_default_matmul_precision", "highest")

IN_FEATURES = 120      # 10 * 12
HID = 128
VAL_HID = 64
ACT_HID = 256
N_ACT = 100            # 10 * 10
LANES = 128
HEAD_LANES = 384       # [0:256] action-head cols, [256:320] value-head cols, [320:384] pad


def _softplus(x):
    # matches torch.nn.Softplus(beta=1, threshold=20)
    return jnp.where(x > 20.0, x, jnp.log1p(jnp.exp(jnp.minimum(x, 20.0))))


def _a2c_kernel(x_ref, w_ref, wh_ref, aux_ref, out_ref):
    # x_ref  : (1, 128)   flattened observation, lanes 120:128 zero
    # w_ref  : (640, 128) rows [0:128]=W1(pad), [128:256]=W2, [256:512]=Wa2(pad), [512:640]=S
    # wh_ref : (128, 384) cols [0:256]=Wa1, [256:320]=Wv1, [320:384]=0
    # aux_ref: (8, 384)   row0=b1, row1=b2, row2=[ba1|bv1|0], row3=ba2(pad), row4=wv2, row5=bv2
    x = x_ref[...]                                                            # (1, 128)

    # feature trunk: Linear(120,128)+Softplus, Linear(128,128)+Softplus   (MXU)
    h = _softplus(jnp.dot(x, w_ref[0:128, :], preferred_element_type=jnp.float32)
                  + aux_ref[0:1, 0:128])
    h = _softplus(jnp.dot(h, w_ref[128:256, :], preferred_element_type=jnp.float32)
                  + aux_ref[1:2, 0:128])                                      # (1, 128)

    # fused first layers of both heads: one (1,128)x(128,384) matmul.
    z = jnp.dot(h, wh_ref[...], preferred_element_type=jnp.float32) + aux_ref[2:3, :]

    # value head: Tanhshrink -> Linear(64,1) -> Sigmoid
    v = z[:, 256:320]                                                         # (1, 64)
    v = v - jnp.tanh(v)                                                       # tanhshrink
    v = jnp.sum(v * aux_ref[4:5, 0:64], axis=-1, keepdims=True) + aux_ref[5:6, 0:1]
    value = 1.0 / (1.0 + jnp.exp(-v))                                         # (1, 1)

    # action head: Softplus -> Linear(256,100) (lane-padded to 128) -> grouped row softmax
    a = _softplus(z[:, 0:256])                                                # (1, 256)
    logits = (jnp.dot(a, w_ref[256:512, :], preferred_element_type=jnp.float32)
              + aux_ref[3:4, 0:128])                                          # (1, 128)
    m = jnp.max(logits, axis=-1, keepdims=True)      # global shift: exact for each 10-wide row
    e = jnp.exp(logits - m)
    denom = jnp.dot(e, w_ref[512:640, :], preferred_element_type=jnp.float32)  # segment sums
    probs = e / denom                                # lanes [10r, 10r+10) = softmax of row r

    # pack the scalar value into lane 100 of the single lane-dense output
    lane = jax.lax.broadcasted_iota(jnp.int32, (1, LANES), 1)
    out_ref[...] = jnp.where(lane == N_ACT, value, probs)


def pack_params(raw):
    (w1, b1, w2, b2, wv1, bv1, wv2, bv2, wa1, ba1, wa2, ba2) = raw

    w1p = jnp.zeros((LANES, HID), jnp.float32).at[:IN_FEATURES, :].set(w1)
    wa2p = jnp.zeros((ACT_HID, LANES), jnp.float32).at[:, :N_ACT].set(wa2)

    # segment-sum matrix for the grouped (10-wide) softmax; identity on padding lanes so the
    # pad lanes normalize to 1.0 (never read) instead of producing 0/0.
    idx = jnp.arange(LANES)
    valid = idx < N_ACT
    same_seg = (idx[:, None] // 10) == (idx[None, :] // 10)
    seg_mat = jnp.where(valid[:, None] & valid[None, :] & same_seg, 1.0, 0.0)
    seg_mat = seg_mat + jnp.where(valid, 0.0, 1.0) * jnp.eye(LANES, dtype=jnp.float32)

    w_slab = jnp.concatenate(
        [w1p, w2, wa2p, seg_mat.astype(jnp.float32)], axis=0)                 # (640, 128)

    wh = jnp.zeros((HID, HEAD_LANES), jnp.float32)
    wh = wh.at[:, :ACT_HID].set(wa1).at[:, ACT_HID:ACT_HID + VAL_HID].set(wv1)  # (128, 384)

    aux = jnp.zeros((8, HEAD_LANES), jnp.float32)
    aux = aux.at[0, :HID].set(b1)
    aux = aux.at[1, :HID].set(b2)
    aux = aux.at[2, :ACT_HID].set(ba1).at[2, ACT_HID:ACT_HID + VAL_HID].set(bv1)
    aux = aux.at[3, :N_ACT].set(ba2)
    aux = aux.at[4, :VAL_HID].set(wv2[:, 0])
    aux = aux.at[5, 0].set(bv2[0])
    return (w_slab, wh, aux)


def init_params(key):
    """Torch-default-like init: U(-1/sqrt(fan_in), +1/sqrt(fan_in)) for W and b."""
    def linear(k, fan_in, fan_out):
        kw, kb = jax.random.split(k)
        bound = 1.0 / jnp.sqrt(jnp.float32(fan_in))
        w = jax.random.uniform(kw, (fan_in, fan_out), jnp.float32, -bound, bound)
        b = jax.random.uniform(kb, (fan_out,), jnp.float32, -bound, bound)
        return w, b

    ks = jax.random.split(key, 6)
    w1, b1 = linear(ks[0], IN_FEATURES, HID)
    w2, b2 = linear(ks[1], HID, HID)
    wv1, bv1 = linear(ks[2], HID, VAL_HID)
    wv2, bv2 = linear(ks[3], VAL_HID, 1)
    wa1, ba1 = linear(ks[4], HID, ACT_HID)
    wa2, ba2 = linear(ks[5], ACT_HID, N_ACT)
    raw = (w1, b1, w2, b2, wv1, bv1, wv2, bv2, wa1, ba1, wa2, ba2)
    return pack_params(raw), raw


@jax.jit
def forward(x, packed):
    w_slab, wh, aux = packed
    xf = x.reshape(-1).astype(jnp.float32)                 # x.flatten() -> (120,)
    x_pad = jnp.pad(xf, (0, LANES - IN_FEATURES)).reshape(1, LANES)

    vmem = pl.BlockSpec(memory_space=pltpu.MemorySpace.VMEM)
    out = pl.pallas_call(
        _a2c_kernel,
        out_shape=jax.ShapeDtypeStruct((1, LANES), jnp.float32),
        in_specs=[vmem, vmem, vmem, vmem],
        out_specs=vmem,
    )(x_pad, w_slab, wh, aux)

    value = out[0, N_ACT].reshape(1)                       # matches torch: (1,)
    action = out[0, :N_ACT].reshape(10, 10)                # pure relayout of lane-dense output
    return value, action


def forward_ref(x, raw):
    """Pure-JAX reference for sanity checking."""
    (w1, b1, w2, b2, wv1, bv1, wv2, bv2, wa1, ba1, wa2, ba2) = raw
    xf = x.reshape(-1).astype(jnp.float32)
    h = _softplus(xf @ w1 + b1)
    h = _softplus(h @ w2 + b2)
    v = h @ wv1 + bv1
    v = v - jnp.tanh(v)
    v = jax.nn.sigmoid(v @ wv2 + bv2)
    logits = (_softplus(h @ wa1 + ba1) @ wa2 + ba2).reshape(10, 10)
    return v, jax.nn.softmax(logits, axis=1)


if __name__ == "__main__":
    key = jax.random.PRNGKey(0)
    kp, kx = jax.random.split(key)
    packed, raw = init_params(kp)

    # the module flattens its input to 120 features -> use a (10, 12) observation
    x = jax.random.normal(kx, (10, 12), dtype=jnp.float32)

    value, action = forward(x, packed)
    jax.block_until_ready((value, action))

    v_ref, a_ref = forward_ref(x, raw)
    assert value.shape == (1,) and action.shape == (10, 10)
    assert jnp.allclose(value, v_ref, atol=5e-3, rtol=5e-3)
    assert jnp.allclose(action, a_ref, atol=5e-3, rtol=5e-3)
    assert jnp.allclose(jnp.sum(action, axis=1), 1.0, atol=1e-5)

    print("KERNEL_OK")
</pallas_src>

<mosaic_0001>
module attributes {stable_mosaic.version = 11 : i64} {
  func.func @_a2c_kernel(%arg0: memref<1x128xf32, #tpu.memory_space<vmem>>, %arg1: memref<640x128xf32, #tpu.memory_space<vmem>>, %arg2: memref<128x384xf32, #tpu.memory_space<vmem>>, %arg3: memref<8x384xf32, #tpu.memory_space<vmem>>, %arg4: memref<1x128xf32, #tpu.memory_space<vmem>>) attributes {dimension_semantics = [], scalar_prefetch = 0 : i64, scratch_operands = 0 : i64, tpu.core_type = #tpu.core_type<tc>} {
    %c0 = arith.constant 0 : index
    %c0_0 = arith.constant 0 : index
    %0 = vector.load %arg0[%c0, %c0_0] : memref<1x128xf32, #tpu.memory_space<vmem>>, vector<1x128xf32>
    %c0_1 = arith.constant 0 : index
    %c0_2 = arith.constant 0 : index
    %1 = vector.load %arg1[%c0_1, %c0_2] : memref<640x128xf32, #tpu.memory_space<vmem>>, vector<128x128xf32>
    %cst = arith.constant dense<0.000000e+00> : vector<1x128xf32>
    %2 = tpu.matmul %0, %1, %cst {dimension_numbers = #tpu.dot_dimension_numbers<[1], [0], [0], [1], [0, 0, 1, 1], [], []>, precision = #tpu.contract_precision<fp32>} : vector<1x128xf32>, vector<128x128xf32>, vector<1x128xf32> -> vector<1x128xf32>
    %c0_3 = arith.constant 0 : index
    %c0_4 = arith.constant 0 : index
    %3 = vector.load %arg3[%c0_3, %c0_4] : memref<8x384xf32, #tpu.memory_space<vmem>>, vector<1x128xf32>
    %4 = arith.addf %2, %3 : vector<1x128xf32>
    %cst_5 = arith.constant 2.000000e+01 : f32
    %5 = vector.broadcast %cst_5 : f32 to vector<1x128xf32>
    %6 = arith.cmpf ogt, %4, %5 : vector<1x128xf32>
    %cst_6 = arith.constant 2.000000e+01 : f32
    %7 = vector.broadcast %cst_6 : f32 to vector<1x128xf32>
    %8 = arith.minimumf %4, %7 : vector<1x128xf32>
    %9 = math.exp %8 : vector<1x128xf32>
    %10 = math.log1p %9 : vector<1x128xf32>
    %11 = arith.select %6, %4, %10 : vector<1x128xi1>, vector<1x128xf32>
    %c128 = arith.constant 128 : index
    %c0_7 = arith.constant 0 : index
    %12 = vector.load %arg1[%c128, %c0_7] : memref<640x128xf32, #tpu.memory_space<vmem>>, vector<128x128xf32>
    %cst_8 = arith.constant dense<0.000000e+00> : vector<1x128xf32>
    %13 = tpu.matmul %11, %12, %cst_8 {dimension_numbers = #tpu.dot_dimension_numbers<[1], [0], [0], [1], [0, 0, 1, 1], [], []>, precision = #tpu.contract_precision<fp32>} : vector<1x128xf32>, vector<128x128xf32>, vector<1x128xf32> -> vector<1x128xf32>
    %c1 = arith.constant 1 : index
    %c0_9 = arith.constant 0 : index
    %14 = vector.load %arg3[%c1, %c0_9] : memref<8x384xf32, #tpu.memory_space<vmem>>, vector<1x128xf32>
    %15 = arith.addf %13, %14 : vector<1x128xf32>
    %cst_10 = arith.constant 2.000000e+01 : f32
    %16 = vector.broadcast %cst_10 : f32 to vector<1x128xf32>
    %17 = arith.cmpf ogt, %15, %16 : vector<1x128xf32>
    %cst_11 = arith.constant 2.000000e+01 : f32
    %18 = vector.broadcast %cst_11 : f32 to vector<1x128xf32>
    %19 = arith.minimumf %15, %18 : vector<1x128xf32>
    %20 = math.exp %19 : vector<1x128xf32>
    %21 = math.log1p %20 : vector<1x128xf32>
    %22 = arith.select %17, %15, %21 : vector<1x128xi1>, vector<1x128xf32>
    %c0_12 = arith.constant 0 : index
    %c0_13 = arith.constant 0 : index
    %23 = vector.load %arg2[%c0_12, %c0_13] : memref<128x384xf32, #tpu.memory_space<vmem>>, vector<128x384xf32>
    %cst_14 = arith.constant dense<0.000000e+00> : vector<1x384xf32>
    %24 = tpu.matmul %22, %23, %cst_14 {dimension_numbers = #tpu.dot_dimension_numbers<[1], [0], [0], [1], [0, 0, 1, 1], [], []>, precision = #tpu.contract_precision<fp32>} : vector<1x128xf32>, vector<128x384xf32>, vector<1x384xf32> -> vector<1x384xf32>
    %c2 = arith.constant 2 : index
    %c0_15 = arith.constant 0 : index
    %25 = vector.load %arg3[%c2, %c0_15] : memref<8x384xf32, #tpu.memory_space<vmem>>, vector<1x384xf32>
    %26 = arith.addf %24, %25 : vector<1x384xf32>
    %27 = vector.extract_strided_slice %26 {offsets = [0, 256], sizes = [1, 64], strides = [1, 1]} : vector<1x384xf32> to vector<1x64xf32>
    %28 = math.tanh %27 : vector<1x64xf32>
    %29 = arith.subf %27, %28 : vector<1x64xf32>
    %c4 = arith.constant 4 : index
    %c0_16 = arith.constant 0 : index
    %30 = vector.load %arg3[%c4, %c0_16] : memref<8x384xf32, #tpu.memory_space<vmem>>, vector<1x64xf32>
    %31 = arith.mulf %29, %30 : vector<1x64xf32>
    %cst_17 = arith.constant dense<0.000000e+00> : vector<1xf32>
    %32 = vector.multi_reduction <add>, %31, %cst_17 [1] : vector<1x64xf32> to vector<1xf32>
    %33 = vector.shape_cast %32 : vector<1xf32> to vector<1x1xf32>
    %c5 = arith.constant 5 : index
    %c0_18 = arith.constant 0 : index
    %34 = vector.load %arg3[%c5, %c0_18] : memref<8x384xf32, #tpu.memory_space<vmem>>, vector<1x1xf32>
    %35 = arith.addf %33, %34 : vector<1x1xf32>
    %cst_19 = arith.constant 0.000000e+00 : f32
    %36 = vector.broadcast %cst_19 : f32 to vector<1x1xf32>
    %37 = arith.subf %36, %35 : vector<1x1xf32>
    %38 = math.exp %37 : vector<1x1xf32>
    %cst_20 = arith.constant 1.000000e+00 : f32
    %39 = vector.broadcast %cst_20 : f32 to vector<1x1xf32>
    %40 = arith.addf %39, %38 : vector<1x1xf32>
    %cst_21 = arith.constant 1.000000e+00 : f32
    %41 = vector.broadcast %cst_21 : f32 to vector<1x1xf32>
    %42 = arith.divf %41, %40 : vector<1x1xf32>
    %43 = vector.extract_strided_slice %26 {offsets = [0, 0], sizes = [1, 256], strides = [1, 1]} : vector<1x384xf32> to vector<1x256xf32>
    %cst_22 = arith.constant 2.000000e+01 : f32
    %44 = vector.broadcast %cst_22 : f32 to vector<1x256xf32>
    %45 = arith.cmpf ogt, %43, %44 : vector<1x256xf32>
    %cst_23 = arith.constant 2.000000e+01 : f32
    %46 = vector.broadcast %cst_23 : f32 to vector<1x256xf32>
    %47 = arith.minimumf %43, %46 : vector<1x256xf32>
    %48 = math.exp %47 : vector<1x256xf32>
    %49 = math.log1p %48 : vector<1x256xf32>
    %50 = arith.select %45, %43, %49 : vector<1x256xi1>, vector<1x256xf32>
    %c256 = arith.constant 256 : index
    %c0_24 = arith.constant 0 : index
    %51 = vector.load %arg1[%c256, %c0_24] : memref<640x128xf32, #tpu.memory_space<vmem>>, vector<256x128xf32>
    %cst_25 = arith.constant dense<0.000000e+00> : vector<1x128xf32>
    %52 = tpu.matmul %50, %51, %cst_25 {dimension_numbers = #tpu.dot_dimension_numbers<[1], [0], [0], [1], [0, 0, 1, 1], [], []>, precision = #tpu.contract_precision<fp32>} : vector<1x256xf32>, vector<256x128xf32>, vector<1x128xf32> -> vector<1x128xf32>
    %c3 = arith.constant 3 : index
    %c0_26 = arith.constant 0 : index
    %53 = vector.load %arg3[%c3, %c0_26] : memref<8x384xf32, #tpu.memory_space<vmem>>, vector<1x128xf32>
    %54 = arith.addf %52, %53 : vector<1x128xf32>
    %cst_27 = arith.constant dense<0xFF800000> : vector<1xf32>
    %55 = vector.multi_reduction <maximumf>, %54, %cst_27 [1] : vector<1x128xf32> to vector<1xf32>
    %56 = vector.shape_cast %55 : vector<1xf32> to vector<1x1xf32>
    %57 = vector.broadcast %56 : vector<1x1xf32> to vector<1x128xf32>
    %58 = arith.subf %54, %57 : vector<1x128xf32>
    %59 = math.exp %58 : vector<1x128xf32>
    %c512 = arith.constant 512 : index
    %c0_28 = arith.constant 0 : index
    %60 = vector.load %arg1[%c512, %c0_28] : memref<640x128xf32, #tpu.memory_space<vmem>>, vector<128x128xf32>
    %cst_29 = arith.constant dense<0.000000e+00> : vector<1x128xf32>
    %61 = tpu.matmul %59, %60, %cst_29 {dimension_numbers = #tpu.dot_dimension_numbers<[1], [0], [0], [1], [0, 0, 1, 1], [], []>, precision = #tpu.contract_precision<fp32>} : vector<1x128xf32>, vector<128x128xf32>, vector<1x128xf32> -> vector<1x128xf32>
    %62 = arith.divf %59, %61 : vector<1x128xf32>
    %63 = tpu.iota {dimensions = array<i32: 1>} : vector<1x128xi32>
    %c100_i32 = arith.constant 100 : i32
    %64 = vector.broadcast %c100_i32 : i32 to vector<1x128xi32>
    %65 = arith.cmpi eq, %63, %64 : vector<1x128xi32>
    %66 = vector.shape_cast %42 : vector<1x1xf32> to vector<1x1xf32>
    %67 = vector.broadcast %66 : vector<1x1xf32> to vector<1x128xf32>
    %68 = arith.select %65, %67, %62 : vector<1x128xi1>, vector<1x128xf32>
    %c0_30 = arith.constant 0 : index
    %c0_31 = arith.constant 0 : index
    %69 = vector.load %arg4[%c0_30, %c0_31] : memref<1x128xf32, #tpu.memory_space<vmem>>, vector<1x128xf32>
    tpu.vector_store %arg4[%c0_30, %c0_31], %68 {strides = array<i32>} : memref<1x128xf32, #tpu.memory_space<vmem>>, vector<1x128xf32>,
    return
  }
}

</mosaic_0001>

<bundles_post_ra>
// kernel: squeeze.3
= control target key start
LH: loop header
LB: loop body
LE: loop exit
PB: predicated region body
PF: predicated region fallthrough
CT: control target
= control target key end

     0   :  { %s153_s0 = inlined_call_operand.vmem [shape: f32[100], index: 0, kind: input, shape index: {}]   ;;  %s154_s1 = inlined_call_operand.hbm [shape: f32[10,10], index: 1, kind: output, shape index: {}]  }
   0x1   :  { %v5_v0 = vld [vmem:[%s153_s0] sm:$0x1] }
   0x2   :  { %6 = vst [vmem:[#allocation2] sm:$0x1] %v5_v0 }
   0x3   :  { %2 = vsyncpa [#allocation1], 0  ;;  %s108_s0 = smov 118   ;;  %s109_s8 = smov 98   ;;  %vm8_vm0 = vcmask 80896  }
   0x4   :  { %s110_s9 = smov 108   ;;  %s111_s10 = smov 88  }
   0x5   :  { %s112_s11 = smov 78   ;;  %s113_s12 = smov 68  }
   0x6   :  { %s114_s13 = smov 58   ;;  %s115_s14 = smov 48  }
   0x7   :  { %s116_s15 = smov 38   ;;  %s117_s16 = smov [#allocation0]  }
   0x8   :  { %s68_s17 = sshll.u32 %s117_s16, 4  ;;  %s69_s17 = int_to_ptr.vmem [resolvable:$true] %s68_s17 }
   0x9   :  { %v10_v1 = vld [vmem:[#allocation2] sm:$0x1]   ;;  %s84_s18 = scalar_lea.vmem %s69_s17, 256  ;;  %p89_p1 = scmp.lt.s32.totalorder %s69_s17, %s69_s17 }
   0xa   :  { %v22_v2 = vld [vmem:[#allocation2] sm:$0x1]   ;;  %11 = vrot.lane.b32.xlu0 %v10_v1, %s108_s0  ;;  %p85_p0 = scmp.ne.s32.totalorder %s69_s17, %s84_s18  ;;  %p90_p2 = scmp.lt.s32.totalorder %s84_s18, %s84_s18 }
   0xb   :  { %23 = vrot.lane.b32.xlu1 %v22_v2, %s109_s8  ;;  %v16_v3 = vld [vmem:[#allocation2] sm:$0x1]  }
   0xc   :  { %v28_v4 = vld [vmem:[#allocation2] sm:$0x1]   ;;  %p91_p3 = por %p90_p2, %p89_p1 }
   0xd   :  { %v7_v5 = vld [vmem:[#allocation2] sm:$0x1]  }
   0xe   :  { %9 = vst.msk [vmem:[#allocation0] sm:$0x1] %vm8_vm0, %v7_v5   ;;  %17 = vrot.lane.b32.xlu0 %v16_v3, %s110_s9  ;;  %v34_v6 = vld [vmem:[#allocation2] sm:$0x1]   ;;  %p92_p4 = pnand %p91_p3, %p85_p0 }
   0xf   :  { %29 = vrot.lane.b32.xlu1 %v28_v4, %s111_s10  ;;  %v40_v7 = vld [vmem:[#allocation2] sm:$0x1]  }
  0x10   :  { %v46_v8 = vld [vmem:[#allocation2] sm:$0x1]  }
  0x11   :  { %v52_v9 = vld [vmem:[#allocation2] sm:$0x1]  }
  0x12   :  { %35 = vrot.lane.b32.xlu0 %v34_v6, %s112_s11  ;;  %v58_v10 = vld [vmem:[#allocation2] sm:$0x1]  }
  0x13   :  { %41 = vrot.lane.b32.xlu1 %v40_v7, %s113_s12 }
  0x16   :  { %47 = vrot.lane.b32.xlu0 %v46_v8, %s114_s13 }
  0x17   :  { %53 = vrot.lane.b32.xlu1 %v52_v9, %s115_s14 }
  0x1a   :  { %59 = vrot.lane.b32.xlu0 %v58_v10, %s116_s15 }
  0x7c   :  { %v12_v11 = vpop.permute.xlu0 %11  }
  0x7d   :  { %v24_v12 = vpop.permute.xlu1 %23   ;;  %15 = vst.msk [vmem:[#allocation0 + $0x1] sm:$0x1] %vm8_vm0, %v12_v11  }
  0x7e   :  { %27 = vst.msk [vmem:[#allocation0 + $0x3] sm:$0x1] %vm8_vm0, %v24_v12  }
  0x80   :  { %v18_v13 = vpop.permute.xlu0 %17  }
  0x81   :  { %v30_v14 = vpop.permute.xlu1 %29   ;;  %21 = vst.msk [vmem:[#allocation0 + $0x2] sm:$0x1] %vm8_vm0, %v18_v13  }
  0x82   :  { %33 = vst.msk [vmem:[#allocation0 + $0x4] sm:$0x1] %vm8_vm0, %v30_v14  }
  0x84   :  { %v36_v15 = vpop.permute.xlu0 %35  }
  0x85   :  { %v42_v16 = vpop.permute.xlu1 %41   ;;  %39 = vst.msk [vmem:[#allocation0 + $0x5] sm:$0x1] %vm8_vm0, %v36_v15  }
  0x86   :  { %45 = vst.msk [vmem:[#allocation0 + $0x6] sm:$0x1] %vm8_vm0, %v42_v16  }
  0x88   :  { %v48_v17 = vpop.permute.xlu0 %47  }
  0x89   :  { %v54_v18 = vpop.permute.xlu1 %53   ;;  %51 = vst.msk [vmem:[#allocation0 + $0x7] sm:$0x1] %vm8_vm0, %v48_v17  }
  0x8a   :  { %57 = vst.msk [vmem:[#allocation0 + $0x8] sm:$0x1] %vm8_vm0, %v54_v18  }
  0x8c   :  { %v60_v19 = vpop.permute.xlu0 %59  }
  0x8d   :  { %63 = vst.msk [vmem:[#allocation0 + $0x9] sm:$0x1] %vm8_vm0, %v60_v19  }
  0x8e   :  { %95 = shalt.err (!%p92_p4)
}
  0x8f   :  { %s96_s21 = scalar_lea.hbm %s154_s1, 256 }
  0x90   :  { %p97_p5 = scmp.ne.s32.totalorder %s154_s1, %s96_s21  ;;  %p100_p6 = scmp.lt.u32.totalorder %s96_s21, %s154_s1 }
  0x92   :  { %p102_p7 = pnand %p100_p6, %p97_p5 }
  0x94   :  { %105 = shalt.err (!%p102_p7)
}
  0x95   :  { %71 = dma.vmem_to_hbm [thread:$0]  %s69_s17, 256, %s154_s1, [#allocation1]  }
  0x96   :  { %106 = dma.done.wait [#allocation1], 256  }
  0x97   :  { %107 = vsyncadd [#allocation1], 4294967040 }
  0x98   :  { %73 = vsyncpa [#allocation1], 1 }

// kernel: forward.1
= control target key start
LH: loop header
LB: loop body
LE: loop exit
PB: predicated region body
PF: predicated region fallthrough
CT: control target
= control target key end

     0   :  { %9 = vsyncpa [#allocation3], 0  ;;  %s9691_s0 = inlined_call_operand.vmem [shape: f32[1,128], index: 0, kind: input, shape index: {}]   ;;  %s9692_s1 = inlined_call_operand.hbm [shape: f32[640,128], index: 1, kind: input, shape index: {}]   ;;  %s9693_s2 = inlined_call_operand.hbm [shape: f32[128,384], index: 2, kind: input, shape index: {}]   ;;  %s9694_s3 = inlined_call_operand.vmem [shape: f32[8,384], index: 3, kind: input, shape index: {}]   ;;  %s9695_s4 = inlined_call_operand.vmem [shape: f32[1,128], index: 4, kind: output, shape index: {}]  }
   0x1   :  { %10 = vsyncpa [#allocation5], 0  ;;  %s7132_s15 = smov [#allocation2]   ;;  %s7084_s19 = scalar_lea.hbm %s9692_s1, 10240 }
   0x2   :  { %s18_s16 = sshll.u32 %s7132_s15, 4  ;;  %p7085_p0 = scmp.ne.s32.totalorder %s9692_s1, %s7084_s19  ;;  %s19_s16 = int_to_ptr.vmem [resolvable:$true] %s18_s16 }
   0x3   :  { %p7088_p1 = scmp.lt.u32.totalorder %s7084_s19, %s9692_s1 }
   0x5   :  { %p7090_p2 = pnand %p7088_p1, %p7085_p0 }
   0x7   :  { %7093 = shalt.err (!%p7090_p2)
}
   0x8   :  { %s7094_s24 = scalar_lea.vmem %s19_s16, 10240  ;;  %p7099_p4 = scmp.lt.s32.totalorder %s19_s16, %s19_s16 }
   0x9   :  { %p7095_p3 = scmp.ne.s32.totalorder %s19_s16, %s7094_s24  ;;  %p7100_p5 = scmp.lt.s32.totalorder %s7094_s24, %s7094_s24 }
   0xb   :  { %p7101_p6 = por %p7100_p5, %p7099_p4 }
   0xd   :  { %p7102_p7 = pnand %p7101_p6, %p7095_p3 }
   0xf   :  { %7105 = shalt.err (!%p7102_p7)
}
  0x10   :  { %s7133_s25 = smov 128   ;;  %s7134_s26 = smov 8  }
  0x11   :  { %24 = dma.hbm_to_vmem [thread:$0]  %s9692_s1, 10240, %s19_s16, [#allocation3], %s7133_s25, %s7133_s25, %s7134_s26  }
  0x12   :  { %s7135_s29 = smov [#allocation4]   ;;  %s7106_s7 = scalar_lea.hbm %s9693_s2, 6144 }
  0x13   :  { %s30_s30 = sshll.u32 %s7135_s29, 4  ;;  %p7107_p8 = scmp.ne.s32.totalorder %s9693_s2, %s7106_s7  ;;  %s31_s30 = int_to_ptr.vmem [resolvable:$true] %s30_s30 }
  0x14   :  { %p7110_p9 = scmp.lt.u32.totalorder %s7106_s7, %s9693_s2 }
  0x16   :  { %p7112_p10 = pnand %p7110_p9, %p7107_p8 }
  0x18   :  { %7115 = shalt.err (!%p7112_p10)
}
  0x19   :  { %s7116_s12 = scalar_lea.vmem %s31_s30, 6144  ;;  %p7121_p12 = scmp.lt.s32.totalorder %s31_s30, %s31_s30 }
  0x1a   :  { %p7117_p11 = scmp.ne.s32.totalorder %s31_s30, %s7116_s12  ;;  %p7122_p13 = scmp.lt.s32.totalorder %s7116_s12, %s7116_s12 }
  0x1c   :  { %p7123_p0 = por %p7122_p13, %p7121_p12 }
  0x1e   :  { %p7124_p1 = pnand %p7123_p0, %p7117_p11 }
  0x20   :  { %7127 = shalt.err (!%p7124_p1)
}
  0x21   :  { %s7136_s1 = smov 384   ;;  %s7137_s13 = smov 24  }
  0x22   :  { %36 = dma.hbm_to_vmem [thread:$0]  %s9693_s2, 6144, %s31_s30, [#allocation5], %s7136_s1, %s7136_s1, %s7137_s13  }
  0x23   :  { %7128 = dma.done.wait [#allocation3], 10240  }
  0x24   :  { %7129 = vsyncadd [#allocation3], 4294957056 }
  0x25   :  { %7130 = dma.done.wait [#allocation5], 6144  }
  0x26   :  { %7131 = vsyncadd [#allocation5], 4294961152  ;;  %v9741_v0 = vmov 0.0|0.0   ;;  %vm7139_vm0 = vmmov 0   ;;  %v9709_v1 = vmov 0.0   ;;  %v46_v2 = vld [vmem:[#allocation2] sm:$0xff] }
  0x27   :  { %6032 = vmatprep.subr.bf16.mxu1 %v9741_v0  ;;  %6104 = vmatprep.subr.bf16.mxu0 %v9741_v0  ;;  %v47_v3 = vld [vmem:[#allocation2 + $0x8] sm:$0xff]  ;;  %v48_v4 = vld [vmem:[#allocation2 + $0x10] sm:$0xff]  ;;  %v64_v5 = vand.u32 4294901760, %v46_v2  ;;  %v49_v7 = vld [vmem:[#allocation2 + $0x18] sm:$0xff]  ;;  %vm3891_vm9 = vcmask 1040384   ;;  %vm2956_vm10 = vcmask 516096  }
  0x28   :  { %5224 = vmatprep.mubr.msk.f32.mxu1 %vm7139_vm0, %v9709_v1  ;;  %5329 = vmatprep.mubr.msk.f32.mxu0 %vm7139_vm0, %v9709_v1  ;;  %v67_v6 = vand.u32 4294901760, %v47_v3  ;;  %v70_v8 = vand.u32 4294901760, %v48_v4  ;;  %v73_v9 = vand.u32 4294901760, %v49_v7  ;;  %v50_v10 = vld [vmem:[#allocation2 + $0x20] sm:$0xff]  ;;  %v51_v11 = vld [vmem:[#allocation2 + $0x28] sm:$0xff]  ;;  %v52_v16 = vld [vmem:[#allocation2 + $0x30] sm:$0xff] }
  0x29   :  { %v76_v14 = vand.u32 4294901760, %v50_v10  ;;  %v79_v15 = vand.u32 4294901760, %v51_v11  ;;  %v53_v17 = vld [vmem:[#allocation2 + $0x38] sm:$0xff]  ;;  %v82_v19 = vand.u32 4294901760, %v52_v16  ;;  %v7211_v21 = vld [vmem:[#allocation2 + $0x40] sm:$0xff]  ;;  %v7213_v22 = vld [vmem:[#allocation2 + $0x48] sm:$0xff]  ;;  %v7230_v29 = vsub.f32 %v46_v2, %v64_v5 }
  0x2a   :  { %v7197_v12 = vpack.c.bf16 %v67_v6, %v64_v5  ;;  %v7201_v13 = vpack.c.bf16 %v73_v9, %v70_v8  ;;  %v85_v20 = vand.u32 4294901760, %v53_v17  ;;  %v88_v24 = vand.u32 4294901760, %v7211_v21  ;;  %v45_v26 = vld [vmem:[%s9691_s0] sm:$0x1]  ;;  %v7226_v27 = vld [vmem:[#allocation2 + $0x50] sm:$0xff]  ;;  %v7228_v28 = vld [vmem:[#allocation2 + $0x58] sm:$0xff] }
  0x2b   :  { %v7207_v18 = vpack.c.bf16 %v79_v15, %v76_v14  ;;  %v91_v25 = vand.u32 4294901760, %v7213_v22  ;;  %v7232_v30 = vand.u32 4294901760, %v45_v26  ;;  %v7234_v31 = vsub.f32 %v47_v3, %v67_v6  ;;  %v7242_v35 = vld [vmem:[#allocation2 + $0x60] sm:$0xff]  ;;  %v7246_v36 = vld [vmem:[#allocation2 + $0x68] sm:$0xff]  ;;  %v7265_v43 = vld [vmem:[#allocation2 + $0x70] sm:$0xff] }
  0x2c   :  { %6034 = vmatpush3.bf16.msra.mxu1 %v7197_v12  ;;  %6106 = vmatpush3.bf16.msra.mxu0 %v7197_v12  ;;  %v7217_v23 = vpack.c.bf16 %v85_v20, %v82_v19  ;;  %v94_v33 = vand.u32 4294901760, %v7226_v27  ;;  %v97_v34 = vand.u32 4294901760, %v7228_v28  ;;  %v7248_v37 = vsub.f32 %v48_v4, %v70_v8  ;;  %v7267_v44 = vld [vmem:[#allocation2 + $0x78] sm:$0xff] }
  0x2d   :  { %6035 = vmatprep.subr.bf16.mxu1 %v9741_v0  ;;  %6107 = vmatprep.subr.bf16.mxu0 %v9741_v0  ;;  %v7238_v32 = vpack.c.bf16 %v91_v25, %v88_v24  ;;  %v7250_v38 = vsub.f32 %v49_v7, %v73_v9  ;;  %v100_v39 = vand.u32 4294901760, %v7242_v35  ;;  %v7254_v40 = vsub.f32 %v45_v26, %v7232_v30 }
  0x2e   :  { %v7262_v41 = vpack.c.bf16 %v97_v34, %v94_v33  ;;  %v103_v42 = vand.u32 4294901760, %v7246_v36  ;;  %v157_v45 = vand.u32 4294901760, %v7230_v29  ;;  %v164_v46 = vand.u32 4294901760, %v7234_v31 }
  0x2f   :  { %v7273_v47 = vsub.f32 %v50_v10, %v76_v14  ;;  %v7275_v48 = vsub.f32 %v51_v11, %v79_v15  ;;  %v106_v49 = vand.u32 4294901760, %v7265_v43  ;;  %v109_v50 = vand.u32 4294901760, %v7267_v44 }
  0x30   :  { %6037 = vmatpush3.bf16.msra.mxu1 %v7201_v13  ;;  %6109 = vmatpush3.bf16.msra.mxu0 %v7201_v13  ;;  %v146_v51 = vand.u32 4294901760, %v7254_v40  ;;  %v171_v52 = vand.u32 4294901760, %v7248_v37  ;;  %v7287_v53 = vpack.c.bf16 %v103_v42, %v100_v39  ;;  %v158_v54 = vsub.f32 %v7230_v29, %v157_v45 }
  0x31   :  { %6038 = vmatprep.subr.bf16.mxu1 %v9741_v0  ;;  %6110 = vmatprep.subr.bf16.mxu0 %v9741_v0  ;;  %v165_v55 = vsub.f32 %v7234_v31, %v164_v46  ;;  %v178_v56 = vand.u32 4294901760, %v7250_v38  ;;  %v7294_v57 = vsub.f32 %v52_v16, %v82_v19  ;;  %v7296_v58 = vsub.f32 %v53_v17, %v85_v20 }
  0x32   :  { %v147_v59 = vsub.f32 %v7254_v40, %v146_v51  ;;  %v172_v60 = vsub.f32 %v7248_v37, %v171_v52  ;;  %v185_v61 = vand.u32 4294901760, %v7273_v47  ;;  %v192_v62 = vand.u32 4294901760, %v7275_v48 }
  0x33   :  { %v7308_v63 = vpack.c.bf16 %v109_v50, %v106_v49  ;;  %v159_v2 = vand.u32 4294901760, %v158_v54  ;;  %v166_v3 = vand.u32 4294901760, %v165_v55  ;;  %v179_v4 = vsub.f32 %v7250_v38, %v178_v56 }
  0x34   :  { %6040 = vmatpush3.bf16.msra.mxu1 %v7207_v18  ;;  %6112 = vmatpush3.bf16.msra.mxu0 %v7207_v18  ;;  %v7314_v5 = vsub.f32 %v7211_v21, %v88_v24  ;;  %v7317_v6 = vsub.f32 %v7213_v22, %v91_v25  ;;  %v6129_v7 = vpack.c.bf16 %v164_v46, %v157_v45  ;;  %v148_v8 = vand.u32 4294901760, %v147_v59 }
  0x35   :  { %6041 = vmatprep.subr.bf16.mxu1 %v9741_v0  ;;  %6113 = vmatprep.subr.bf16.mxu0 %v9741_v0  ;;  %v173_v9 = vand.u32 4294901760, %v172_v60  ;;  %v186_v10 = vsub.f32 %v7273_v47, %v185_v61  ;;  %v193_v11 = vsub.f32 %v7275_v48, %v192_v62  ;;  %v6057_v14 = vpack.c.bf16 %v166_v3, %v159_v2 }
  0x36   :  { %v180_v15 = vand.u32 4294901760, %v179_v4  ;;  %v199_v16 = vand.u32 4294901760, %v7294_v57  ;;  %v206_v17 = vand.u32 4294901760, %v7296_v58  ;;  %v7330_v19 = vsub.f32 %v7226_v27, %v94_v33 }
  0x37   :  { %v7335_v20 = vsub.f32 %v7228_v28, %v97_v34  ;;  %v6132_v21 = vpack.c.bf16 %v178_v56, %v171_v52  ;;  %v187_v22 = vand.u32 4294901760, %v186_v10  ;;  %v194_v24 = vand.u32 4294901760, %v193_v11 }
  0x38   :  { %6043 = vmatpush3.bf16.msra.mxu1 %v7217_v23  ;;  %6115 = vmatpush3.bf16.msra.mxu0 %v7217_v23  ;;  %v213_v25 = vand.u32 4294901760, %v7314_v5  ;;  %v6060_v26 = vpack.c.bf16 %v180_v15, %v173_v9  ;;  %v200_v45 = vsub.f32 %v7294_v57, %v199_v16  ;;  %v207_v27 = vsub.f32 %v7296_v58, %v206_v17 }
  0x39   :  { %6044 = vmatprep.subr.bf16.mxu1 %v9741_v0  ;;  %6116 = vmatprep.subr.bf16.mxu0 %v9741_v0  ;;  %v220_v33 = vand.u32 4294901760, %v7317_v6  ;;  %v7346_v28 = vsub.f32 %v7242_v35, %v100_v39  ;;  %v7351_v34 = vsub.f32 %v7246_v36, %v103_v42  ;;  %v6063_v46 = vpack.c.bf16 %v194_v24, %v187_v22 }
  0x3a   :  { %v214_v52 = vsub.f32 %v7314_v5, %v213_v25  ;;  %v227_v54 = vand.u32 4294901760, %v7330_v19  ;;  %v201_v35 = vand.u32 4294901760, %v200_v45  ;;  %v208_v39 = vand.u32 4294901760, %v207_v27 }
  0x3b   :  { %v221_v55 = vsub.f32 %v7317_v6, %v220_v33  ;;  %v234_v36 = vand.u32 4294901760, %v7335_v20  ;;  %v7366_v42 = vsub.f32 %v7265_v43, %v106_v49  ;;  %v7371_v56 = vsub.f32 %v7267_v44, %v109_v50 }
  0x3c   :  { %6046 = vmatpush3.bf16.msra.mxu1 %v7238_v32  ;;  %6118 = vmatpush3.bf16.msra.mxu0 %v7238_v32  ;;  %v6138_v59 = vpack.c.bf16 %v206_v17, %v199_v16  ;;  %v215_v60 = vand.u32 4294901760, %v214_v52  ;;  %v6066_v2 = vpack.c.bf16 %v208_v39, %v201_v35  ;;  %v248_v43 = vand.u32 4294901760, %v7351_v34  ;;  %v726_v35 = vld [vmem:[#allocation2 + $0xc0] sm:$0xff]  ;;  %v727_v39 = vld [vmem:[#allocation2 + $0xc8] sm:$0xff] }
  0x3d   :  { %6047 = vmatprep.subr.bf16.mxu1 %v9741_v0  ;;  %6119 = vmatprep.subr.bf16.mxu0 %v9741_v0  ;;  %v222_v3 = vand.u32 4294901760, %v221_v55  ;;  %v235_v4 = vsub.f32 %v7335_v20, %v234_v36  ;;  %v6141_v44 = vpack.c.bf16 %v220_v33, %v213_v25  ;;  %v262_v11 = vand.u32 4294901760, %v7371_v56 }
  0x3e   :  { %v249_v10 = vsub.f32 %v7351_v34, %v248_v43  ;;  %v760_v55 = vand.u32 4294901760, %v726_v35 }
  0x3f   :  { %v236_v9 = vand.u32 4294901760, %v235_v4  ;;  %v263_v22 = vsub.f32 %v7371_v56, %v262_v11 }
  0x40   :  { %6049 = vmatpush3.bf16.msra.mxu1 %v7262_v41  ;;  %6121 = vmatpush3.bf16.msra.mxu0 %v7262_v41  ;;  %v250_v17 = vand.u32 4294901760, %v249_v10 }
  0x41   :  { %6050 = vmatprep.subr.bf16.mxu1 %v9741_v0  ;;  %6122 = vmatprep.subr.bf16.mxu0 %v9741_v0  ;;  %v264_v45 = vand.u32 4294901760, %v263_v22 }
  0x44   :  { %6052 = vmatpush3.bf16.msra.mxu1 %v7287_v53  ;;  %6124 = vmatpush3.bf16.msra.mxu0 %v7287_v53 }
  0x45   :  { %6053 = vmatprep.subr.bf16.mxu1 %v9741_v0  ;;  %6125 = vmatprep.subr.bf16.mxu0 %v9741_v0 }
  0x48   :  { %6055 = vmatpush3.bf16.msra.mxu1 %v7308_v63  ;;  %6127 = vmatpush3.bf16.msra.mxu0 %v7308_v63 }
  0x49   :  { %6056 = vmatprep.subr.bf16.mxu1 %v9741_v0  ;;  %6128 = vmatprep.subr.bf16.mxu0 %v9741_v0 }
  0x4b   :  { %5225 = vmatmul.mubr.f32.vlgmr.msra.gmra.mrb[0].mxu1 %v148_v8  ;;  %5330 = vmatmul.mubr.f32.vlgmr.msra.gmra.mrb[0].mxu0 %v146_v51  ;;  %v6135_v51 = vpack.c.bf16 %v192_v62, %v185_v61  ;;  %v228_v61 = vsub.f32 %v7330_v19, %v227_v54  ;;  %v241_v62 = vand.u32 4294901760, %v7346_v28  ;;  %v6069_v8 = vpack.c.bf16 %v222_v3, %v215_v60  ;;  %v731_v3 = vld [vmem:[#allocation2 + $0xe8] sm:$0xff] }
  0x4c   :  { %6058 = vmatpush3.bf16.msra.mxu1 %v6057_v14  ;;  %6130 = vmatpush3.bf16.msra.mxu0 %v6129_v7  ;;  %v255_v7 = vand.u32 4294901760, %v7366_v42  ;;  %v6144_v14 = vpack.c.bf16 %v234_v36, %v227_v54  ;;  %v763_v36 = vand.u32 4294901760, %v727_v39 }
  0x4d   :  { %6059 = vmatprep.subr.bf16.mxu1 %v9741_v0  ;;  %6131 = vmatprep.subr.bf16.mxu0 %v9741_v0  ;;  %v229_v49 = vand.u32 4294901760, %v228_v61  ;;  %v242_v50 = vsub.f32 %v7346_v28, %v241_v62  ;;  %v6147_v25 = vpack.c.bf16 %v248_v43, %v241_v62  ;;  %v775_v43 = vand.u32 4294901760, %v731_v3 }
  0x4e   :  { %5259 = vmatprep.mubr.msk.f32.mxu1 %vm7139_vm0, %v9709_v1  ;;  %5364 = vmatprep.mubr.msk.f32.mxu0 %vm7139_vm0, %v9709_v1  ;;  %v6150_v33 = vpack.c.bf16 %v262_v11, %v255_v7  ;;  %v732_v11 = vld [vmem:[#allocation2 + $0xf0] sm:$0xff] }
  0x4f   :  { %v243_v15 = vand.u32 4294901760, %v242_v50  ;;  %v6072_v16 = vpack.c.bf16 %v236_v9, %v229_v49 }
  0x50   :  { %6061 = vmatpush3.bf16.msra.mxu1 %v6060_v26  ;;  %6133 = vmatpush3.bf16.msra.mxu0 %v6132_v21  ;;  %v256_v21 = vsub.f32 %v7366_v42, %v255_v7 }
  0x51   :  { %6062 = vmatprep.subr.bf16.mxu1 %v9741_v0  ;;  %6134 = vmatprep.subr.bf16.mxu0 %v9741_v0  ;;  %v6075_v24 = vpack.c.bf16 %v250_v17, %v243_v15  ;;  %v7488_v17 = vsub.f32 %v726_v35, %v760_v55 }
  0x52   :  { %v257_v26 = vand.u32 4294901760, %v256_v21  ;;  %v7490_v21 = vsub.f32 %v727_v39, %v763_v36 }
  0x54   :  { %6064 = vmatpush3.bf16.msra.mxu1 %v6063_v46  ;;  %6136 = vmatpush3.bf16.msra.mxu0 %v6135_v51  ;;  %v6078_v27 = vpack.c.bf16 %v264_v45, %v257_v26  ;;  %v6081_v46 = vpack.c.bf16 %v7234_v31, %v7230_v29  ;;  %v6084_v51 = vpack.c.bf16 %v7250_v38, %v7248_v37  ;;  %v719_v37 = vld [vmem:[#allocation2 + $0x88] sm:$0xff]  ;;  %v778_v45 = vand.u32 4294901760, %v732_v11 }
  0x55   :  { %6065 = vmatprep.subr.bf16.mxu1 %v9741_v0  ;;  %6137 = vmatprep.subr.bf16.mxu0 %v9741_v0  ;;  %v6087_v29 = vpack.c.bf16 %v7275_v48, %v7273_v47  ;;  %v6102_v31 = vpack.c.bf16 %v7371_v56, %v7366_v42  ;;  %v720_v48 = vld [vmem:[#allocation2 + $0x90] sm:$0xff]  ;;  %v7461_v42 = vpack.c.bf16 %v763_v36, %v760_v55 }
  0x56   :  { %v728_v56 = vld [vmem:[#allocation2 + $0xd0] sm:$0xff]  ;;  %v7499_v26 = vsub.f32 %v731_v3, %v775_v43 }
  0x57   :  { %v766_v60 = vand.u32 4294901760, %v728_v56 }
  0x58   :  { %6067 = vmatpush3.bf16.msra.mxu1 %v6066_v2  ;;  %6139 = vmatpush3.bf16.msra.mxu0 %v6138_v59  ;;  %v729_v59 = vld [vmem:[#allocation2 + $0xd8] sm:$0xff]  ;;  %v730_v2 = vld [vmem:[#allocation2 + $0xe0] sm:$0xff] }
  0x59   :  { %6068 = vmatprep.subr.bf16.mxu1 %v9741_v0  ;;  %6140 = vmatprep.subr.bf16.mxu0 %v9741_v0  ;;  %v769_v61 = vand.u32 4294901760, %v729_v59  ;;  %v772_v4 = vand.u32 4294901760, %v730_v2  ;;  %v7493_v22 = vsub.f32 %v728_v56, %v766_v60 }
  0x5b   :  { %v7465_v62 = vpack.c.bf16 %v769_v61, %v766_v60  ;;  %v7473_v50 = vpack.c.bf16 %v775_v43, %v772_v4  ;;  %v9702_v60 = vand.u32 4294901760, %v7490_v21 }
  0x5c   :  { %6070 = vmatpush3.bf16.msra.mxu1 %v6069_v8  ;;  %6142 = vmatpush3.bf16.msra.mxu0 %v6141_v44 }
  0x5d   :  { %6071 = vmatprep.subr.bf16.mxu1 %v9741_v0  ;;  %6143 = vmatprep.subr.bf16.mxu0 %v9741_v0  ;;  %v893_v3 = vsub.f32 %v7490_v21, %v9702_v60 }
  0x5f   :  { %v894_v43 = vand.u32 4294901760, %v893_v3 }
  0x60   :  { %6073 = vmatpush3.bf16.msra.mxu1 %v6072_v16  ;;  %6145 = vmatpush3.bf16.msra.mxu0 %v6144_v14  ;;  %v733_v14 = vld [vmem:[#allocation2 + $0xf8] sm:$0xff] }
  0x61   :  { %6074 = vmatprep.subr.bf16.mxu1 %v9741_v0  ;;  %6146 = vmatprep.subr.bf16.mxu0 %v9741_v0 }
  0x64   :  { %6076 = vmatpush3.bf16.msra.mxu1 %v6075_v24  ;;  %6148 = vmatpush3.bf16.msra.mxu0 %v6147_v25  ;;  %v7495_v24 = vsub.f32 %v729_v59, %v769_v61  ;;  %v7497_v25 = vsub.f32 %v730_v2, %v772_v4  ;;  %v9703_v59 = vand.u32 4294901760, %v7488_v17 }
  0x65   :  { %6077 = vmatprep.subr.bf16.mxu1 %v9741_v0  ;;  %6149 = vmatprep.subr.bf16.mxu0 %v9741_v0 }
  0x66   :  { %v886_v2 = vsub.f32 %v7488_v17, %v9703_v59 }
  0x68   :  { %6079 = vmatpush3.bf16.msra.mxu1 %v6078_v27  ;;  %6151 = vmatpush3.bf16.msra.mxu0 %v6150_v33  ;;  %v781_v27 = vand.u32 4294901760, %v733_v14  ;;  %v887_v4 = vand.u32 4294901760, %v886_v2 }
  0x69   :  { %6080 = vmatprep.subr.bf16.mxu1 %v9741_v0  ;;  %6152 = vmatprep.subr.bf16.mxu0 %v9741_v0 }
  0x6b   :  { %5260 = vmatmul.mubr.f32.vlgmr.msra.gmra.mrb[0].mxu1 %v7232_v30  ;;  %5365 = vmatmul.mubr.f32.vlgmr.msra.gmra.mrb[0].mxu0 %v7232_v30 }
  0x6c   :  { %6082 = vmatpush3.bf16.msra.mxu1 %v6081_v46  ;;  %6154 = vmatpush3.bf16.msra.mxu0 %v7197_v12  ;;  %v6090_v12 = vpack.c.bf16 %v7296_v58, %v7294_v57  ;;  %v742_v57 = vand.u32 4294901760, %v720_v48 }
  0x6d   :  { %6083 = vmatprep.subr.bf16.mxu1 %v9741_v0  ;;  %6155 = vmatprep.subr.bf16.mxu0 %v9741_v0 }
  0x6e   :  { %5294 = vmatprep.mubr.msk.f32.mxu1 %vm7139_vm0, %v9709_v1  ;;  %5399 = vmatprep.mubr.msk.f32.mxu0 %vm7139_vm0, %v9709_v1  ;;  %v7475_v7 = vsub.f32 %v720_v48, %v742_v57 }
  0x70   :  { %6085 = vmatpush3.bf16.msra.mxu1 %v6084_v51  ;;  %6157 = vmatpush3.bf16.msra.mxu0 %v7201_v13  ;;  %v6093_v13 = vpack.c.bf16 %v7317_v6, %v7314_v5  ;;  %v7503_v51 = vpack.c.bf16 %v781_v27, %v778_v45 }
  0x71   :  { %6086 = vmatprep.subr.bf16.mxu1 %v9741_v0  ;;  %6158 = vmatprep.subr.bf16.mxu0 %v9741_v0 }
  0x74   :  { %6088 = vmatpush3.bf16.msra.mxu1 %v6087_v29  ;;  %6160 = vmatpush3.bf16.msra.mxu0 %v7207_v18  ;;  %v6096_v18 = vpack.c.bf16 %v7335_v20, %v7330_v19  ;;  %v724_v20 = vld [vmem:[#allocation2 + $0xb0] sm:$0xff]  ;;  %v7505_v29 = vsub.f32 %v732_v11, %v778_v45  ;;  %v9701_v11 = vand.u32 4294901760, %v7493_v22  ;;  %v7559_v45 = vpack.c.bf16 %v894_v43, %v887_v4 }
  0x75   :  { %6089 = vmatprep.subr.bf16.mxu1 %v9741_v0  ;;  %6161 = vmatprep.subr.bf16.mxu0 %v9741_v0 }
  0x78   :  { %6091 = vmatpush3.bf16.msra.mxu1 %v6090_v12  ;;  %6163 = vmatpush3.bf16.msra.mxu0 %v7217_v23  ;;  %v6099_v23 = vpack.c.bf16 %v7351_v34, %v7346_v28  ;;  %v725_v28 = vld [vmem:[#allocation2 + $0xb8] sm:$0xff]  ;;  %v754_v34 = vand.u32 4294901760, %v724_v20  ;;  %v7507_v12 = vsub.f32 %v733_v14, %v781_v27  ;;  %v9700_v14 = vand.u32 4294901760, %v7495_v24 }
  0x79   :  { %6092 = vmatprep.subr.bf16.mxu1 %v9741_v0  ;;  %6164 = vmatprep.subr.bf16.mxu0 %v9741_v0  ;;  %v757_v52 = vand.u32 4294901760, %v725_v28  ;;  %v900_v27 = vsub.f32 %v7493_v22, %v9701_v11 }
  0x7a   :  { %v7484_v15 = vsub.f32 %v724_v20, %v754_v34 }
  0x7b   :  { %v7457_v54 = vpack.c.bf16 %v757_v52, %v754_v34  ;;  %v7486_v16 = vsub.f32 %v725_v28, %v757_v52 }
  0x7c   :  { %6094 = vmatpush3.bf16.msra.mxu1 %v6093_v13  ;;  %6166 = vmatpush3.bf16.msra.mxu0 %v7238_v32  ;;  %v718_v32 = vld [vmem:[#allocation2 + $0x80] sm:$0xff]  ;;  %v9705_v34 = vand.u32 4294901760, %v7484_v15 }
  0x7d   :  { %6095 = vmatprep.subr.bf16.mxu1 %v9741_v0  ;;  %6167 = vmatprep.subr.bf16.mxu0 %v9741_v0  ;;  %v736_v38 = vand.u32 4294901760, %v718_v32  ;;  %v9704_v52 = vand.u32 4294901760, %v7486_v16 }
  0x7e   :  { %v872_v39 = vsub.f32 %v7484_v15, %v9705_v34 }
  0x7f   :  { %v7469_v44 = vsub.f32 %v718_v32, %v736_v38  ;;  %v879_v55 = vsub.f32 %v7486_v16, %v9704_v52 }
  0x80   :  { %6097 = vmatpush3.bf16.msra.mxu1 %v6096_v18  ;;  %6169 = vmatpush3.bf16.msra.mxu0 %v7262_v41  ;;  %v739_v41 = vand.u32 4294901760, %v719_v37  ;;  %v873_v36 = vand.u32 4294901760, %v872_v39 }
  0x81   :  { %6098 = vmatprep.subr.bf16.mxu1 %v9741_v0  ;;  %6170 = vmatprep.subr.bf16.mxu0 %v9741_v0  ;;  %v829_v33 = vand.u32 4294901760, %v7469_v44  ;;  %v880_v56 = vand.u32 4294901760, %v879_v55 }
  0x82   :  { %v7445_v47 = vpack.c.bf16 %v739_v41, %v736_v38  ;;  %v7471_v49 = vsub.f32 %v719_v37, %v739_v41 }
  0x83   :  { %v830_v13 = vsub.f32 %v7469_v44, %v829_v33  ;;  %v7549_v61 = vpack.c.bf16 %v880_v56, %v873_v36 }
  0x84   :  { %6100 = vmatpush3.bf16.msra.mxu1 %v6099_v23  ;;  %6172 = vmatpush3.bf16.msra.mxu0 %v7287_v53  ;;  %v721_v53 = vld [vmem:[#allocation2 + $0x98] sm:$0xff]  ;;  %v836_v46 = vand.u32 4294901760, %v7471_v49  ;;  %v843_v23 = vand.u32 4294901760, %v7475_v7  ;;  %v6225_v4 = vpack.c.bf16 %v7471_v49, %v7469_v44 }
  0x85   :  { %6101 = vmatprep.subr.bf16.mxu1 %v9741_v0  ;;  %6173 = vmatprep.subr.bf16.mxu0 %v9741_v0  ;;  %v745_v58 = vand.u32 4294901760, %v721_v53  ;;  %v831_v32 = vand.u32 4294901760, %v830_v13  ;;  %v907_v13 = vsub.f32 %v7495_v24, %v9700_v14 }
  0x86   :  { %v837_v18 = vsub.f32 %v7471_v49, %v836_v46  ;;  %v844_v38 = vsub.f32 %v7475_v7, %v843_v23 }
  0x87   :  { %v7477_v8 = vsub.f32 %v721_v53, %v745_v58 }
  0x88   :  { %6103 = vmatpush3.bf16.msra.mxu1 %v6102_v31  ;;  %6175 = vmatpush3.bf16.msra.mxu0 %v7308_v63  ;;  %v723_v63 = vld [vmem:[#allocation2 + $0xa8] sm:$0xff]  ;;  %v838_v37 = vand.u32 4294901760, %v837_v18  ;;  %v901_v18 = vand.u32 4294901760, %v900_v27 }
  0x89   :  { %6176 = vmatprep.subr.bf16.mxu1 %v9741_v0  ;;  %v751_v6 = vand.u32 4294901760, %v723_v63  ;;  %v9708_v31 = vand.u32 4294901760, %v7477_v8  ;;  %v6228_v43 = vpack.c.bf16 %v7477_v8, %v7475_v7  ;;  %v9921_v7 = vand.u32 4294901760, %v7486_v16 }
  0x8b   :  { %5295 = vmatmul.mubr.f32.vlgmr.msra.gmra.mrb[0].mxu1 %v7254_v40  ;;  %5400 = vmatmul.mubr.f32.vlgmr.msra.gmra.mrb[0].mxu0 %v7232_v30  ;;  %v7449_v30 = vpack.c.bf16 %v745_v58, %v742_v57  ;;  %v722_v40 = vld [vmem:[#allocation2 + $0xa0] sm:$0xff]  ;;  %v7481_v10 = vsub.f32 %v723_v63, %v751_v6  ;;  %v851_v41 = vsub.f32 %v7477_v8, %v9708_v31  ;;  %v845_v58 = vand.u32 4294901760, %v844_v38 }
  0x8c   :  { %5434 = vmatprep.mubr.msk.f32.mxu1 %vm7139_vm0, %v9709_v1  ;;  %1552 = vmatprep.mubr.f32.mxu0 %v9709_v1  ;;  %v748_v5 = vand.u32 4294901760, %v722_v40  ;;  %v7527_v57 = vpack.c.bf16 %v838_v37, %v831_v32  ;;  %v908_v32 = vand.u32 4294901760, %v907_v13  ;;  %v9699_v37 = vand.u32 4294901760, %v7497_v25 }
  0x8d   :  { %6178 = vmatpush3.bf16.msra.mxu1 %v7445_v47  ;;  %v9706_v53 = vand.u32 4294901760, %v7481_v10  ;;  %v9698_v38 = vand.u32 4294901760, %v7499_v26  ;;  %v6234_v13 = vpack.c.bf16 %v7486_v16, %v7484_v15  ;;  %v9919_v49 = vand.u32 4294901760, %v7481_v10 }
  0x8e   :  { %6179 = vmatprep.subr.bf16.mxu1 %v9741_v0  ;;  %v7453_v19 = vpack.c.bf16 %v751_v6, %v748_v5  ;;  %v7479_v9 = vsub.f32 %v722_v40, %v748_v5  ;;  %v852_v40 = vand.u32 4294901760, %v851_v41  ;;  %v6216_v41 = vpack.c.bf16 %v908_v32, %v901_v18 }
  0x8f   :  { %v865_v5 = vsub.f32 %v7481_v10, %v9706_v53  ;;  %v6237_v18 = vpack.c.bf16 %v7490_v21, %v7488_v17  ;;  %v6240_v32 = vpack.c.bf16 %v7495_v24, %v7493_v22  ;;  %v9927_v16 = vand.u32 4294901760, %v7499_v26 }
  0x90   :  { %v9707_v48 = vand.u32 4294901760, %v7479_v9  ;;  %v7535_v6 = vpack.c.bf16 %v852_v40, %v845_v58  ;;  %v914_v58 = vsub.f32 %v7497_v25, %v9699_v37  ;;  %v921_v40 = vsub.f32 %v7499_v26, %v9698_v38 }
  0x91   :  { %6181 = vmatpush3.bf16.msra.mxu1 %v7449_v30  ;;  %v866_v28 = vand.u32 4294901760, %v865_v5  ;;  %v6231_v27 = vpack.c.bf16 %v7481_v10, %v7479_v9  ;;  %v9918_v44 = vand.u32 4294901760, %v7479_v9  ;;  %v9925_v10 = vand.u32 4294901760, %v7495_v24 }
  0x92   :  { %6182 = vmatprep.subr.bf16.mxu1 %v9741_v0  ;;  %v858_v63 = vsub.f32 %v7479_v9, %v9707_v48  ;;  %v922_v5 = vand.u32 4294901760, %v921_v40  ;;  %v6246_v40 = vpack.c.bf16 %v7507_v12, %v7505_v29  ;;  %v9924_v9 = vand.u32 4294901760, %v7493_v22 }
  0x94   :  { %v859_v20 = vand.u32 4294901760, %v858_v63  ;;  %v915_v63 = vand.u32 4294901760, %v914_v58  ;;  %v6243_v58 = vpack.c.bf16 %v7499_v26, %v7497_v25 }
  0x95   :  { %6184 = vmatpush3.bf16.msra.mxu1 %v7453_v19 }
  0x96   :  { %6185 = vmatprep.subr.bf16.mxu1 %v9741_v0  ;;  %v7539_v35 = vpack.c.bf16 %v866_v28, %v859_v20  ;;  %v9697_v20 = vand.u32 4294901760, %v7505_v29  ;;  %v9696_v28 = vand.u32 4294901760, %v7507_v12  ;;  %v6219_v39 = vpack.c.bf16 %v922_v5, %v915_v63  ;;  %v62_v63 = vld [vmem:[%s9694_s3] ss:$0 sm:$0xff] }
  0x98   :  { %v928_v55 = vsub.f32 %v7505_v29, %v9697_v20  ;;  %v935_v36 = vsub.f32 %v7507_v12, %v9696_v28 }
  0x99   :  { %6187 = vmatpush3.bf16.msra.mxu1 %v7457_v54 }
  0x9a   :  { %6188 = vmatprep.subr.bf16.mxu1 %v9741_v0  ;;  %v929_v56 = vand.u32 4294901760, %v928_v55  ;;  %v936_v2 = vand.u32 4294901760, %v935_v36 }
  0x9c   :  { %v6222_v3 = vpack.c.bf16 %v936_v2, %v929_v56 }
  0x9d   :  { %6190 = vmatpush3.bf16.msra.mxu1 %v7461_v42 }
  0x9e   :  { %6191 = vmatprep.subr.bf16.mxu1 %v9741_v0 }
  0xa1   :  { %6193 = vmatpush3.bf16.msra.mxu1 %v7465_v62 }
  0xa2   :  { %6194 = vmatprep.subr.bf16.mxu1 %v9741_v0 }
  0xa5   :  { %6196 = vmatpush3.bf16.msra.mxu1 %v7473_v50 }
  0xa6   :  { %6197 = vmatprep.subr.bf16.mxu1 %v9741_v0 }
  0xa9   :  { %6199 = vmatpush3.bf16.msra.mxu1 %v7503_v51 }
  0xaa   :  { %6200 = vmatprep.subr.bf16.mxu1 %v9741_v0 }
 0x15e   :  { %v405_v5 = vpop.f32.mrb[0].mxu1  ;;  %v700_v55 = vpop.f32.mrb[0].mxu0 }
 0x15f   :  { %v6992_v36 = vadd.f32 %v405_v5, %v62_v63  ;;  %v5296_v56 = vpop.f32.mrb[1].mxu1  ;;  %v5401_v2 = vpop.f32.mrb[1].mxu0 }
 0x160   :  { %v7796_v56 = vld [vmem:[#allocation4 + $0x60] sm:$0xff]  ;;  %v7798_v2 = vld [vmem:[#allocation4 + $0x78] sm:$0xff] }
 0x161   :  { %v6993_v28 = vadd.f32 %v6992_v36, %v700_v55 }
 0x163   :  { %v705_v20 = vmin.f32 %v6993_v28, 20.0  ;;  %vm704_vm2 = vcmp.gt.f32.partialorder %v6993_v28, 20.0 }
 0x165   :  { %v706_v38 = vmul.f32 1.442695, %v705_v20 }
 0x167   :  { %7058 = vpow2.f32 %v706_v38 }
 0x171   :  { %v7059_v37 = vpop.eup %7058 }
 0x172   :  { %v708_v14 = vadd.f32 1.0, %v7059_v37  ;;  %v711_v11 = vmul.f32 -0.5, %v7059_v37  ;;  %v714_v59 = vand.u32 2147483647, %v7059_v37 }
 0x174   :  { %7060 = vlog2.f32 %v708_v14  ;;  %v712_v60 = vadd.f32 1.0, %v711_v11  ;;  %vm715_vm1 = vcmp.lt.f32.partialorder %v714_v59, 0.0004427343  ;;  %v7743_v59 = vld [vmem:[#allocation4 + $0x38] sm:$0xff] }
 0x175   :  { %v9732_v11 = vand.u32 4294901760, %v7743_v59 }
 0x176   :  { %v713_v53 = vmul.f32 %v7059_v37, %v712_v60  ;;  %v7745_v60 = vld [vmem:[#allocation4 + $0x50] sm:$0xff]  ;;  %v7758_v37 = vld [vmem:[#allocation4 + $0x48] sm:$0xff] }
 0x177   :  { %v9731_v14 = vand.u32 4294901760, %v7745_v60 }
 0x17e   :  { %v7061_v52 = vpop.eup %7060 }
 0x17f   :  { %v710_v34 = vmul.f32 0.6931472, %v7061_v52 }
 0x181   :  { %v716_v48 = vsel %vm715_vm1, %v713_v53, %v710_v34  ;;  %v6288_v34 = vpack.c.bf16 %v9925_v10, %v9924_v9  ;;  %v7845_v10 = vld [vmem:[#allocation4 + $0xb8] sm:$0xff] }
 0x182   :  { %v717_v31 = vsel %vm704_vm2, %v6993_v28, %v716_v48  ;;  %v9917_v48 = vand.u32 4294901760, %v7477_v8 }
 0x183   :  { %v7602_v63 = vand.u32 4294901760, %v717_v31 }
 0x184   :  { %v6276_v53 = vpack.c.bf16 %v9917_v48, %v843_v23  ;;  %v9922_v23 = vand.u32 4294901760, %v7488_v17  ;;  %v9928_v17 = vand.u32 4294901760, %v7505_v29 }
 0x185   :  { %v817_v5 = vsub.f32 %v717_v31, %v7602_v63  ;;  %v6273_v31 = vpack.c.bf16 %v836_v46, %v829_v33  ;;  %v6279_v33 = vpack.c.bf16 %v9919_v49, %v9918_v44  ;;  %v9920_v46 = vand.u32 4294901760, %v7484_v15  ;;  %v7823_v44 = vld [vmem:[#allocation4 + $0x98] sm:$0xff]  ;;  %v7825_v49 = vld [vmem:[#allocation4 + $0xb0] sm:$0xff] }
 0x186   :  { %v9926_v15 = vand.u32 4294901760, %v7497_v25  ;;  %v7727_v25 = vld [vmem:[#allocation4 + $0x28] sm:$0xff] }
 0x187   :  { %v818_v55 = vand.u32 4294901760, %v817_v5  ;;  %v6282_v8 = vpack.c.bf16 %v9921_v7, %v9920_v46  ;;  %v9735_v29 = vand.u32 4294901760, %v7727_v25  ;;  %v9712_v46 = vand.u32 4294901760, %v7823_v44 }
 0x188   :  { %v6291_v52 = vpack.c.bf16 %v9927_v16, %v9926_v15  ;;  %v9711_v7 = vand.u32 4294901760, %v7825_v49  ;;  %v9718_v16 = vand.u32 4294901760, %v7845_v10 }
 0x189   :  { %v819_v20 = vsub.f32 %v817_v5, %v818_v55 }
 0x18a   :  { %v7853_v15 = vpack.c.bf16 %v9711_v7, %v9712_v46  ;;  %v7876_v46 = vld [vmem:[#allocation4 + $0xc0] sm:$0xff] }
 0x18b   :  { %v820_v38 = vand.u32 4294901760, %v819_v20  ;;  %v7805_v20 = vld [vmem:[#allocation4 + $0x88] sm:$0xff] }
 0x18c   :  { %v9715_v48 = vand.u32 4294901760, %v7805_v20  ;;  %9939 = vst [vmem:[#allocation17_spill] sm:$0xff] %v7853_v15 }
 0x18d   :  { %5435 = vmatmul.mubr.f32.vlgmr.msra.gmra.mrb[2].mxu1 %v820_v38 }
 0x18e   :  { %6202 = vmatpush3.bf16.msra.mxu1 %v7527_v57  ;;  %5469 = vmatprep.mubr.msk.f32.mxu1 %vm7139_vm0, %v9709_v1  ;;  %v9923_v57 = vand.u32 4294901760, %v7490_v21  ;;  %v9929_v21 = vand.u32 4294901760, %v7507_v12 }
 0x18f   :  { %6203 = vmatprep.subr.bf16.mxu1 %v9741_v0 }
 0x192   :  { %6205 = vmatpush3.bf16.msra.mxu1 %v7535_v6  ;;  %v6285_v6 = vpack.c.bf16 %v9923_v57, %v9922_v23  ;;  %v7838_v23 = vld [vmem:[#allocation4 + $0xa8] sm:$0xff]  ;;  %v7840_v57 = vld [vmem:[#allocation4 + $0xa0] sm:$0xff] }
 0x193   :  { %6206 = vmatprep.subr.bf16.mxu1 %v9741_v0  ;;  %v9713_v9 = vand.u32 4294901760, %v7838_v23 }
 0x196   :  { %6208 = vmatpush3.bf16.msra.mxu1 %v7539_v35  ;;  %v6294_v35 = vpack.c.bf16 %v9929_v21, %v9928_v17  ;;  %v7863_v17 = vld [vmem:[#allocation4 + $0xc8] sm:$0xff]  ;;  %v7865_v21 = vld [vmem:[#allocation4 + $0xe0] sm:$0xff] }
 0x197   :  { %6209 = vmatprep.subr.bf16.mxu1 %v9741_v0  ;;  %v9724_v7 = vand.u32 4294901760, %v7865_v21 }
 0x19a   :  { %6211 = vmatpush3.bf16.msra.mxu1 %v7549_v61 }
 0x19b   :  { %6212 = vmatprep.subr.bf16.mxu1 %v9741_v0 }
 0x19e   :  { %6214 = vmatpush3.bf16.msra.mxu1 %v7559_v45  ;;  %v7756_v45 = vld [vmem:[#allocation4 + $0x30] sm:$0xff] }
 0x19f   :  { %6215 = vmatprep.subr.bf16.mxu1 %v9741_v0  ;;  %v9730_v28 = vand.u32 4294901760, %v7756_v45 }
 0x1a2   :  { %6217 = vmatpush3.bf16.msra.mxu1 %v6216_v41  ;;  %v7760_v41 = vld [vmem:[#allocation4 + $0x40] sm:$0xff] }
 0x1a3   :  { %6218 = vmatprep.subr.bf16.mxu1 %v9741_v0 }
 0x1a6   :  { %6220 = vmatpush3.bf16.msra.mxu1 %v6219_v39  ;;  %v9727_v39 = vand.u32 4294901760, %v7758_v37 }
 0x1a7   :  { %6221 = vmatprep.subr.bf16.mxu1 %v9741_v0 }
 0x1aa   :  { %6223 = vmatpush3.bf16.msra.mxu1 %v6222_v3  ;;  %v7765_v3 = vld [vmem:[#allocation4 + $0x58] sm:$0xff] }
 0x1ab   :  { %6224 = vmatprep.subr.bf16.mxu1 %v9741_v0 }
 0x1ad   :  { %5470 = vmatmul.mubr.f32.vlgmr.msra.gmra.mrb[2].mxu1 %v7602_v63 }
 0x1ae   :  { %6226 = vmatpush3.bf16.msra.mxu1 %v6225_v4  ;;  %5504 = vmatprep.mubr.msk.f32.mxu1 %vm7139_vm0, %v9709_v1  ;;  %v9726_v4 = vand.u32 4294901760, %v7760_v41 }
 0x1af   :  { %6227 = vmatprep.subr.bf16.mxu1 %v9741_v0 }
 0x1b2   :  { %6229 = vmatpush3.bf16.msra.mxu1 %v6228_v43  ;;  %v7773_v43 = vpack.c.bf16 %v9731_v14, %v9732_v11  ;;  %v7925_v11 = vld [vmem:[#allocation4 + $0x118] sm:$0xff] }
 0x1b3   :  { %6230 = vmatprep.subr.bf16.mxu1 %v9741_v0 }
 0x1b4   :  { %9933 = vst [vmem:[#allocation11_spill] sm:$0xff] %v7773_v43 }
 0x1b6   :  { %6232 = vmatpush3.bf16.msra.mxu1 %v6231_v27  ;;  %v9723_v27 = vand.u32 4294901760, %v7765_v3 }
 0x1b7   :  { %6233 = vmatprep.subr.bf16.mxu1 %v9741_v0 }
 0x1ba   :  { %6235 = vmatpush3.bf16.msra.mxu1 %v6234_v13  ;;  %v7781_v13 = vpack.c.bf16 %v9727_v39, %v9730_v28  ;;  %v7916_v39 = vld [vmem:[#allocation4 + $0xf0] sm:$0xff] }
 0x1bb   :  { %6236 = vmatprep.subr.bf16.mxu1 %v9741_v0  ;;  %v9745_v28 = vand.u32 4294901760, %v7916_v39 }
 0x1bc   :  { %9934 = vst [vmem:[#allocation12_spill] sm:$0xff] %v7781_v13 }
 0x1be   :  { %6238 = vmatpush3.bf16.msra.mxu1 %v6237_v18  ;;  %v7783_v18 = vld [vmem:[#allocation4 + $0x68] sm:$0xff] }
 0x1bf   :  { %6239 = vmatprep.subr.bf16.mxu1 %v9741_v0 }
 0x1c2   :  { %6241 = vmatpush3.bf16.msra.mxu1 %v6240_v32  ;;  %v7785_v32 = vld [vmem:[#allocation4 + $0x80] sm:$0xff] }
 0x1c3   :  { %6242 = vmatprep.subr.bf16.mxu1 %v9741_v0  ;;  %v9721_v36 = vand.u32 4294901760, %v7785_v32 }
 0x1c6   :  { %6244 = vmatpush3.bf16.msra.mxu1 %v6243_v58  ;;  %v7792_v58 = vpack.c.bf16 %v9723_v27, %v9726_v4  ;;  %v7905_v27 = vld [vmem:[#allocation4 + $0x110] sm:$0xff] }
 0x1c7   :  { %6245 = vmatprep.subr.bf16.mxu1 %v9741_v0  ;;  %v9739_v4 = vand.u32 4294901760, %v7905_v27 }
 0x1c8   :  { %9935 = vst [vmem:[#allocation13_spill] sm:$0xff] %v7792_v58 }
 0x1ca   :  { %6247 = vmatpush3.bf16.msra.mxu1 %v6246_v40  ;;  %v9722_v40 = vand.u32 4294901760, %v7783_v18 }
 0x1cb   :  { %6248 = vmatprep.subr.bf16.mxu1 %v9741_v0 }
 0x1cd   :  { %5505 = vmatmul.mubr.f32.vlgmr.msra.gmra.mrb[2].mxu1 %v817_v5  ;;  %v9720_v5 = vand.u32 4294901760, %v7796_v56 }
 0x1ce   :  { %6250 = vmatpush3.bf16.msra.mxu1 %v7445_v47  ;;  %5539 = vmatprep.mubr.msk.f32.mxu1 %vm7139_vm0, %v9709_v1 }
 0x1cf   :  { %6251 = vmatprep.subr.bf16.mxu1 %v9741_v0 }
 0x1d2   :  { %6253 = vmatpush3.bf16.msra.mxu1 %v7449_v30 }
 0x1d3   :  { %6254 = vmatprep.subr.bf16.mxu1 %v9741_v0 }
 0x1d6   :  { %6256 = vmatpush3.bf16.msra.mxu1 %v7453_v19 }
 0x1d7   :  { %6257 = vmatprep.subr.bf16.mxu1 %v9741_v0 }
 0x1da   :  { %6259 = vmatpush3.bf16.msra.mxu1 %v7457_v54 }
 0x1db   :  { %6260 = vmatprep.subr.bf16.mxu1 %v9741_v0 }
 0x1de   :  { %6262 = vmatpush3.bf16.msra.mxu1 %v7461_v42 }
 0x1df   :  { %6263 = vmatprep.subr.bf16.mxu1 %v9741_v0 }
 0x1e2   :  { %6265 = vmatpush3.bf16.msra.mxu1 %v7465_v62 }
 0x1e3   :  { %6266 = vmatprep.subr.bf16.mxu1 %v9741_v0 }
 0x1e6   :  { %6268 = vmatpush3.bf16.msra.mxu1 %v7473_v50 }
 0x1e7   :  { %6269 = vmatprep.subr.bf16.mxu1 %v9741_v0 }
 0x1ea   :  { %6271 = vmatpush3.bf16.msra.mxu1 %v7503_v51 }
 0x1eb   :  { %6272 = vmatprep.subr.bf16.mxu1 %v9741_v0 }
 0x1ed   :  { %5540 = vmatmul.mubr.f32.vlgmr.msra.gmra.mrb[2].mxu1 %v818_v55  ;;  %v9717_v55 = vand.u32 4294901760, %v7798_v2 }
 0x1ee   :  { %6274 = vmatpush3.bf16.msra.mxu1 %v6273_v31  ;;  %5574 = vmatprep.mubr.msk.f32.mxu1 %vm7139_vm0, %v9709_v1  ;;  %v7813_v31 = vpack.c.bf16 %v9721_v36, %v9722_v40  ;;  %v7903_v40 = vld [vmem:[#allocation4 + $0xf8] sm:$0xff] }
 0x1ef   :  { %6275 = vmatprep.subr.bf16.mxu1 %v9741_v0 }
 0x1f0   :  { %9936 = vst [vmem:[#allocation14_spill] sm:$0xff] %v7813_v31 }
 0x1f2   :  { %6277 = vmatpush3.bf16.msra.mxu1 %v6276_v53  ;;  %v7821_v53 = vpack.c.bf16 %v9717_v55, %v9720_v5  ;;  %v7885_v55 = vld [vmem:[#allocation4 + $0xe8] sm:$0xff] }
 0x1f3   :  { %6278 = vmatprep.subr.bf16.mxu1 %v9741_v0  ;;  %v9733_v5 = vand.u32 4294901760, %v7885_v55 }
 0x1f4   :  { %9937 = vst [vmem:[#allocation15_spill] sm:$0xff] %v7821_v53 }
 0x1f6   :  { %6280 = vmatpush3.bf16.msra.mxu1 %v6279_v33 }
 0x1f7   :  { %6281 = vmatprep.subr.bf16.mxu1 %v9741_v0 }
 0x1fa   :  { %6283 = vmatpush3.bf16.msra.mxu1 %v6282_v8  ;;  %v7836_v8 = vld [vmem:[#allocation4 + $0x90] sm:$0xff] }
 0x1fb   :  { %6284 = vmatprep.subr.bf16.mxu1 %v9741_v0 }
 0x1fe   :  { %6286 = vmatpush3.bf16.msra.mxu1 %v6285_v6  ;;  %v9714_v6 = vand.u32 4294901760, %v7836_v8 }
 0x1ff   :  { %6287 = vmatprep.subr.bf16.mxu1 %v9741_v0 }
 0x202   :  { %6289 = vmatpush3.bf16.msra.mxu1 %v6288_v34  ;;  %v9719_v34 = vand.u32 4294901760, %v7840_v57 }
 0x203   :  { %6290 = vmatprep.subr.bf16.mxu1 %v9741_v0 }
 0x206   :  { %6292 = vmatpush3.bf16.msra.mxu1 %v6291_v52  ;;  %v7861_v52 = vpack.c.bf16 %v9713_v9, %v9714_v6  ;;  %v7878_v9 = vld [vmem:[#allocation4 + $0xd8] sm:$0xff]  ;;  %v7880_v6 = vld [vmem:[#allocation4 + $0xd0] sm:$0xff] }
 0x207   :  { %6293 = vmatprep.subr.bf16.mxu1 %v9741_v0 }
 0x208   :  { %9940 = vst [vmem:[#allocation18_spill] sm:$0xff] %v7861_v52 }
 0x20a   :  { %6295 = vmatpush3.bf16.msra.mxu1 %v6294_v35  ;;  %v7872_v35 = vpack.c.bf16 %v9718_v16, %v9719_v34  ;;  %v9734_v16 = vand.u32 4294901760, %v7880_v6 }
 0x20b   :  { %6296 = vmatprep.subr.bf16.mxu1 %v9741_v0 }
 0x20c   :  { %9941 = vst [vmem:[#allocation19_spill] sm:$0xff] %v7872_v35 }
 0x20d   :  { %5575 = vmatmul.mubr.f32.vlgmr.msra.gmra.mrb[2].mxu1 %v7602_v63 }
 0x20e   :  { %6298 = vmatpush3.bf16.msra.mxu1 %v7445_v47  ;;  %5609 = vmatprep.mubr.msk.f32.mxu1 %vm7139_vm0, %v9709_v1  ;;  %v7713_v47 = vld [vmem:[#allocation4 + $0x8] sm:$0xff] }
 0x20f   :  { %6299 = vmatprep.subr.bf16.mxu1 %v9741_v0 }
 0x212   :  { %6301 = vmatpush3.bf16.msra.mxu1 %v7449_v30  ;;  %v7715_v30 = vld [vmem:[#allocation4 + $0x20] sm:$0xff] }
 0x213   :  { %6302 = vmatprep.subr.bf16.mxu1 %v9741_v0 }
 0x216   :  { %6304 = vmatpush3.bf16.msra.mxu1 %v7453_v19  ;;  %v9746_v19 = vand.u32 4294901760, %v7713_v47 }
 0x217   :  { %6305 = vmatprep.subr.bf16.mxu1 %v9741_v0 }
 0x21a   :  { %6307 = vmatpush3.bf16.msra.mxu1 %v7457_v54  ;;  %v9743_v54 = vand.u32 4294901760, %v7715_v30 }
 0x21b   :  { %6308 = vmatprep.subr.bf16.mxu1 %v9741_v0 }
 0x21e   :  { %6310 = vmatpush3.bf16.msra.mxu1 %v7461_v42  ;;  %v7719_v42 = vld [vmem:[#allocation4] sm:$0xff] }
 0x21f   :  { %6311 = vmatprep.subr.bf16.mxu1 %v9741_v0  ;;  %v9738_v22 = vand.u32 4294901760, %v7719_v42 }
 0x222   :  { %6313 = vmatpush3.bf16.msra.mxu1 %v7465_v62  ;;  %v7721_v62 = vld [vmem:[#allocation4 + $0x18] sm:$0xff] }
 0x223   :  { %6314 = vmatprep.subr.bf16.mxu1 %v9741_v0  ;;  %v9737_v24 = vand.u32 4294901760, %v7721_v62 }
 0x225   :  { %v7741_v12 = vpack.c.bf16 %v9737_v24, %v9738_v22  ;;  %v7943_v24 = vld [vmem:[#allocation4 + $0x128] sm:$0xff]  ;;  %v7945_v22 = vld [vmem:[#allocation4 + $0x140] sm:$0xff] }
 0x226   :  { %6316 = vmatpush3.bf16.msra.mxu1 %v7473_v50  ;;  %v7723_v50 = vld [vmem:[#allocation4 + $0x10] sm:$0xff] }
 0x227   :  { %6317 = vmatprep.subr.bf16.mxu1 %v9741_v0  ;;  %v9736_v26 = vand.u32 4294901760, %v7723_v50  ;;  %9931 = vst [vmem:[#allocation9_spill] sm:$0xff] %v7741_v12 }
 0x229   :  { %v7752_v61 = vpack.c.bf16 %v9735_v29, %v9736_v26  ;;  %v9751_v29 = vand.u32 4294901760, %v7925_v11 }
 0x22a   :  { %6319 = vmatpush3.bf16.msra.mxu1 %v7503_v51  ;;  %v7734_v51 = vpack.c.bf16 %v9743_v54, %v9746_v19  ;;  %v7956_v54 = vld [vmem:[#allocation4 + $0x120] sm:$0xff] }
 0x22b   :  { %6512 = vmatprep.subr.bf16.mxu1 %v9741_v0  ;;  %9932 = vst [vmem:[#allocation10_spill] sm:$0xff] %v7752_v61  ;;  %v1506_v19 = vand.u32 4294901760, %v7956_v54 }
 0x22c   :  { %9930 = vst [vmem:[#allocation8_spill] sm:$0xff] %v7734_v51  ;;  %6321 = vmatprep.subr.bf16.mxu0 %v7734_v51  ;;  %v9962_v51 = vand.u32 4294901760, %v7760_v41 }
 0x22d   :  { %5610 = vmatmul.mubr.f32.vlgmr.msra.gmra.mrb[2].mxu1 %v7602_v63  ;;  %6323 = vmatpush1.bf16.msra.mxu0 %v7741_v12  ;;  %v7800_v63 = vld [vmem:[#allocation4 + $0x70] sm:$0xff] }
 0x22e   :  { %5644 = vmatprep.mubr.msk.f32.mxu1 %vm7139_vm0, %v9709_v1  ;;  %6514 = vmatpush3.bf16.msra.mxu1 %v7752_v61  ;;  %v9716_v38 = vand.u32 4294901760, %v7800_v63  ;;  %v9725_v1 = vand.u32 4294901760, %v7863_v17  ;;  %v9961_v61 = vand.u32 4294901760, %v7758_v37 }
 0x22f   :  { %6515 = vmatprep.subr.bf16.mxu1 %v9741_v0  ;;  %6325 = vmatprep.subr.bf16.mxu0 %v7773_v43  ;;  %v9960_v43 = vand.u32 4294901760, %v7756_v45 }
 0x230   :  { %v7832_v33 = vpack.c.bf16 %v9715_v48, %v9716_v38  ;;  %v9729_v48 = vand.u32 4294901760, %v7876_v46  ;;  %v9728_v38 = vand.u32 4294901760, %v7878_v9  ;;  %v7893_v34 = vpack.c.bf16 %v9724_v7, %v9725_v1 }
 0x231   :  { %6327 = vmatpush1.bf16.msra.mxu0 %v7781_v13  ;;  %v7912_v7 = vpack.c.bf16 %v9733_v5, %v9734_v16  ;;  %v9740_v1 = vand.u32 4294901760, %v7903_v40  ;;  %v8023_v12 = vsub.f32 %v7758_v37, %v9961_v61 }
 0x232   :  { %6517 = vmatpush3.bf16.msra.mxu1 %v7792_v58  ;;  %6329 = vmatprep.subr.bf16.mxu0 %v7813_v31  ;;  %9938 = vst [vmem:[#allocation16_spill] sm:$0xff] %v7832_v33  ;;  %9942 = vst [vmem:[#allocation20_spill] sm:$0xff] %v7893_v34  ;;  %v7901_v36 = vpack.c.bf16 %v9728_v38, %v9729_v48  ;;  %v7918_v38 = vld [vmem:[#allocation4 + $0x108] sm:$0xff]  ;;  %v7920_v48 = vld [vmem:[#allocation4 + $0x100] sm:$0xff]  ;;  %v9955_v31 = vmov 0.0|0.0  }
 0x233   :  { %6518 = vmatprep.subr.bf16.mxu1 %v9741_v0  ;;  %9944 = vst [vmem:[#allocation22_spill] sm:$0xff] %v7912_v7  ;;  %v9744_v14 = vand.u32 4294901760, %v7918_v38  ;;  %v9752_v5 = vand.u32 4294901760, %v7920_v48  ;;  %v7933_v16 = vpack.c.bf16 %v9739_v4, %v9740_v1  ;;  %v1504_v1 = vand.u32 4294901760, %v7943_v24  ;;  %v1433_v58 = vld [vmem:[#allocation4 + $0x158] sm:$0xff] }
 0x234   :  { %9943 = vst [vmem:[#allocation21_spill] sm:$0xff] %v7901_v36 }
 0x235   :  { %6331 = vmatpush1.bf16.msra.mxu0 %v7821_v53  ;;  %9945 = vst [vmem:[#allocation23_spill] sm:$0xff] %v7933_v16  ;;  %v7941_v26 = vpack.c.bf16 %v9744_v14, %v9745_v28  ;;  %v7952_v4 = vpack.c.bf16 %v9751_v29, %v9752_v5  ;;  %v7958_v14 = vld [vmem:[#allocation4 + $0x138] sm:$0xff]  ;;  %v7960_v28 = vld [vmem:[#allocation4 + $0x130] sm:$0xff]  ;;  %v9948_v5 = vand.u32 4294901760, %v7713_v47  ;;  %v9952_v53 = vand.u32 4294901760, %v7721_v62 }
 0x236   :  { %6520 = vmatpush3.bf16.msra.mxu1 %v7832_v33  ;;  %6333 = vmatprep.subr.bf16.mxu0 %v7853_v15  ;;  %v2348_v29 = vand.u32 4294901760, %v7960_v28  ;;  %v9951_v15 = vand.u32 4294901760, %v7719_v42 }
 0x237   :  { %6521 = vmatprep.subr.bf16.mxu1 %v9741_v0  ;;  %9946 = vst [vmem:[#allocation24_spill] sm:$0xff] %v7941_v26  ;;  %9947 = vst [vmem:[#allocation25_spill] sm:$0xff] %v7952_v4 }
 0x238   :  { %v7982_v33 = vsub.f32 %v7719_v42, %v9951_v15  ;;  %v1436_v42 = vld [vmem:[#allocation4 + $0x170] sm:$0xff] }
 0x239   :  { %6335 = vmatpush1.bf16.msra.mxu0 %v7861_v52  ;;  %v1516_v13 = vand.u32 4294901760, %v1436_v42 }
 0x23a   :  { %6523 = vmatpush3.bf16.msra.mxu1 %v7872_v35  ;;  %6337 = vmatprep.subr.bf16.mxu0 %v7893_v34  ;;  %v9949_v34 = vand.u32 4294901760, %v7715_v30 }
 0x23b   :  { %6524 = vmatprep.subr.bf16.mxu1 %v9741_v0 }
 0x23c   :  { %v7974_v35 = vsub.f32 %v7715_v30, %v9949_v34  ;;  %v9954_v34 = vand.u32 4294901760, %v7727_v25 }
 0x23d   :  { %6339 = vmatpush1.bf16.msra.mxu0 %v7901_v36  ;;  %v7969_v36 = vsub.f32 %v7713_v47, %v9948_v5  ;;  %v7987_v47 = vsub.f32 %v7721_v62, %v9952_v53  ;;  %v9953_v5 = vand.u32 4294901760, %v7723_v50  ;;  %v1512_v53 = vand.u32 4294901760, %v1433_v58 }
 0x23e   :  { %6526 = vmatpush3.bf16.msra.mxu1 %v7912_v7  ;;  %6341 = vmatprep.subr.bf16.mxu0 %v7933_v16  ;;  %v1510_v16 = vand.u32 4294901760, %v7958_v14  ;;  %v1431_v7 = vld [vmem:[#allocation4 + $0x148] sm:$0xff] }
 0x23f   :  { %6527 = vmatprep.subr.bf16.mxu1 %v9741_v0  ;;  %v1508_v0 = vand.u32 4294901760, %v7945_v22  ;;  %v2351_v52 = vand.u32 4294901760, %v1431_v7  ;;  %v7992_v30 = vsub.f32 %v7723_v50, %v9953_v5  ;;  %v9958_v50 = vand.u32 4294901760, %v7743_v59 }
 0x240   :  { %v8001_v15 = vpack.c.bf16 %v1510_v16, %v1506_v19 }
 0x241   :  { %6343 = vmatpush1.bf16.msra.mxu0 %v7941_v26  ;;  %v7977_v26 = vpack.c.bf16 %v1508_v0, %v1504_v1  ;;  %v8003_v62 = vpack.c.bf16 %v2351_v52, %v2348_v29  ;;  %v8008_v5 = vsub.f32 %v7743_v59, %v9958_v50  ;;  %v8028_v59 = vsub.f32 %v7760_v41, %v9962_v51 }
 0x242   :  { %6529 = vmatpush3.bf16.msra.mxu1 %v7952_v4  ;;  %v7997_v4 = vsub.f32 %v7727_v25, %v9954_v34  ;;  %9956 = vst [vmem:[#allocation27_spill] sm:$0xff] %v8001_v15  ;;  %v9959_v25 = vand.u32 4294901760, %v7745_v60  ;;  %v9963_v50 = vand.u32 4294901760, %v7765_v3  ;;  %v9966_v51 = vand.u32 4294901760, %v7796_v56 }
 0x243   :  { %9950 = vst [vmem:[#allocation26_spill] sm:$0xff] %v7977_v26  ;;  %6530 = vmatprep.subr.bf16.mxu1 %v9955_v31  ;;  %6345 = vmatprep.subr.bf16.mxu0 %v7977_v26  ;;  %9957 = vst [vmem:[#allocation28_spill] sm:$0xff] %v8003_v62  ;;  %v8018_v26 = vsub.f32 %v7756_v45, %v9960_v43  ;;  %v9965_v43 = vand.u32 4294901760, %v7785_v32  ;;  %v9967_v41 = vand.u32 4294901760, %v7798_v2 }
 0x244   :  { %v8013_v34 = vsub.f32 %v7745_v60, %v9959_v25  ;;  %v8033_v60 = vsub.f32 %v7765_v3, %v9963_v50  ;;  %v9964_v25 = vand.u32 4294901760, %v7783_v18  ;;  %v8049_v37 = vsub.f32 %v7796_v56, %v9966_v51 }
 0x245   :  { %v8043_v61 = vsub.f32 %v7785_v32, %v9965_v43  ;;  %6347 = vmatpush1.bf16.msra.mxu0 %v8001_v15  ;;  %v8054_v3 = vsub.f32 %v7798_v2, %v9967_v41  ;;  %v9969_v32 = vand.u32 4294901760, %v7805_v20  ;;  %v9970_v56 = vand.u32 4294901760, %v7823_v44 }
 0x246   :  { %v8038_v45 = vsub.f32 %v7783_v18, %v9964_v25  ;;  %v9968_v18 = vand.u32 4294901760, %v7800_v63  ;;  %6532 = vmatpush3.bf16.msra.mxu1 %v8003_v62  ;;  %v9971_v2 = vand.u32 4294901760, %v7825_v49  ;;  %v9986_v62 = vand.u32 4294901760, %v7920_v48 }
 0x247   :  { %v8064_v25 = vsub.f32 %v7805_v20, %v9969_v32  ;;  %v8070_v43 = vsub.f32 %v7823_v44, %v9970_v56  ;;  %v9973_v20 = vand.u32 4294901760, %v7838_v23  ;;  %6533 = vmatprep.subr.bf16.mxu1 %v9955_v31  ;;  %v9974_v44 = vand.u32 4294901760, %v7840_v57 }
 0x248   :  { %v8059_v50 = vsub.f32 %v7800_v63, %v9968_v18  ;;  %v8075_v51 = vsub.f32 %v7825_v49, %v9971_v2  ;;  %v9972_v63 = vand.u32 4294901760, %v7836_v8  ;;  %v9975_v49 = vand.u32 4294901760, %v7845_v10 }
 0x249   :  { %v8085_v18 = vsub.f32 %v7838_v23, %v9973_v20  ;;  %v8091_v32 = vsub.f32 %v7840_v57, %v9974_v44  ;;  %v9977_v23 = vand.u32 4294901760, %v7865_v21  ;;  %v9978_v20 = vand.u32 4294901760, %v7876_v46 }
 0x24a   :  { %v8080_v41 = vsub.f32 %v7836_v8, %v9972_v63  ;;  %v8096_v56 = vsub.f32 %v7845_v10, %v9975_v49  ;;  %v9976_v8 = vand.u32 4294901760, %v7863_v17  ;;  %v9979_v44 = vand.u32 4294901760, %v7878_v9 }
 0x24b   :  { %v8106_v63 = vsub.f32 %v7865_v21, %v9977_v23  ;;  %v8111_v57 = vsub.f32 %v7876_v46, %v9978_v20  ;;  %v9980_v49 = vand.u32 4294901760, %v7880_v6  ;;  %v9982_v23 = vand.u32 4294901760, %v7903_v40 }
 0x24c   :  { %v8101_v2 = vsub.f32 %v7863_v17, %v9976_v8  ;;  %v8116_v10 = vsub.f32 %v7878_v9, %v9979_v44  ;;  %v9981_v8 = vand.u32 4294901760, %v7885_v55  ;;  %v9983_v20 = vand.u32 4294901760, %v7905_v27 }
 0x24d   :  { %v8121_v17 = vsub.f32 %v7880_v6, %v9980_v49  ;;  %v8131_v46 = vsub.f32 %v7903_v40, %v9982_v23  ;;  %v9984_v44 = vand.u32 4294901760, %v7916_v39  ;;  %v9985_v49 = vand.u32 4294901760, %v7918_v38 }
 0x24e   :  { %v8126_v21 = vsub.f32 %v7885_v55, %v9981_v8  ;;  %v8136_v9 = vsub.f32 %v7905_v27, %v9983_v20  ;;  %v1432_v8 = vld [vmem:[#allocation4 + $0x150] sm:$0xff]  ;;  %v8151_v40 = vsub.f32 %v7920_v48, %v9986_v62  ;;  %v9988_v23 = vand.u32 4294901760, %v7925_v11 }
 0x24f   :  { %v8141_v6 = vsub.f32 %v7916_v39, %v9984_v44  ;;  %v8146_v55 = vsub.f32 %v7918_v38, %v9985_v49  ;;  %v8159_v20 = vsub.f32 %v7943_v24, %v1504_v1  ;;  %v8162_v39 = vsub.f32 %v7945_v22, %v1508_v0  ;;  %v1435_v44 = vld [vmem:[#allocation4 + $0x168] sm:$0xff]  ;;  %v1434_v38 = vld [vmem:[#allocation4 + $0x160] sm:$0xff]  ;;  %v1437_v49 = vld [vmem:[#allocation4 + $0x178] sm:$0xff] }
 0x250   :  { %9987 = vst [vmem:[#allocation29_spill] sm:$0xff] %v8151_v40  ;;  %v8156_v27 = vsub.f32 %v7925_v11, %v9988_v23  ;;  %v8165_v15 = vsub.f32 %v7956_v54, %v1506_v19  ;;  %v8168_v48 = vsub.f32 %v7958_v14, %v1510_v16  ;;  %v8171_v62 = vsub.f32 %v7960_v28, %v2348_v29 }
 0x251   :  { %9990 = vst [vmem:[#allocation31_spill] sm:$0xff] %v8159_v20  ;;  %9991 = vst [vmem:[#allocation32_spill] sm:$0xff] %v8162_v39  ;;  %v8173_v11 = vsub.f32 %v1431_v7, %v2351_v52  ;;  %v8175_v23 = vpack.c.bf16 %v1516_v13, %v1512_v53  ;;  %v8177_v1 = vsub.f32 %v1433_v58, %v1512_v53  ;;  %v1514_v22 = vand.u32 4294901760, %v1432_v8 }
 0x252   :  { %9989 = vst [vmem:[#allocation30_spill] sm:$0xff] %v8156_v27  ;;  %9992 = vst [vmem:[#allocation33_spill] sm:$0xff] %v8171_v62  ;;  %v8179_v0 = vsub.f32 %v1436_v42, %v1516_v13  ;;  %v1518_v24 = vand.u32 4294901760, %v1435_v44  ;;  %v2354_v39 = vand.u32 4294901760, %v1434_v38  ;;  %v2357_v20 = vand.u32 4294901760, %v1437_v49 }
 0x253   :  { %9993 = vst [vmem:[#allocation34_spill] sm:$0xff] %v8175_v23  ;;  %9994 = vst [vmem:[#allocation35_spill] sm:$0xff] %v8177_v1  ;;  %v9795_v19 = vand.u32 4294901760, %v7969_v36  ;;  %6349 = vmatprep.subr.bf16.mxu0 %v8175_v23  ;;  %v8183_v54 = vsub.f32 %v1432_v8, %v1514_v22  ;;  %v9794_v29 = vand.u32 4294901760, %v7974_v35  ;;  %v9793_v14 = vand.u32 4294901760, %v7982_v33 }
 0x254   :  { %9995 = vst [vmem:[#allocation36_spill] sm:$0xff] %v8179_v0  ;;  %v9796_v28 = vand.u32 4294901760, %v7987_v47  ;;  %v8188_v58 = vpack.c.bf16 %v1518_v24, %v1514_v22  ;;  %v8190_v13 = vsub.f32 %v1435_v44, %v1518_v24  ;;  %v8192_v7 = vpack.c.bf16 %v2357_v20, %v2354_v39 }
 0x255   :  { %9996 = vst [vmem:[#allocation37_spill] sm:$0xff] %v8183_v54  ;;  %v8194_v16 = vsub.f32 %v1434_v38, %v2354_v39  ;;  %v8196_v52 = vsub.f32 %v1437_v49, %v2357_v20  ;;  %v1567_v42 = vsub.f32 %v7969_v36, %v9795_v19  ;;  %v1579_v53 = vsub.f32 %v7974_v35, %v9794_v29 }
 0x256   :  { %9997 = vst [vmem:[#allocation38_spill] sm:$0xff] %v8188_v58  ;;  %9998 = vst [vmem:[#allocation39_spill] sm:$0xff] %v8190_v13  ;;  %v1573_v8 = vsub.f32 %v7982_v33, %v9793_v14  ;;  %6351 = vmatpush1.bf16.msra.mxu0 %v8188_v58  ;;  %6535 = vmatpush3.bf16.msra.mxu1 %v8192_v7  ;;  %v1585_v20 = vsub.f32 %v7987_v47, %v9796_v28  ;;  %v9801_v39 = vand.u32 4294901760, %v7992_v30 }
 0x257   :  { %9999 = vst [vmem:[#allocation40_spill] sm:$0xff] %v8192_v7  ;;  %10000 = vst [vmem:[#allocation41_spill] sm:$0xff] %v8194_v16  ;;  %v9805_v44 = vand.u32 4294901760, %v7997_v4  ;;  %v9806_v38 = vand.u32 4294901760, %v8008_v5  ;;  %v1568_v49 = vand.u32 4294901760, %v1567_v42  ;;  %v1580_v22 = vand.u32 4294901760, %v1579_v53  ;;  %6536 = vmatprep.subr.bf16.mxu1 %v9955_v31 }
 0x258   :  { %10001 = vst [vmem:[#allocation42_spill] sm:$0xff] %v8196_v52  ;;  %v1574_v24 = vand.u32 4294901760, %v1573_v8  ;;  %v9807_v14 = vand.u32 4294901760, %v8013_v34  ;;  %v1586_v29 = vand.u32 4294901760, %v1585_v20  ;;  %v2406_v19 = vsub.f32 %v7992_v30, %v9801_v39 }
 0x259   :  { %v2413_v28 = vsub.f32 %v7997_v4, %v9805_v44  ;;  %v1591_v7 = vsub.f32 %v8008_v5, %v9806_v38  ;;  %v6352_v42 = vpack.c.bf16 %v1580_v22, %v1568_v49  ;;  %v9810_v8 = vand.u32 4294901760, %v8018_v26 }
 0x25a   :  { %v1603_v53 = vsub.f32 %v8013_v34, %v9807_v14  ;;  %v9808_v20 = vand.u32 4294901760, %v8023_v12  ;;  %v8231_v58 = vpack.c.bf16 %v1586_v29, %v1574_v24  ;;  %v2407_v39 = vand.u32 4294901760, %v2406_v19 }
 0x25b   :  { %v2414_v23 = vand.u32 4294901760, %v2413_v28  ;;  %v1592_v31 = vand.u32 4294901760, %v1591_v7  ;;  %6353 = vmatprep.subr.bf16.mxu0 %v6352_v42  ;;  %v1597_v38 = vsub.f32 %v8018_v26, %v9810_v8  ;;  %v9809_v22 = vand.u32 4294901760, %v8028_v59 }
 0x25c   :  { %10002 = vst [vmem:[#allocation43_spill] sm:$0xff] %v8231_v58  ;;  %v1604_v44 = vand.u32 4294901760, %v1603_v53  ;;  %v1609_v49 = vsub.f32 %v8023_v12, %v9808_v20  ;;  %v9811_v29 = vand.u32 4294901760, %v8033_v60  ;;  %v9812_v19 = vand.u32 4294901760, %v8038_v45 }
 0x25d   :  { %v8240_v14 = vpack.c.bf16 %v2414_v23, %v2407_v39  ;;  %v9813_v28 = vand.u32 4294901760, %v8043_v61  ;;  %v1598_v24 = vand.u32 4294901760, %v1597_v38  ;;  %v2420_v53 = vsub.f32 %v8028_v59, %v9809_v22 }
 0x25e   :  { %v8245_v7 = vpack.c.bf16 %v1604_v44, %v1592_v31  ;;  %v1610_v42 = vand.u32 4294901760, %v1609_v49  ;;  %v2427_v20 = vsub.f32 %v8033_v60, %v9811_v29  ;;  %v1615_v23 = vsub.f32 %v8038_v45, %v9812_v19 }
 0x25f   :  { %10003 = vst [vmem:[#allocation44_spill] sm:$0xff] %v8240_v14  ;;  %v1627_v39 = vsub.f32 %v8043_v61, %v9813_v28  ;;  %v9814_v31 = vand.u32 4294901760, %v8049_v37  ;;  %v2421_v38 = vand.u32 4294901760, %v2420_v53  ;;  %v9815_v49 = vand.u32 4294901760, %v8054_v3 }
 0x260   :  { %10004 = vst [vmem:[#allocation45_spill] sm:$0xff] %v8245_v7  ;;  %v8260_v44 = vpack.c.bf16 %v1610_v42, %v1598_v24  ;;  %v9816_v22 = vand.u32 4294901760, %v8059_v50  ;;  %v2428_v8 = vand.u32 4294901760, %v2427_v20  ;;  %v1616_v7 = vand.u32 4294901760, %v1615_v23 }
 0x261   :  { %v1628_v29 = vand.u32 4294901760, %v1627_v39  ;;  %v1621_v19 = vsub.f32 %v8049_v37, %v9814_v31  ;;  %v1633_v28 = vsub.f32 %v8054_v3, %v9815_v49  ;;  %v9817_v42 = vand.u32 4294901760, %v8064_v25 }
 0x262   :  { %10005 = vst [vmem:[#allocation46_spill] sm:$0xff] %v8260_v44  ;;  %v2434_v24 = vsub.f32 %v8059_v50, %v9816_v22  ;;  %v9818_v53 = vand.u32 4294901760, %v8070_v43  ;;  %v8275_v44 = vpack.c.bf16 %v2428_v8, %v2421_v38  ;;  %v9819_v39 = vand.u32 4294901760, %v8075_v51 }
 0x263   :  { %v8277_v20 = vpack.c.bf16 %v1628_v29, %v1616_v7  ;;  %v1622_v23 = vand.u32 4294901760, %v1621_v19  ;;  %v1634_v31 = vand.u32 4294901760, %v1633_v28  ;;  %v2441_v49 = vsub.f32 %v8064_v25, %v9817_v42 }
 0x264   :  { %10006 = vst [vmem:[#allocation47_spill] sm:$0xff] %v8275_v44  ;;  %v2435_v14 = vand.u32 4294901760, %v2434_v24  ;;  %v1639_v22 = vsub.f32 %v8070_v43, %v9818_v53  ;;  %v1651_v8 = vsub.f32 %v8075_v51, %v9819_v39  ;;  %v9820_v29 = vand.u32 4294901760, %v8080_v41 }
 0x265   :  { %10007 = vst [vmem:[#allocation48_spill] sm:$0xff] %v8277_v20  ;;  %v9821_v19 = vand.u32 4294901760, %v8085_v18  ;;  %v9822_v7 = vand.u32 4294901760, %v8091_v32  ;;  %v8292_v28 = vpack.c.bf16 %v1634_v31, %v1622_v23  ;;  %v2442_v38 = vand.u32 4294901760, %v2441_v49 }
 0x266   :  { %v1640_v24 = vand.u32 4294901760, %v1639_v22  ;;  %v9823_v42 = vand.u32 4294901760, %v8096_v56  ;;  %v1652_v20 = vand.u32 4294901760, %v1651_v8  ;;  %v1645_v53 = vsub.f32 %v8080_v41, %v9820_v29 }
 0x267   :  { %10008 = vst [vmem:[#allocation49_spill] sm:$0xff] %v8292_v28  ;;  %v1657_v39 = vsub.f32 %v8085_v18, %v9821_v19  ;;  %v2448_v44 = vsub.f32 %v8091_v32, %v9822_v7  ;;  %v8304_v58 = vpack.c.bf16 %v2442_v38, %v2435_v14  ;;  %v9826_v31 = vand.u32 4294901760, %v8101_v2 }
 0x268   :  { %v2455_v22 = vsub.f32 %v8096_v56, %v9823_v42  ;;  %v9824_v49 = vand.u32 4294901760, %v8106_v63  ;;  %v8311_v23 = vpack.c.bf16 %v1652_v20, %v1640_v24  ;;  %v1646_v8 = vand.u32 4294901760, %v1645_v53 }
 0x269   :  { %10009 = vst [vmem:[#allocation50_spill] sm:$0xff] %v8304_v58  ;;  %v1658_v29 = vand.u32 4294901760, %v1657_v39  ;;  %v2449_v28 = vand.u32 4294901760, %v2448_v44  ;;  %v1663_v7 = vsub.f32 %v8101_v2, %v9826_v31  ;;  %v9825_v38 = vand.u32 4294901760, %v8111_v57 }
 0x26a   :  { %10010 = vst [vmem:[#allocation51_spill] sm:$0xff] %v8311_v23  ;;  %v2456_v19 = vand.u32 4294901760, %v2455_v22  ;;  %v1675_v14 = vsub.f32 %v8106_v63, %v9824_v49  ;;  %v9827_v58 = vand.u32 4294901760, %v8116_v10  ;;  %v9828_v20 = vand.u32 4294901760, %v8121_v17 }
 0x26b   :  { %v8320_v42 = vpack.c.bf16 %v1658_v29, %v1646_v8  ;;  %v9829_v53 = vand.u32 4294901760, %v8126_v21  ;;  %v1664_v39 = vand.u32 4294901760, %v1663_v7  ;;  %v1669_v22 = vsub.f32 %v8111_v57, %v9825_v38 }
 0x26c   :  { %v8325_v44 = vpack.c.bf16 %v2456_v19, %v2449_v28  ;;  %v1676_v24 = vand.u32 4294901760, %v1675_v14  ;;  %v1681_v49 = vsub.f32 %v8116_v10, %v9827_v58  ;;  %v2462_v29 = vsub.f32 %v8121_v17, %v9828_v20 }
 0x26d   :  { %10011 = vst [vmem:[#allocation52_spill] sm:$0xff] %v8320_v42  ;;  %v2469_v8 = vsub.f32 %v8126_v21, %v9829_v53  ;;  %v9830_v19 = vand.u32 4294901760, %v8131_v46  ;;  %v1670_v28 = vand.u32 4294901760, %v1669_v22  ;;  %v9831_v14 = vand.u32 4294901760, %v8136_v9 }
 0x26e   :  { %10012 = vst [vmem:[#allocation53_spill] sm:$0xff] %v8325_v44  ;;  %v8340_v7 = vpack.c.bf16 %v1676_v24, %v1664_v39  ;;  %v9832_v38 = vand.u32 4294901760, %v8141_v6  ;;  %v1682_v31 = vand.u32 4294901760, %v1681_v49  ;;  %v2463_v44 = vand.u32 4294901760, %v2462_v29 }
 0x26f   :  { %v2470_v58 = vand.u32 4294901760, %v2469_v8  ;;  %v1687_v20 = vsub.f32 %v8131_v46, %v9830_v19  ;;  %v1699_v53 = vsub.f32 %v8136_v9, %v9831_v14  ;;  %v9833_v24 = vand.u32 4294901760, %v8146_v55 }
 0x270   :  { %10013 = vst [vmem:[#allocation54_spill] sm:$0xff] %v8340_v7  ;;  %v1693_v39 = vsub.f32 %v8141_v6, %v9832_v38  ;;  %v9834_v22 = vand.u32 4294901760, %v8151_v40  ;;  %v8355_v7 = vpack.c.bf16 %v1682_v31, %v1670_v28  ;;  %v9835_v8 = vand.u32 4294901760, %v8156_v27  ;;  %v10016_v28 = vld [vmem:[#allocation31_spill] sm:$0xff] }
 0x271   :  { %v8357_v49 = vpack.c.bf16 %v2470_v58, %v2463_v44  ;;  %v1688_v29 = vand.u32 4294901760, %v1687_v20  ;;  %v1700_v19 = vand.u32 4294901760, %v1699_v53  ;;  %v1705_v14 = vsub.f32 %v8146_v55, %v9833_v24  ;;  %v10017_v44 = vld [vmem:[#allocation32_spill] sm:$0xff] }
 0x272   :  { %10014 = vst [vmem:[#allocation55_spill] sm:$0xff] %v8355_v7  ;;  %v1694_v42 = vand.u32 4294901760, %v1693_v39  ;;  %v2476_v38 = vsub.f32 %v8151_v40, %v9834_v22  ;;  %v2483_v31 = vsub.f32 %v8156_v27, %v9835_v8  ;;  %v9840_v58 = vand.u32 4294901760, %v10016_v28 }
 0x273   :  { %10015 = vst [vmem:[#allocation56_spill] sm:$0xff] %v8357_v49  ;;  %v9841_v20 = vand.u32 4294901760, %v10017_v44  ;;  %v9842_v49 = vand.u32 4294901760, %v8165_v15  ;;  %v8372_v53 = vpack.c.bf16 %v1700_v19, %v1688_v29  ;;  %v1706_v39 = vand.u32 4294901760, %v1705_v14 }
 0x274   :  { %v2477_v7 = vand.u32 4294901760, %v2476_v38  ;;  %v9843_v24 = vand.u32 4294901760, %v8168_v48  ;;  %v2484_v23 = vand.u32 4294901760, %v2483_v31  ;;  %v1711_v22 = vsub.f32 %v10016_v28, %v9840_v58 }
 0x275   :  { %10018 = vst [vmem:[#allocation31_spill] sm:$0xff] %v8372_v53  ;;  %v1723_v8 = vsub.f32 %v10017_v44, %v9841_v20  ;;  %v1717_v27 = vsub.f32 %v8165_v15, %v9842_v49  ;;  %v8384_v40 = vpack.c.bf16 %v1706_v39, %v1694_v42  ;;  %v9846_v19 = vand.u32 4294901760, %v8171_v62 }
 0x276   :  { %v1729_v38 = vsub.f32 %v8168_v48, %v9843_v24  ;;  %v9844_v14 = vand.u32 4294901760, %v8173_v11  ;;  %v8391_v29 = vpack.c.bf16 %v2484_v23, %v2477_v7  ;;  %v1712_v31 = vand.u32 4294901760, %v1711_v22 }
 0x277   :  { %10019 = vst [vmem:[#allocation32_spill] sm:$0xff] %v8384_v40  ;;  %v1724_v58 = vand.u32 4294901760, %v1723_v8  ;;  %v1718_v53 = vand.u32 4294901760, %v1717_v27  ;;  %v2490_v49 = vsub.f32 %v8171_v62, %v9846_v19  ;;  %v9845_v39 = vand.u32 4294901760, %v8177_v1 }
 0x278   :  { %v1730_v20 = vand.u32 4294901760, %v1729_v38  ;;  %v2497_v42 = vsub.f32 %v8173_v11, %v9844_v14  ;;  %v9847_v40 = vand.u32 4294901760, %v8179_v0  ;;  %v9848_v23 = vand.u32 4294901760, %v8183_v54 }
 0x279   :  { %v8400_v24 = vpack.c.bf16 %v1724_v58, %v1712_v31  ;;  %v9849_v7 = vand.u32 4294901760, %v8190_v13  ;;  %v2491_v22 = vand.u32 4294901760, %v2490_v49  ;;  %v1735_v38 = vsub.f32 %v8177_v1, %v9845_v39 }
 0x27a   :  { %v8405_v27 = vpack.c.bf16 %v1730_v20, %v1718_v53  ;;  %v2498_v8 = vand.u32 4294901760, %v2497_v42  ;;  %v1747_v14 = vsub.f32 %v8179_v0, %v9847_v40  ;;  %v1741_v58 = vsub.f32 %v8183_v54, %v9848_v23 }
 0x27b   :  { %v1753_v31 = vsub.f32 %v8190_v13, %v9849_v7  ;;  %v9850_v20 = vand.u32 4294901760, %v8194_v16  ;;  %v1736_v53 = vand.u32 4294901760, %v1735_v38  ;;  %v9851_v42 = vand.u32 4294901760, %v8196_v52 }
 0x27c   :  { %10020 = vst [vmem:[#allocation57_spill] sm:$0xff] %v8405_v27  ;;  %v8420_v49 = vpack.c.bf16 %v2498_v8, %v2491_v22  ;;  %v1748_v19 = vand.u32 4294901760, %v1747_v14  ;;  %v1742_v40 = vand.u32 4294901760, %v1741_v58  ;;  %v10021_v22 = vld [vmem:[#allocation29_spill] sm:$0xff] }
 0x27d   :  { %v1754_v27 = vand.u32 4294901760, %v1753_v31  ;;  %v2504_v23 = vsub.f32 %v8194_v16, %v9850_v20  ;;  %v2511_v7 = vsub.f32 %v8196_v52, %v9851_v42  ;;  %v10022_v42 = vld [vmem:[#allocation30_spill] sm:$0xff] }
 0x27e   :  { %v8437_v14 = vpack.c.bf16 %v1748_v19, %v1736_v53 }
 0x27f   :  { %v8439_v58 = vpack.c.bf16 %v1754_v27, %v1742_v40  ;;  %v2505_v31 = vand.u32 4294901760, %v2504_v23  ;;  %v2512_v39 = vand.u32 4294901760, %v2511_v7  ;;  %v734_v7 = vld [vmem:[%s9694_s3 + $0x1] ss:$0 sm:$0xff] }
 0x281   :  { %v8457_v27 = vpack.c.bf16 %v2512_v39, %v2505_v31 }
 0x300   :  { %v1372_v39 = vpop.f32.mrb[2].mxu1 }
 0x301   :  { %v6994_v53 = vadd.f32 %v1372_v39, %v734_v7  ;;  %v5611_v20 = vpop.f32.mrb[3].mxu1  ;;  %v10031_v7 = vld [vmem:[#allocation49_spill] sm:$0xff]  ;;  %v10033_v39 = vld [vmem:[#allocation51_spill] sm:$0xff] }
 0x303   :  { %v1377_v31 = vmin.f32 %v6994_v53, 20.0  ;;  %vm1376_vm4 = vcmp.gt.f32.partialorder %v6994_v53, 20.0 }
 0x305   :  { %v1378_v38 = vmul.f32 1.442695, %v1377_v31  ;;  %v10034_v31 = vld [vmem:[#allocation52_spill] sm:$0xff] }
 0x307   :  { %7062 = vpow2.f32 %v1378_v38 }
 0x311   :  { %v7063_v8 = vpop.eup %7062 }
 0x312   :  { %v1380_v62 = vadd.f32 1.0, %v7063_v8  ;;  %v1383_v19 = vmul.f32 -0.5, %v7063_v8  ;;  %v1386_v0 = vand.u32 2147483647, %v7063_v8 }
 0x314   :  { %7064 = vlog2.f32 %v1380_v62  ;;  %v1384_v1 = vadd.f32 1.0, %v1383_v19  ;;  %vm1387_vm3 = vcmp.lt.f32.partialorder %v1386_v0, 0.0004427343  ;;  %v10025_v0 = vld [vmem:[#allocation45_spill] sm:$0xff] }
 0x316   :  { %v1385_v13 = vmul.f32 %v7063_v8, %v1384_v1  ;;  %v10024_v1 = vld [vmem:[#allocation44_spill] sm:$0xff]  ;;  %v10029_v8 = vld [vmem:[#allocation47_spill] sm:$0xff] }
 0x31e   :  { %v7065_v40 = vpop.eup %7064 }
 0x31f   :  { %v1382_v54 = vmul.f32 0.6931472, %v7065_v40  ;;  %v10023_v40 = vld [vmem:[#allocation43_spill] sm:$0xff] }
 0x321   :  { %v1388_v23 = vsel %vm1387_vm3, %v1385_v13, %v1382_v54  ;;  %v10026_v54 = vmov 0.0|0.0   ;;  %v10027_v13 = vmov 0.0  }
 0x322   :  { %v1389_v16 = vsel %vm1376_vm4, %v6994_v53, %v1388_v23  ;;  %v10030_v23 = vld [vmem:[#allocation48_spill] sm:$0xff]  ;;  %v10032_v53 = vld [vmem:[#allocation50_spill] sm:$0xff] }
 0x323   :  { %v8486_v52 = vand.u32 4294901760, %v1389_v16 }
 0x325   :  { %v8489_v20 = vsub.f32 %v1389_v16, %v8486_v52  ;;  %v10028_v16 = vld [vmem:[#allocation46_spill] sm:$0xff] }
 0x327   :  { %v8492_v38 = vand.u32 4294901760, %v8489_v20 }
 0x329   :  { %v1556_v62 = vsub.f32 %v8489_v20, %v8492_v38 }
 0x32b   :  { %v1557_v19 = vand.u32 4294901760, %v1556_v62  ;;  %v10035_v62 = vld [vmem:[#allocation53_spill] sm:$0xff] }
 0x32d   :  { %1558 = vmatmul.mubr.f32.vlgmr.msra.gmra.mrb[2].mxu0 %v1557_v19  ;;  %5645 = vmatmul.mubr.f32.vlgmr.msra.gmra.mrb[4].mxu1 %v1557_v19  ;;  %v10036_v19 = vld [vmem:[#allocation54_spill] sm:$0xff] }
 0x32e   :  { %6355 = vmatpush1.bf16.msra.mxu0 %v10023_v40  ;;  %6538 = vmatpush3.bf16.msra.mxu1 %v10024_v1  ;;  %v10037_v40 = vld [vmem:[#allocation55_spill] sm:$0xff]  ;;  %v10038_v1 = vld [vmem:[#allocation56_spill] sm:$0xff] }
 0x32f   :  { %6357 = vmatprep.subr.bf16.mxu0 %v10025_v0  ;;  %6539 = vmatprep.subr.bf16.mxu1 %v10026_v54  ;;  %v10039_v0 = vld [vmem:[#allocation31_spill] sm:$0xff] }
 0x330   :  { %1788 = vmatprep.mubr.f32.mxu0 %v10027_v13  ;;  %5679 = vmatprep.mubr.msk.f32.mxu1 %vm7139_vm0, %v10027_v13 }
 0x332   :  { %6359 = vmatpush1.bf16.msra.mxu0 %v10028_v16  ;;  %6541 = vmatpush3.bf16.msra.mxu1 %v10029_v8  ;;  %v10040_v16 = vld [vmem:[#allocation32_spill] sm:$0xff]  ;;  %v10041_v8 = vld [vmem:[#allocation57_spill] sm:$0xff] }
 0x333   :  { %6361 = vmatprep.subr.bf16.mxu0 %v10030_v23  ;;  %6542 = vmatprep.subr.bf16.mxu1 %v10026_v54  ;;  %v10042_v23 = vpack.c.bf16 %v7974_v35, %v7969_v36 }
 0x336   :  { %6363 = vmatpush1.bf16.msra.mxu0 %v10031_v7  ;;  %6544 = vmatpush3.bf16.msra.mxu1 %v10032_v53  ;;  %v10049_v7 = vpack.c.bf16 %v8054_v3, %v8049_v37  ;;  %v10050_v53 = vpack.c.bf16 %v8064_v25, %v8059_v50 }
 0x337   :  { %6365 = vmatprep.subr.bf16.mxu0 %v10033_v39  ;;  %6545 = vmatprep.subr.bf16.mxu1 %v10026_v54  ;;  %v10051_v39 = vpack.c.bf16 %v8075_v51, %v8070_v43 }
 0x33a   :  { %6367 = vmatpush1.bf16.msra.mxu0 %v10034_v31  ;;  %6547 = vmatpush3.bf16.msra.mxu1 %v10035_v62  ;;  %v10052_v31 = vpack.c.bf16 %v8085_v18, %v8080_v41  ;;  %v10053_v62 = vpack.c.bf16 %v8096_v56, %v8091_v32 }
 0x33b   :  { %6369 = vmatprep.subr.bf16.mxu0 %v10036_v19  ;;  %6548 = vmatprep.subr.bf16.mxu1 %v10026_v54  ;;  %v10054_v19 = vpack.c.bf16 %v8106_v63, %v8101_v2 }
 0x33e   :  { %6371 = vmatpush1.bf16.msra.mxu0 %v10037_v40  ;;  %6550 = vmatpush3.bf16.msra.mxu1 %v10038_v1  ;;  %v10055_v40 = vpack.c.bf16 %v8116_v10, %v8111_v57  ;;  %v10056_v1 = vpack.c.bf16 %v8126_v21, %v8121_v17 }
 0x33f   :  { %6373 = vmatprep.subr.bf16.mxu0 %v10039_v0  ;;  %6551 = vmatprep.subr.bf16.mxu1 %v10026_v54  ;;  %v10057_v0 = vpack.c.bf16 %v8136_v9, %v8131_v46 }
 0x342   :  { %6375 = vmatpush1.bf16.msra.mxu0 %v10040_v16  ;;  %6553 = vmatpush3.bf16.msra.mxu1 %v8391_v29  ;;  %v10044_v29 = vpack.c.bf16 %v7997_v4, %v7992_v30  ;;  %v10058_v16 = vpack.c.bf16 %v8146_v55, %v8141_v6 }
 0x343   :  { %6377 = vmatprep.subr.bf16.mxu0 %v8400_v24  ;;  %6554 = vmatprep.subr.bf16.mxu1 %v10026_v54  ;;  %v10043_v24 = vpack.c.bf16 %v7987_v47, %v7982_v33 }
 0x346   :  { %6379 = vmatpush1.bf16.msra.mxu0 %v10041_v8  ;;  %6556 = vmatpush3.bf16.msra.mxu1 %v8420_v49  ;;  %v10045_v49 = vpack.c.bf16 %v8013_v34, %v8008_v5  ;;  %v10059_v8 = vpack.c.bf16 %v10022_v42, %v10021_v22 }
 0x347   :  { %6381 = vmatprep.subr.bf16.mxu0 %v8437_v14  ;;  %6557 = vmatprep.subr.bf16.mxu1 %v10026_v54  ;;  %v10046_v14 = vpack.c.bf16 %v8023_v12, %v8018_v26 }
 0x34a   :  { %6383 = vmatpush1.bf16.msra.mxu0 %v8439_v58  ;;  %6559 = vmatpush3.bf16.msra.mxu1 %v8457_v27  ;;  %v10047_v58 = vpack.c.bf16 %v8033_v60, %v8028_v59  ;;  %v10048_v27 = vpack.c.bf16 %v8043_v61, %v8038_v45 }
 0x34b   :  { %6385 = vmatprep.subr.bf16.mxu0 %v10042_v23  ;;  %6560 = vmatprep.subr.bf16.mxu1 %v10026_v54  ;;  %v10060_v23 = vpack.c.bf16 %v10017_v44, %v10016_v28 }
 0x34d   :  { %1790 = vmatmul.mubr.f32.vlgmr.msra.gmra.mrb[2].mxu0 %v8486_v52  ;;  %5680 = vmatmul.mubr.f32.vlgmr.msra.gmra.mrb[4].mxu1 %v8486_v52 }
 0x34e   :  { %6387 = vmatpush1.bf16.msra.mxu0 %v10043_v24  ;;  %6562 = vmatpush3.bf16.msra.mxu1 %v10044_v29  ;;  %v10061_v24 = vpack.c.bf16 %v8168_v48, %v8165_v15  ;;  %v10062_v29 = vld [vmem:[#allocation33_spill] sm:$0xff] }
 0x34f   :  { %6389 = vmatprep.subr.bf16.mxu0 %v10045_v49  ;;  %6563 = vmatprep.subr.bf16.mxu1 %v10026_v54  ;;  %v10063_v49 = vpack.c.bf16 %v8173_v11, %v10062_v29 }
 0x350   :  { %1924 = vmatprep.mubr.f32.mxu0 %v10027_v13  ;;  %5714 = vmatprep.mubr.msk.f32.mxu1 %vm7139_vm0, %v10027_v13 }
 0x352   :  { %6391 = vmatpush1.bf16.msra.mxu0 %v10046_v14  ;;  %6565 = vmatpush3.bf16.msra.mxu1 %v10047_v58  ;;  %v10064_v14 = vld [vmem:[#allocation36_spill] sm:$0xff]  ;;  %v10065_v58 = vld [vmem:[#allocation35_spill] sm:$0xff] }
 0x353   :  { %6393 = vmatprep.subr.bf16.mxu0 %v10048_v27  ;;  %6566 = vmatprep.subr.bf16.mxu1 %v10026_v54  ;;  %v10066_v27 = vpack.c.bf16 %v10064_v14, %v10065_v58 }
 0x356   :  { %6395 = vmatpush1.bf16.msra.mxu0 %v10049_v7  ;;  %6568 = vmatpush3.bf16.msra.mxu1 %v10050_v53  ;;  %v10067_v7 = vld [vmem:[#allocation39_spill] sm:$0xff]  ;;  %v10068_v53 = vld [vmem:[#allocation37_spill] sm:$0xff] }
 0x357   :  { %6397 = vmatprep.subr.bf16.mxu0 %v10051_v39  ;;  %6569 = vmatprep.subr.bf16.mxu1 %v10026_v54  ;;  %v10069_v39 = vpack.c.bf16 %v10067_v7, %v10068_v53 }
 0x35a   :  { %6399 = vmatpush1.bf16.msra.mxu0 %v10052_v31  ;;  %6571 = vmatpush3.bf16.msra.mxu1 %v10053_v62  ;;  %v10070_v31 = vld [vmem:[#allocation42_spill] sm:$0xff]  ;;  %v10071_v62 = vld [vmem:[#allocation41_spill] sm:$0xff] }
 0x35b   :  { %6401 = vmatprep.subr.bf16.mxu0 %v10054_v19  ;;  %6572 = vmatprep.subr.bf16.mxu1 %v10026_v54  ;;  %v10072_v19 = vpack.c.bf16 %v10070_v31, %v10071_v62 }
 0x35e   :  { %6403 = vmatpush1.bf16.msra.mxu0 %v10055_v40  ;;  %6574 = vmatpush3.bf16.msra.mxu1 %v10056_v1  ;;  %v10073_v40 = vld [vmem:[#allocation8_spill] sm:$0xff]  ;;  %v10074_v1 = vld [vmem:[#allocation9_spill] sm:$0xff] }
 0x35f   :  { %6405 = vmatprep.subr.bf16.mxu0 %v10057_v0  ;;  %6575 = vmatprep.subr.bf16.mxu1 %v10026_v54  ;;  %v10075_v0 = vld [vmem:[#allocation10_spill] sm:$0xff] }
 0x362   :  { %6407 = vmatpush1.bf16.msra.mxu0 %v10058_v16  ;;  %6577 = vmatpush3.bf16.msra.mxu1 %v10059_v8  ;;  %v10076_v16 = vld [vmem:[#allocation11_spill] sm:$0xff]  ;;  %v10077_v8 = vld [vmem:[#allocation12_spill] sm:$0xff] }
 0x363   :  { %6409 = vmatprep.subr.bf16.mxu0 %v10060_v23  ;;  %6578 = vmatprep.subr.bf16.mxu1 %v10026_v54  ;;  %v10078_v23 = vld [vmem:[#allocation13_spill] sm:$0xff] }
 0x366   :  { %6411 = vmatpush1.bf16.msra.mxu0 %v10061_v24  ;;  %6580 = vmatpush3.bf16.msra.mxu1 %v10063_v49  ;;  %v10079_v24 = vld [vmem:[#allocation14_spill] sm:$0xff]  ;;  %v10081_v49 = vld [vmem:[#allocation16_spill] sm:$0xff] }
 0x367   :  { %6413 = vmatprep.subr.bf16.mxu0 %v10066_v27  ;;  %6581 = vmatprep.subr.bf16.mxu1 %v10026_v54  ;;  %v10082_v27 = vld [vmem:[#allocation17_spill] sm:$0xff] }
 0x36a   :  { %6415 = vmatpush1.bf16.msra.mxu0 %v10069_v39  ;;  %6583 = vmatpush3.bf16.msra.mxu1 %v10072_v19  ;;  %v10083_v39 = vld [vmem:[#allocation18_spill] sm:$0xff]  ;;  %v10084_v19 = vld [vmem:[#allocation19_spill] sm:$0xff] }
 0x36b   :  { %6417 = vmatprep.subr.bf16.mxu0 %v10073_v40  ;;  %6584 = vmatprep.subr.bf16.mxu1 %v10026_v54 }
 0x36d   :  { %1927 = vmatmul.mubr.f32.vlgmr.msra.gmra.mrb[2].mxu0 %v8489_v20  ;;  %5715 = vmatmul.mubr.f32.vlgmr.msra.gmra.mrb[4].mxu1 %v8489_v20  ;;  %v10080_v20 = vld [vmem:[#allocation15_spill] sm:$0xff] }
 0x36e   :  { %6419 = vmatpush1.bf16.msra.mxu0 %v10074_v1  ;;  %6586 = vmatpush3.bf16.msra.mxu1 %v10075_v0  ;;  %v10100_v0 = vand.u32 4294901760, %v7987_v47  ;;  %v10106_v47 = vand.u32 4294901760, %v8023_v12  ;;  %v10112_v12 = vand.u32 4294901760, %v8054_v3  ;;  %v10118_v3 = vand.u32 4294901760, %v8085_v18 }
 0x36f   :  { %6421 = vmatprep.subr.bf16.mxu0 %v10076_v16  ;;  %6587 = vmatprep.subr.bf16.mxu1 %v10026_v54  ;;  %v10085_v16 = vld [vmem:[#allocation20_spill] sm:$0xff]  ;;  %v10124_v18 = vand.u32 4294901760, %v8116_v10  ;;  %v10130_v10 = vand.u32 4294901760, %v8146_v55  ;;  %v10136_v55 = vand.u32 4294901760, %v8168_v48  ;;  %v10142_v48 = vand.u32 4294901760, %v10067_v7  ;;  %v10147_v7 = vld [vmem:[#allocation11_spill] sm:$0xff] }
 0x370   :  { %2029 = vmatprep.mubr.f32.mxu0 %v10027_v13  ;;  %5749 = vmatprep.mubr.msk.f32.mxu1 %vm7139_vm0, %v10027_v13 }
 0x372   :  { %6423 = vmatpush1.bf16.msra.mxu0 %v10077_v8  ;;  %6589 = vmatpush3.bf16.msra.mxu1 %v10078_v23  ;;  %v10086_v23 = vld [vmem:[#allocation21_spill] sm:$0xff]  ;;  %v10088_v8 = vld [vmem:[#allocation23_spill] sm:$0xff] }
 0x373   :  { %6425 = vmatprep.subr.bf16.mxu0 %v10079_v24  ;;  %6590 = vmatprep.subr.bf16.mxu1 %v10026_v54  ;;  %v10087_v24 = vld [vmem:[#allocation22_spill] sm:$0xff] }
 0x376   :  { %6427 = vmatpush1.bf16.msra.mxu0 %v10080_v20  ;;  %6592 = vmatpush3.bf16.msra.mxu1 %v10081_v49  ;;  %v10089_v49 = vld [vmem:[#allocation24_spill] sm:$0xff]  ;;  %v10091_v20 = vld [vmem:[#allocation26_spill] sm:$0xff] }
 0x377   :  { %6429 = vmatprep.subr.bf16.mxu0 %v10082_v27  ;;  %6593 = vmatprep.subr.bf16.mxu1 %v10026_v54  ;;  %v10090_v27 = vld [vmem:[#allocation25_spill] sm:$0xff] }
 0x37a   :  { %6431 = vmatpush1.bf16.msra.mxu0 %v10083_v39  ;;  %6595 = vmatpush3.bf16.msra.mxu1 %v10084_v19  ;;  %v10092_v19 = vld [vmem:[#allocation27_spill] sm:$0xff]  ;;  %v10094_v39 = vld [vmem:[#allocation34_spill] sm:$0xff] }
 0x37b   :  { %6433 = vmatprep.subr.bf16.mxu0 %v10085_v16  ;;  %6596 = vmatprep.subr.bf16.mxu1 %v10026_v54  ;;  %v10093_v16 = vld [vmem:[#allocation28_spill] sm:$0xff] }
 0x37e   :  { %6435 = vmatpush1.bf16.msra.mxu0 %v10086_v23  ;;  %6598 = vmatpush3.bf16.msra.mxu1 %v10087_v24  ;;  %v10096_v24 = vand.u32 4294901760, %v7974_v35  ;;  %v10104_v35 = vand.u32 4294901760, %v8013_v34  ;;  %v10110_v34 = vand.u32 4294901760, %v8043_v61  ;;  %v10115_v61 = vand.u32 4294901760, %v8070_v43 }
 0x37f   :  { %6437 = vmatprep.subr.bf16.mxu0 %v10088_v8  ;;  %6599 = vmatprep.subr.bf16.mxu1 %v10026_v54  ;;  %v10095_v8 = vand.u32 4294901760, %v7969_v36  ;;  %v10103_v36 = vand.u32 4294901760, %v8008_v5  ;;  %v10109_v5 = vand.u32 4294901760, %v8038_v45  ;;  %v10121_v43 = vand.u32 4294901760, %v8101_v2 }
 0x380   :  { %v10127_v2 = vand.u32 4294901760, %v8131_v46  ;;  %v10133_v46 = vand.u32 4294901760, %v10016_v28  ;;  %v10139_v28 = vand.u32 4294901760, %v10065_v58  ;;  %v10146_v58 = vld [vmem:[#allocation10_spill] sm:$0xff] }
 0x381   :  { %v6448_v23 = vpack.c.bf16 %v10096_v24, %v10095_v8  ;;  %v6452_v8 = vpack.c.bf16 %v10104_v35, %v10103_v36 }
 0x382   :  { %6439 = vmatpush1.bf16.msra.mxu0 %v10089_v49  ;;  %6601 = vmatpush3.bf16.msra.mxu1 %v10090_v27  ;;  %v10097_v49 = vld [vmem:[#allocation38_spill] sm:$0xff]  ;;  %v10098_v27 = vld [vmem:[#allocation40_spill] sm:$0xff] }
 0x383   :  { %6441 = vmatprep.subr.bf16.mxu0 %v10091_v20  ;;  %6602 = vmatprep.subr.bf16.mxu1 %v10026_v54  ;;  %v10099_v20 = vand.u32 4294901760, %v7982_v33  ;;  %v10105_v33 = vand.u32 4294901760, %v8018_v26  ;;  %v10111_v26 = vand.u32 4294901760, %v8049_v37  ;;  %v10117_v37 = vand.u32 4294901760, %v8080_v41 }
 0x384   :  { %v10123_v41 = vand.u32 4294901760, %v8111_v57  ;;  %v10129_v57 = vand.u32 4294901760, %v8141_v6  ;;  %v10135_v6 = vand.u32 4294901760, %v8165_v15  ;;  %v10141_v15 = vand.u32 4294901760, %v10068_v53  ;;  %v10148_v53 = vld [vmem:[#allocation12_spill] sm:$0xff] }
 0x386   :  { %6443 = vmatpush1.bf16.msra.mxu0 %v10092_v19  ;;  %6604 = vmatpush3.bf16.msra.mxu1 %v10093_v16  ;;  %v6450_v19 = vpack.c.bf16 %v10100_v0, %v10099_v20  ;;  %v10101_v16 = vand.u32 4294901760, %v7992_v30  ;;  %v10107_v30 = vand.u32 4294901760, %v8028_v59  ;;  %v10108_v0 = vand.u32 4294901760, %v8033_v60 }
 0x387   :  { %6445 = vmatprep.subr.bf16.mxu0 %v10094_v39  ;;  %6605 = vmatprep.subr.bf16.mxu1 %v10026_v54  ;;  %v10102_v39 = vand.u32 4294901760, %v7997_v4  ;;  %v6454_v4 = vpack.c.bf16 %v10106_v47, %v10105_v33  ;;  %v6458_v59 = vpack.c.bf16 %v10112_v12, %v10111_v26  ;;  %v10113_v60 = vand.u32 4294901760, %v8059_v50  ;;  %v10153_v26 = vld [vmem:[#allocation17_spill] sm:$0xff]  ;;  %v10154_v12 = vld [vmem:[#allocation18_spill] sm:$0xff] }
 0x388   :  { %v6462_v20 = vpack.c.bf16 %v10118_v3, %v10117_v37  ;;  %v10119_v50 = vand.u32 4294901760, %v8091_v32  ;;  %v6466_v36 = vpack.c.bf16 %v10124_v18, %v10123_v41  ;;  %v10125_v32 = vand.u32 4294901760, %v8121_v17  ;;  %v10162_v37 = vld [vmem:[#allocation26_spill] sm:$0xff]  ;;  %v10163_v3 = vld [vmem:[#allocation27_spill] sm:$0xff]  ;;  %v8807_v41 = vld [vmem:[#allocation2 + $0x108] sm:$0xff] }
 0x389   :  { %v6609_v1 = vpack.c.bf16 %v10102_v39, %v10101_v16  ;;  %v6612_v16 = vpack.c.bf16 %v10108_v0, %v10107_v30  ;;  %v6470_v33 = vpack.c.bf16 %v10130_v10, %v10129_v57  ;;  %v10131_v17 = vand.u32 4294901760, %v10021_v22  ;;  %v8838_v57 = vld [vmem:[#allocation2 + $0x110] sm:$0xff] }
 0x38a   :  { %6447 = vmatpush1.bf16.msra.mxu0 %v10097_v49  ;;  %6607 = vmatpush3.bf16.msra.mxu1 %v10098_v27  ;;  %v6474_v30 = vpack.c.bf16 %v10136_v55, %v10135_v6  ;;  %v10137_v22 = vand.u32 4294901760, %v10062_v29  ;;  %v10143_v29 = vand.u32 4294901760, %v10071_v62  ;;  %v10150_v62 = vld [vmem:[#allocation14_spill] sm:$0xff] }
 0x38b   :  { %6449 = vmatprep.subr.bf16.mxu0 %v6448_v23  ;;  %6608 = vmatprep.subr.bf16.mxu1 %v10026_v54  ;;  %v10116_v23 = vand.u32 4294901760, %v8075_v51  ;;  %v10122_v51 = vand.u32 4294901760, %v8106_v63  ;;  %v10128_v63 = vand.u32 4294901760, %v8136_v9  ;;  %v10134_v9 = vand.u32 4294901760, %v10017_v44 }
 0x38c   :  { %v10140_v44 = vand.u32 4294901760, %v10064_v14  ;;  %v10145_v14 = vld [vmem:[#allocation9_spill] sm:$0xff] }
 0x38d   :  { %2033 = vmatmul.mubr.f32.vlgmr.msra.gmra.mrb[2].mxu0 %v8492_v38  ;;  %5750 = vmatmul.mubr.f32.vlgmr.msra.gmra.mrb[4].mxu1 %v8492_v38  ;;  %v6456_v38 = vpack.c.bf16 %v10110_v34, %v10109_v5  ;;  %v6460_v24 = vpack.c.bf16 %v10116_v23, %v10115_v61  ;;  %v6478_v5 = vpack.c.bf16 %v10142_v48, %v10141_v15  ;;  %v10159_v61 = vld [vmem:[#allocation23_spill] sm:$0xff]  ;;  %v10160_v23 = vld [vmem:[#allocation24_spill] sm:$0xff] }
 0x38e   :  { %6451 = vmatpush1.bf16.msra.mxu0 %v6450_v19  ;;  %6610 = vmatpush3.bf16.msra.mxu1 %v6609_v1  ;;  %v10114_v1 = vand.u32 4294901760, %v8064_v25  ;;  %v10120_v25 = vand.u32 4294901760, %v8096_v56  ;;  %v6464_v19 = vpack.c.bf16 %v10122_v51, %v10121_v43  ;;  %v10126_v56 = vand.u32 4294901760, %v8126_v21 }
 0x38f   :  { %6453 = vmatprep.subr.bf16.mxu0 %v6452_v8  ;;  %6611 = vmatprep.subr.bf16.mxu1 %v10026_v54  ;;  %v6468_v8 = vpack.c.bf16 %v10128_v63, %v10127_v2  ;;  %v10132_v21 = vand.u32 4294901760, %v10022_v42  ;;  %v10138_v42 = vand.u32 4294901760, %v8173_v11  ;;  %v10144_v11 = vand.u32 4294901760, %v10070_v31  ;;  %v10149_v31 = vld [vmem:[#allocation13_spill] sm:$0xff] }
 0x390   :  { %2199 = vmatprep.mubr.f32.mxu0 %v10027_v13  ;;  %5784 = vmatprep.mubr.msk.f32.mxu1 %vm7139_vm0, %v10027_v13  ;;  %v6615_v45 = vpack.c.bf16 %v10114_v1, %v10113_v60  ;;  %v6618_v39 = vpack.c.bf16 %v10120_v25, %v10119_v50  ;;  %v6621_v35 = vpack.c.bf16 %v10126_v56, %v10125_v32  ;;  %v10156_v60 = vld [vmem:[#allocation20_spill] sm:$0xff]  ;;  %v10157_v1 = vld [vmem:[#allocation21_spill] sm:$0xff]  ;;  %v10165_v50 = vld [vmem:[#allocation34_spill] sm:$0xff] }
 0x391   :  { %v6624_v47 = vpack.c.bf16 %v10132_v21, %v10131_v17  ;;  %v6627_v0 = vpack.c.bf16 %v10138_v42, %v10137_v22  ;;  %v6630_v34 = vpack.c.bf16 %v10144_v11, %v10143_v29  ;;  %v8799_v25 = vld [vmem:[#allocation2 + $0x180] sm:$0xff]  ;;  %v8831_v56 = vld [vmem:[#allocation2 + $0x190] sm:$0xff]  ;;  %v8843_v21 = vld [vmem:[#allocation2 + $0x118] sm:$0xff] }
 0x392   :  { %6455 = vmatpush1.bf16.msra.mxu0 %v6454_v4  ;;  %6613 = vmatpush3.bf16.msra.mxu1 %v6612_v16  ;;  %v6472_v4 = vpack.c.bf16 %v10134_v9, %v10133_v46  ;;  %v6476_v16 = vpack.c.bf16 %v10140_v44, %v10139_v28  ;;  %v3078_v43 = vand.u32 4294901760, %v8799_v25  ;;  %v8868_v22 = vld [vmem:[#allocation2 + $0x1a0] sm:$0xff]  ;;  %v3039_v44 = vand.u32 4294901760, %v8843_v21 }
 0x393   :  { %6457 = vmatprep.subr.bf16.mxu0 %v6456_v38  ;;  %6614 = vmatprep.subr.bf16.mxu1 %v10026_v54  ;;  %v10152_v38 = vld [vmem:[#allocation16_spill] sm:$0xff] }
 0x394   :  { %v8880_v11 = vld [vmem:[#allocation2 + $0x120] sm:$0xff] }
 0x396   :  { %6459 = vmatpush1.bf16.msra.mxu0 %v6458_v59  ;;  %6616 = vmatpush3.bf16.msra.mxu1 %v6615_v45  ;;  %v10155_v59 = vld [vmem:[#allocation19_spill] sm:$0xff]  ;;  %v10158_v45 = vld [vmem:[#allocation22_spill] sm:$0xff] }
 0x397   :  { %6461 = vmatprep.subr.bf16.mxu0 %v6460_v24  ;;  %6617 = vmatprep.subr.bf16.mxu1 %v10026_v54  ;;  %v10161_v24 = vld [vmem:[#allocation25_spill] sm:$0xff] }
 0x39a   :  { %6463 = vmatpush1.bf16.msra.mxu0 %v6462_v20  ;;  %6619 = vmatpush3.bf16.msra.mxu1 %v6618_v39  ;;  %v10164_v20 = vld [vmem:[#allocation28_spill] sm:$0xff]  ;;  %v8801_v39 = vld [vmem:[#allocation2 + $0x188] sm:$0xff] }
 0x39b   :  { %6465 = vmatprep.subr.bf16.mxu0 %v6464_v19  ;;  %6620 = vmatprep.subr.bf16.mxu1 %v10026_v54  ;;  %v3081_v51 = vand.u32 4294901760, %v8801_v39  ;;  %v8805_v19 = vld [vmem:[#allocation2 + $0x100] sm:$0xff] }
 0x39d   :  { %v8819_v18 = vsub.f32 %v8801_v39, %v3081_v51 }
 0x39e   :  { %6467 = vmatpush1.bf16.msra.mxu0 %v6466_v36  ;;  %6622 = vmatpush3.bf16.msra.mxu1 %v6621_v35  ;;  %v8833_v35 = vld [vmem:[#allocation2 + $0x198] sm:$0xff] }
 0x39f   :  { %6469 = vmatprep.subr.bf16.mxu0 %v6468_v8  ;;  %6623 = vmatprep.subr.bf16.mxu1 %v10026_v54  ;;  %v9888_v63 = vand.u32 4294901760, %v8819_v18  ;;  %v3084_v8 = vand.u32 4294901760, %v8831_v56  ;;  %v3087_v17 = vand.u32 4294901760, %v8833_v35 }
 0x3a1   :  { %v3264_v46 = vsub.f32 %v8819_v18, %v9888_v63  ;;  %v8854_v9 = vsub.f32 %v8831_v56, %v3084_v8  ;;  %v8865_v55 = vsub.f32 %v8833_v35, %v3087_v17 }
 0x3a2   :  { %6471 = vmatpush1.bf16.msra.mxu0 %v6470_v33  ;;  %6625 = vmatpush3.bf16.msra.mxu1 %v6624_v47 }
 0x3a3   :  { %6473 = vmatprep.subr.bf16.mxu0 %v6472_v4  ;;  %6626 = vmatprep.subr.bf16.mxu1 %v10026_v54  ;;  %v9876_v28 = vand.u32 4294901760, %v8854_v9 }
 0x3a6   :  { %6475 = vmatpush1.bf16.msra.mxu0 %v6474_v30  ;;  %6628 = vmatpush3.bf16.msra.mxu1 %v6627_v0  ;;  %v3036_v30 = vand.u32 4294901760, %v8838_v57  ;;  %v3265_v0 = vand.u32 4294901760, %v3264_v46  ;;  %v8928_v46 = vld [vmem:[#allocation2 + $0x130] sm:$0xff] }
 0x3a7   :  { %6477 = vmatprep.subr.bf16.mxu0 %v6476_v16  ;;  %6629 = vmatprep.subr.bf16.mxu1 %v10026_v54  ;;  %v8872_v16 = vld [vmem:[#allocation2 + $0x1a8] sm:$0xff] }
 0x3a8   :  { %v8878_v29 = vsub.f32 %v8838_v57, %v3036_v30 }
 0x3aa   :  { %6479 = vmatpush1.bf16.msra.mxu0 %v6478_v5  ;;  %6631 = vmatpush3.bf16.msra.mxu1 %v6630_v34  ;;  %v9870_v5 = vand.u32 4294901760, %v8865_v55 }
 0x3ab   :  { %6481 = vmatprep.subr.bf16.mxu0 %v10073_v40  ;;  %6632 = vmatprep.subr.bf16.mxu1 %v10026_v54  ;;  %v10151_v40 = vld [vmem:[#allocation15_spill] sm:$0xff] }
 0x3ad   :  { %2201 = vmatmul.mubr.f32.vlgmr.msra.gmra.mrb[2].mxu0 %v8486_v52  ;;  %5785 = vmatmul.mubr.f32.vlgmr.msra.gmra.mrb[4].mxu1 %v8486_v52 }
 0x3ae   :  { %6483 = vmatpush1.bf16.msra.mxu0 %v10145_v14  ;;  %6634 = vmatpush3.bf16.msra.mxu1 %v10146_v58  ;;  %v3271_v14 = vsub.f32 %v8854_v9, %v9876_v28  ;;  %v8888_v58 = vsub.f32 %v8843_v21, %v3039_v44 }
 0x3af   :  { %6485 = vmatprep.subr.bf16.mxu0 %v10147_v7  ;;  %6635 = vmatprep.subr.bf16.mxu1 %v10026_v54  ;;  %v3090_v7 = vand.u32 4294901760, %v8868_v22 }
 0x3b0   :  { %2303 = vmatprep.mubr.f32.mxu0 %v10027_v13  ;;  %5819 = vmatprep.mubr.msk.f32.mxu1 %vm7139_vm0, %v10027_v13 }
 0x3b2   :  { %6487 = vmatpush1.bf16.msra.mxu0 %v10148_v53  ;;  %6637 = vmatpush3.bf16.msra.mxu1 %v10149_v31  ;;  %v8891_v53 = vld [vmem:[#allocation2 + $0x128] sm:$0xff] }
 0x3b3   :  { %6489 = vmatprep.subr.bf16.mxu0 %v10150_v62  ;;  %6638 = vmatprep.subr.bf16.mxu1 %v10026_v54  ;;  %v3278_v62 = vsub.f32 %v8865_v55, %v9870_v5 }
 0x3b6   :  { %6491 = vmatpush1.bf16.msra.mxu0 %v10151_v40  ;;  %6640 = vmatpush3.bf16.msra.mxu1 %v10152_v38  ;;  %v9869_v40 = vand.u32 4294901760, %v8878_v29  ;;  %v3093_v38 = vand.u32 4294901760, %v8872_v16 }
 0x3b7   :  { %6493 = vmatprep.subr.bf16.mxu0 %v10153_v26  ;;  %6641 = vmatprep.subr.bf16.mxu1 %v10026_v54  ;;  %v8898_v26 = vld [vmem:[#allocation2 + $0x1b0] sm:$0xff] }
 0x3ba   :  { %6495 = vmatpush1.bf16.msra.mxu0 %v10154_v12  ;;  %6643 = vmatpush3.bf16.msra.mxu1 %v10155_v59  ;;  %v3272_v12 = vand.u32 4294901760, %v3271_v14  ;;  %v9868_v59 = vand.u32 4294901760, %v8888_v58 }
 0x3bb   :  { %6497 = vmatprep.subr.bf16.mxu0 %v10156_v60  ;;  %6644 = vmatprep.subr.bf16.mxu1 %v10026_v54  ;;  %v8904_v60 = vsub.f32 %v8868_v22, %v3090_v7 }
 0x3be   :  { %6499 = vmatpush1.bf16.msra.mxu0 %v10157_v1  ;;  %6646 = vmatpush3.bf16.msra.mxu1 %v10158_v45  ;;  %v3042_v1 = vand.u32 4294901760, %v8880_v11  ;;  %v3279_v45 = vand.u32 4294901760, %v3278_v62 }
 0x3bf   :  { %6501 = vmatprep.subr.bf16.mxu0 %v10159_v61  ;;  %6647 = vmatprep.subr.bf16.mxu1 %v10026_v54  ;;  %v3159_v61 = vsub.f32 %v8878_v29, %v9869_v40 }
 0x3c2   :  { %6503 = vmatpush1.bf16.msra.mxu0 %v10160_v23  ;;  %6649 = vmatpush3.bf16.msra.mxu1 %v10161_v24  ;;  %v8913_v23 = vsub.f32 %v8872_v16, %v3093_v38  ;;  %v3045_v24 = vand.u32 4294901760, %v8891_v53 }
 0x3c3   :  { %6505 = vmatprep.subr.bf16.mxu0 %v10162_v37  ;;  %6650 = vmatprep.subr.bf16.mxu1 %v10026_v54  ;;  %v8916_v37 = vld [vmem:[#allocation2 + $0x1b8] sm:$0xff] }
 0x3c4   :  { %v3099_v14 = vand.u32 4294901760, %v8916_v37 }
 0x3c6   :  { %6507 = vmatpush1.bf16.msra.mxu0 %v10163_v3  ;;  %6652 = vmatpush3.bf16.msra.mxu1 %v10164_v20  ;;  %v3166_v3 = vsub.f32 %v8888_v58, %v9868_v59  ;;  %v9866_v20 = vand.u32 4294901760, %v8904_v60  ;;  %v8962_v59 = vld [vmem:[#allocation2 + $0x1c0] sm:$0xff] }
 0x3c7   :  { %6509 = vmatprep.subr.bf16.mxu0 %v10165_v50  ;;  %6653 = vmatprep.subr.bf16.mxu1 %v10026_v54  ;;  %v8925_v50 = vsub.f32 %v8880_v11, %v3042_v1 }
 0x3ca   :  { %6511 = vmatpush1.bf16.msra.mxu0 %v10097_v49  ;;  %6655 = vmatpush3.bf16.msra.mxu1 %v10098_v27  ;;  %v3030_v49 = vand.u32 4294901760, %v8805_v19  ;;  %v3033_v27 = vand.u32 4294901760, %v8807_v41 }
 0x3cc   :  { %v8824_v36 = vsub.f32 %v8805_v19, %v3030_v49  ;;  %v8829_v32 = vsub.f32 %v8807_v41, %v3033_v27  ;;  %v8968_v5 = vpack.c.bf16 %v3033_v27, %v3030_v49  ;;  %v8986_v49 = vld [vmem:[#allocation2 + $0x1c8] sm:$0xff] }
 0x3cd   :  { %2305 = vmatmul.mubr.f32.vlgmr.msra.gmra.mrb[2].mxu0 %v8486_v52  ;;  %5820 = vmatmul.mubr.f32.vlgmr.msra.gmra.mrb[4].mxu1 %v8486_v52  ;;  %v8814_v52 = vsub.f32 %v8799_v25, %v3078_v43 }
 0x3ce   :  { %v9885_v10 = vand.u32 4294901760, %v8824_v36  ;;  %v9878_v33 = vand.u32 4294901760, %v8829_v32 }
 0x3cf   :  { %v9889_v2 = vand.u32 4294901760, %v8814_v52 }
 0x3d0   :  { %v3145_v4 = vsub.f32 %v8824_v36, %v9885_v10  ;;  %v3152_v6 = vsub.f32 %v8829_v32, %v9878_v33  ;;  %v3027_v10 = vld [vmem:[#allocation2 + $0x1f8] sm:$0xff] }
 0x3d1   :  { %v3257_v47 = vsub.f32 %v8814_v52, %v9889_v2  ;;  %v3010_v2 = vld [vmem:[#allocation2 + $0x170] sm:$0xff] }
 0x3d2   :  { %v3146_v15 = vand.u32 4294901760, %v3145_v4  ;;  %v3153_v48 = vand.u32 4294901760, %v3152_v6  ;;  %v6692_v4 = vpack.c.bf16 %v3279_v45, %v3272_v12  ;;  %v3160_v6 = vand.u32 4294901760, %v3159_v61  ;;  %v8950_v45 = vld [vmem:[#allocation2 + $0x138] sm:$0xff] }
 0x3d3   :  { %v3258_v42 = vand.u32 4294901760, %v3257_v47  ;;  %v3096_v47 = vand.u32 4294901760, %v8898_v26  ;;  %v3048_v61 = vand.u32 4294901760, %v8928_v46  ;;  %v3051_v19 = vand.u32 4294901760, %v8950_v45 }
 0x3d4   :  { %v6690_v31 = vpack.c.bf16 %v3153_v48, %v3146_v15  ;;  %v3167_v15 = vand.u32 4294901760, %v3166_v3  ;;  %v3285_v48 = vsub.f32 %v8904_v60, %v9866_v20 }
 0x3d5   :  { %v6688_v34 = vpack.c.bf16 %v3265_v0, %v3258_v42  ;;  %v9867_v42 = vand.u32 4294901760, %v8913_v23  ;;  %v8934_v0 = vsub.f32 %v8891_v53, %v3045_v24  ;;  %v8948_v12 = vsub.f32 %v8898_v26, %v3096_v47 }
 0x3d6   :  { %v6694_v3 = vpack.c.bf16 %v3167_v15, %v3160_v6  ;;  %v3286_v20 = vand.u32 4294901760, %v3285_v48  ;;  %v8984_v41 = vsub.f32 %v8928_v46, %v3048_v61  ;;  %v3102_v15 = vand.u32 4294901760, %v8962_v59 }
 0x3d7   :  { %6689 = vmatprep.subr.bf16.mxu1 %v6688_v34  ;;  %v9875_v34 = vand.u32 4294901760, %v8925_v50  ;;  %v9872_v62 = vand.u32 4294901760, %v8934_v0  ;;  %v9871_v39 = vand.u32 4294901760, %v8948_v12  ;;  %v8997_v48 = vpack.c.bf16 %v3087_v17, %v3084_v8 }
 0x3d8   :  { %6691 = vmatpush3.bf16.msra.mxu1 %v6690_v31  ;;  %v3292_v31 = vsub.f32 %v8913_v23, %v9867_v42  ;;  %v9016_v8 = vpack.c.bf16 %v3039_v44, %v3036_v30  ;;  %v3105_v17 = vand.u32 4294901760, %v8986_v49  ;;  %v9030_v57 = vsub.f32 %v8962_v59, %v3102_v15 }
 0x3d9   :  { %6693 = vmatprep.subr.bf16.mxu1 %v6692_v4  ;;  %v8957_v4 = vpack.c.bf16 %v3081_v51, %v3078_v43  ;;  %v3173_v42 = vsub.f32 %v8925_v50, %v9875_v34  ;;  %v3180_v25 = vsub.f32 %v8934_v0, %v9872_v62  ;;  %v8978_v51 = vsub.f32 %v8916_v37, %v3099_v14 }
 0x3da   :  { %v3293_v40 = vand.u32 4294901760, %v3292_v31  ;;  %v9034_v21 = vsub.f32 %v8986_v49, %v3105_v17  ;;  %v9048_v49 = vpack.c.bf16 %v3093_v38, %v3090_v7 }
 0x3db   :  { %6657 = vmatprep.subr.bf16.mxu0 %v8957_v4  ;;  %v3174_v43 = vand.u32 4294901760, %v3173_v42  ;;  %v3181_v6 = vand.u32 4294901760, %v3180_v25  ;;  %v3299_v42 = vsub.f32 %v8948_v12, %v9871_v39  ;;  %v9874_v31 = vand.u32 4294901760, %v8978_v51  ;;  %v9008_v25 = vld [vmem:[#allocation2 + $0x148] sm:$0xff]  ;;  %v9010_v39 = vld [vmem:[#allocation2 + $0x1d0] sm:$0xff] }
 0x3dc   :  { %6695 = vmatpush3.bf16.msra.mxu1 %v6694_v3  ;;  %v6696_v27 = vpack.c.bf16 %v3293_v40, %v3286_v20  ;;  %6659 = vmatpush3.bf16.msra.mxu0 %v8968_v5  ;;  %v9873_v3 = vand.u32 4294901760, %v8984_v41  ;;  %v9004_v40 = vsub.f32 %v8950_v45, %v3051_v19  ;;  %v9006_v20 = vld [vmem:[#allocation2 + $0x140] sm:$0xff]  ;;  %v3057_v44 = vand.u32 4294901760, %v9008_v25 }
 0x3dd   :  { %v6698_v56 = vpack.c.bf16 %v3181_v6, %v3174_v43  ;;  %v3300_v35 = vand.u32 4294901760, %v3299_v42  ;;  %6661 = vmatprep.subr.bf16.mxu0 %v8997_v48  ;;  %v3306_v62 = vsub.f32 %v8978_v51, %v9874_v31  ;;  %v3054_v30 = vand.u32 4294901760, %v9006_v20  ;;  %v9038_v6 = vld [vmem:[#allocation2 + $0x1d8] sm:$0xff] }
 0x3de   :  { %6697 = vmatprep.subr.bf16.mxu1 %v6696_v27  ;;  %v3187_v27 = vsub.f32 %v8984_v41, %v9873_v3  ;;  %v9877_v43 = vand.u32 4294901760, %v9004_v40  ;;  %v3108_v42 = vand.u32 4294901760, %v9010_v39  ;;  %v9879_v28 = vand.u32 4294901760, %v9034_v21 }
 0x3df   :  { %v3307_v3 = vand.u32 4294901760, %v3306_v62  ;;  %v9056_v62 = vpack.c.bf16 %v3045_v24, %v3042_v1  ;;  %v9063_v22 = vsub.f32 %v9008_v25, %v3057_v44  ;;  %v3111_v16 = vand.u32 4294901760, %v9038_v6  ;;  %v9079_v1 = vld [vmem:[#allocation2 + $0x150] sm:$0xff]  ;;  %v9091_v25 = vld [vmem:[#allocation2 + $0x158] sm:$0xff] }
 0x3e0   :  { %6699 = vmatpush3.bf16.msra.mxu1 %v6698_v56  ;;  %6663 = vmatpush3.bf16.msra.mxu0 %v9016_v8  ;;  %v3188_v31 = vand.u32 4294901760, %v3187_v27  ;;  %v3194_v34 = vsub.f32 %v9004_v40, %v9877_v43  ;;  %v9884_v56 = vand.u32 4294901760, %v9030_v57  ;;  %v9059_v27 = vsub.f32 %v9006_v20, %v3054_v30 }
 0x3e1   :  { %v6700_v43 = vpack.c.bf16 %v3307_v3, %v3300_v35  ;;  %6665 = vmatprep.subr.bf16.mxu0 %v9048_v49  ;;  %v3320_v7 = vsub.f32 %v9034_v21, %v9879_v28  ;;  %v9077_v38 = vsub.f32 %v9010_v39, %v3108_v42  ;;  %v9086_v3 = vpack.c.bf16 %v3099_v14, %v3096_v47 }
 0x3e2   :  { %v3195_v33 = vand.u32 4294901760, %v3194_v34  ;;  %v3313_v11 = vsub.f32 %v9030_v57, %v9884_v56  ;;  %v9881_v53 = vand.u32 4294901760, %v9059_v27  ;;  %v9880_v34 = vand.u32 4294901760, %v9063_v22 }
 0x3e3   :  { %6701 = vmatprep.subr.bf16.mxu1 %v6700_v43  ;;  %v9089_v20 = vsub.f32 %v9038_v6, %v3111_v16  ;;  %v3321_v28 = vand.u32 4294901760, %v3320_v7  ;;  %v9106_v47 = vpack.c.bf16 %v3051_v19, %v3048_v61  ;;  %v3060_v14 = vand.u32 4294901760, %v9079_v1  ;;  %v9111_v6 = vld [vmem:[#allocation2 + $0x1e8] sm:$0xff]  ;;  %v9128_v61 = vld [vmem:[#allocation2 + $0x160] sm:$0xff] }
 0x3e4   :  { %6667 = vmatpush3.bf16.msra.mxu0 %v9056_v62  ;;  %v6702_v24 = vpack.c.bf16 %v3195_v33, %v3188_v31  ;;  %v3314_v35 = vand.u32 4294901760, %v3313_v11  ;;  %v3201_v43 = vsub.f32 %v9059_v27, %v9881_v53  ;;  %v9883_v33 = vand.u32 4294901760, %v9077_v38  ;;  %v9109_v31 = vld [vmem:[#allocation2 + $0x1e0] sm:$0xff] }
 0x3e5   :  { %v3208_v26 = vsub.f32 %v9063_v22, %v9880_v34  ;;  %6669 = vmatprep.subr.bf16.mxu0 %v9086_v3  ;;  %v9882_v37 = vand.u32 4294901760, %v9089_v20  ;;  %10166 = vst [vmem:[#allocation29_spill] sm:$0xff] %v9106_v47  ;;  %v3063_v34 = vand.u32 4294901760, %v9091_v25  ;;  %v9122_v45 = vsub.f32 %v9079_v1, %v3060_v14 }
 0x3e6   :  { %6703 = vmatpush3.bf16.msra.mxu1 %v6702_v24  ;;  %v6704_v11 = vpack.c.bf16 %v3321_v28, %v3314_v35  ;;  %v3202_v7 = vand.u32 4294901760, %v3201_v43  ;;  %v3327_v24 = vsub.f32 %v9077_v38, %v9883_v33  ;;  %v9126_v28 = vpack.c.bf16 %v3105_v17, %v3102_v15 }
 0x3e7   :  { %v3209_v53 = vand.u32 4294901760, %v3208_v26  ;;  %v3334_v46 = vsub.f32 %v9089_v20, %v9882_v37  ;;  %v9131_v35 = vsub.f32 %v9091_v25, %v3063_v34  ;;  %v3114_v43 = vand.u32 4294901760, %v9109_v31  ;;  %v3009_v37 = vld [vmem:[#allocation2 + $0x168] sm:$0xff] }
 0x3e8   :  { %6671 = vmatpush3.bf16.msra.mxu0 %v9106_v47  ;;  %10167 = vst [vmem:[#allocation30_spill] sm:$0xff] %v9126_v28  ;;  %6705 = vmatprep.subr.bf16.mxu1 %v6704_v11  ;;  %v3328_v19 = vand.u32 4294901760, %v3327_v24  ;;  %v3117_v26 = vand.u32 4294901760, %v9111_v6  ;;  %v9887_v1 = vand.u32 4294901760, %v9122_v45  ;;  %v9137_v59 = vpack.c.bf16 %v3057_v44, %v3054_v30  ;;  %v3026_v24 = vld [vmem:[#allocation2 + $0x1f0] sm:$0xff] }
 0x3e9   :  { %v6706_v33 = vpack.c.bf16 %v3209_v53, %v3202_v7  ;;  %v3335_v56 = vand.u32 4294901760, %v3334_v46  ;;  %6673 = vmatprep.subr.bf16.mxu0 %v9126_v28  ;;  %v9886_v15 = vand.u32 4294901760, %v9131_v35  ;;  %v9141_v17 = vsub.f32 %v9109_v31, %v3114_v43 }
 0x3ea   :  { %10168 = vst [vmem:[#allocation43_spill] sm:$0xff] %v9137_v59  ;;  %v9144_v25 = vsub.f32 %v9111_v6, %v3117_v26  ;;  %v3066_v11 = vand.u32 4294901760, %v9128_v61  ;;  %v3215_v7 = vsub.f32 %v9122_v45, %v9887_v1  ;;  %v3069_v30 = vand.u32 4294901760, %v3009_v37 }
 0x3eb   :  { %6707 = vmatpush3.bf16.msra.mxu1 %v6706_v33  ;;  %v6708_v53 = vpack.c.bf16 %v3335_v56, %v3328_v19  ;;  %v9153_v44 = vpack.c.bf16 %v3111_v16, %v3108_v42  ;;  %v3222_v31 = vsub.f32 %v9131_v35, %v9886_v15  ;;  %v9894_v6 = vand.u32 4294901760, %v9141_v17 }
 0x3ec   :  { %6675 = vmatpush3.bf16.msra.mxu0 %v9137_v59  ;;  %v9895_v33 = vand.u32 4294901760, %v9144_v25  ;;  %v9161_v56 = vsub.f32 %v9128_v61, %v3066_v11  ;;  %v3216_v46 = vand.u32 4294901760, %v3215_v7  ;;  %v9163_v19 = vsub.f32 %v3009_v37, %v3069_v30 }
 0x3ed   :  { %10169 = vst [vmem:[#allocation44_spill] sm:$0xff] %v9153_v44  ;;  %6709 = vmatprep.subr.bf16.mxu1 %v6708_v53  ;;  %6677 = vmatprep.subr.bf16.mxu0 %v9153_v44  ;;  %v3120_v39 = vand.u32 4294901760, %v3026_v24  ;;  %v3123_v42 = vand.u32 4294901760, %v3027_v10  ;;  %v3223_v16 = vand.u32 4294901760, %v3222_v31  ;;  %v3341_v15 = vsub.f32 %v9141_v17, %v9894_v6  ;;  %v3011_v31 = vld [vmem:[#allocation2 + $0x178] sm:$0xff] }
 0x3ee   :  { %v3348_v1 = vsub.f32 %v9144_v25, %v9895_v33  ;;  %v9896_v61 = vand.u32 4294901760, %v9161_v56  ;;  %v9899_v53 = vand.u32 4294901760, %v9163_v19  ;;  %v9178_v63 = vpack.c.bf16 %v3063_v34, %v3060_v14 }
 0x3ef   :  { %v9174_v7 = vsub.f32 %v3026_v24, %v3120_v39  ;;  %v9176_v37 = vsub.f32 %v3027_v10, %v3123_v42  ;;  %v6710_v13 = vpack.c.bf16 %v3223_v16, %v3216_v46  ;;  %v3342_v54 = vand.u32 4294901760, %v3341_v15 }
 0x3f0   :  { %10170 = vst [vmem:[#allocation45_spill] sm:$0xff] %v9178_v63  ;;  %v3349_v44 = vand.u32 4294901760, %v3348_v1  ;;  %v3229_v6 = vsub.f32 %v9161_v56, %v9896_v61  ;;  %v3236_v33 = vsub.f32 %v9163_v19, %v9899_v53  ;;  %6679 = vmatpush3.bf16.msra.mxu0 %v9178_v63  ;;  %v3072_v14 = vand.u32 4294901760, %v3010_v2 }
 0x3f1   :  { %v3354_v24 = vand.u32 4294901760, %v9174_v7  ;;  %v3361_v10 = vand.u32 4294901760, %v9176_v37  ;;  %6711 = vmatpush3.bf16.msra.mxu1 %v6710_v13  ;;  %v3075_v46 = vand.u32 4294901760, %v3011_v31  ;;  %v9195_v28 = vpack.c.bf16 %v3117_v26, %v3114_v43 }
 0x3f2   :  { %v6712_v34 = vpack.c.bf16 %v3349_v44, %v3342_v54  ;;  %v3230_v15 = vand.u32 4294901760, %v3229_v6  ;;  %v3237_v1 = vand.u32 4294901760, %v3236_v33  ;;  %v9191_v59 = vsub.f32 %v3010_v2, %v3072_v14 }
 0x3f3   :  { %v3355_v16 = vsub.f32 %v9174_v7, %v3354_v24  ;;  %v3362_v61 = vsub.f32 %v9176_v37, %v3361_v10  ;;  %v9193_v53 = vsub.f32 %v3011_v31, %v3075_v46  ;;  %v9197_v47 = vpack.c.bf16 %v3069_v30, %v3066_v11  ;;  %6681 = vmatprep.subr.bf16.mxu0 %v9195_v28 }
 0x3f4   :  { %6713 = vmatprep.subr.bf16.mxu1 %v6712_v34  ;;  %10171 = vst [vmem:[#allocation46_spill] sm:$0xff] %v9191_v59  ;;  %v6714_v63 = vpack.c.bf16 %v3237_v1, %v3230_v15  ;;  %v9199_v44 = vpack.c.bf16 %v3123_v42, %v3120_v39  ;;  %v3242_v6 = vand.u32 4294901760, %v9191_v59  ;;  %v9205_v31 = vpack.c.bf16 %v3075_v46, %v3072_v14 }
 0x3f5   :  { %v3356_v13 = vand.u32 4294901760, %v3355_v16  ;;  %v3363_v54 = vand.u32 4294901760, %v3362_v61  ;;  %v3249_v33 = vand.u32 4294901760, %v9193_v53  ;;  %6683 = vmatpush3.bf16.msra.mxu0 %v9197_v47  ;;  %v6720_v11 = vpack.c.bf16 %v8819_v18, %v8814_v52 }
 0x3f6   :  { %6715 = vmatpush3.bf16.msra.mxu1 %v6714_v63  ;;  %v3243_v43 = vsub.f32 %v9191_v59, %v3242_v6  ;;  %6685 = vmatprep.subr.bf16.mxu0 %v9199_v44 }
 0x3f7   :  { %v6716_v2 = vpack.c.bf16 %v3363_v54, %v3356_v13  ;;  %v3250_v26 = vsub.f32 %v9193_v53, %v3249_v33  ;;  %v9906_v54 = vlaneseq }
 0x3f8   :  { %v3244_v39 = vand.u32 4294901760, %v3243_v43 }
 0x3f9   :  { %6717 = vmatprep.subr.bf16.mxu1 %v6716_v2  ;;  %v3251_v63 = vand.u32 4294901760, %v3250_v26  ;;  %6687 = vmatpush3.bf16.msra.mxu0 %v9205_v31  ;;  %v9249_v13 = vshrl.u32 %v9906_v54, 7  ;;  %v9255_v26 = vld [vmem:[%s9694_s3 + $0x2] ss:$8 sm:$0x7] }
 0x3fa   :  { %6721 = vmatprep.subr.bf16.mxu0 %v6720_v11  ;;  %10175 = vst [vmem:[#allocation50_spill] sm:$0xff] %v9255_v26 }
 0x3fb   :  { %v6718_v42 = vpack.c.bf16 %v3251_v63, %v3244_v39  ;;  %v9244_v63 = vpack.c.bf16 %v3361_v10, %v3354_v24  ;;  %10174 = vst [vmem:[#allocation49_spill] sm:$0xff] %v9249_v13  ;;  %v1443_v2 = vsub.s32 0, %v9249_v13  ;;  %v1447_v11 = vsub.s32 1, %v9249_v13 }
 0x3fd   :  { %6719 = vmatpush3.bf16.msra.mxu1 %v6718_v42  ;;  %10172 = vst [vmem:[#allocation47_spill] sm:$0xff] %v9244_v63  ;;  %v9246_v42 = vpack.c.bf16 %v3249_v33, %v3242_v6  ;;  %v1444_v43 = vrot.slane %v9255_v26, %v1443_v2  ;;  %v1448_v24 = vrot.slane %v9255_v26, %v1447_v11 }
 0x3fe   :  { %6753 = vmatprep.subr.bf16.mxu1 %v8957_v4 }
 0x3ff   :  { %10173 = vst [vmem:[#allocation48_spill] sm:$0xff] %v9246_v42 }
 0x4a0   :  { %v2306_v10 = vpop.f32.mrb[2].mxu0  ;;  %v9260_v6 = vpop.f32.mrb[4].mxu1 }
 0x4a1   :  { %10176 = vst [vmem:[#allocation51_spill] sm:$0xff] %v9260_v6  ;;  %v6995_v33 = vadd.f32 %v2306_v10, %v1444_v43  ;;  %v2308_v39 = vpop.f32.mrb[3].mxu0  ;;  %v5821_v54 = vpop.f32.mrb[5].mxu1 }
 0x4a2   :  { %v6996_v16 = vadd.f32 %v2308_v39, %v1448_v24 }
 0x4a3   :  { %v2970_v1 = vmin.f32 %v6995_v33, 20.0  ;;  %vm2968_vm6 = vcmp.gt.f32.partialorder %v6995_v33, 20.0 }
 0x4a4   :  { %v2971_v15 = vmin.f32 %v6996_v16, 20.0  ;;  %vm2969_vm8 = vcmp.gt.f32.partialorder %v6996_v16, 20.0 }
 0x4a5   :  { %v2972_v46 = vmul.f32 1.442695, %v2970_v1 }
 0x4a6   :  { %v2974_v14 = vmul.f32 1.442695, %v2971_v15 }
 0x4a7   :  { %7066 = vpow2.f32 %v2972_v46 }
 0x4a8   :  { %7068 = vpow2.f32 %v2974_v14 }
 0x4b1   :  { %v7067_v34 = vpop.eup %7066 }
 0x4b2   :  { %v7069_v61 = vpop.eup %7068  ;;  %v2976_v30 = vadd.f32 1.0, %v7067_v34  ;;  %v2979_v2 = vmul.f32 -0.5, %v7067_v34  ;;  %v2982_v6 = vand.u32 2147483647, %v7067_v34 }
 0x4b3   :  { %v2985_v13 = vadd.f32 1.0, %v7069_v61  ;;  %v2988_v11 = vmul.f32 -0.5, %v7069_v61  ;;  %v2991_v10 = vand.u32 2147483647, %v7069_v61 }
 0x4b4   :  { %7070 = vlog2.f32 %v2976_v30  ;;  %v2980_v26 = vadd.f32 1.0, %v2979_v2  ;;  %vm2983_vm5 = vcmp.lt.f32.partialorder %v2982_v6, 0.0004427343 }
 0x4b5   :  { %7072 = vlog2.f32 %v2985_v13  ;;  %v2989_v43 = vadd.f32 1.0, %v2988_v11  ;;  %vm2992_vm7 = vcmp.lt.f32.partialorder %v2991_v10, 0.0004427343  ;;  %v10180_v10 = vld [vmem:[#allocation29_spill] sm:$0xff] }
 0x4b6   :  { %v2981_v42 = vmul.f32 %v7067_v34, %v2980_v26 }
 0x4b7   :  { %v2990_v46 = vmul.f32 %v7069_v61, %v2989_v43  ;;  %v10179_v43 = vpack.c.bf16 %v8888_v58, %v8878_v29 }
 0x4be   :  { %v7071_v54 = vpop.eup %7070 }
 0x4bf   :  { %v7073_v39 = vpop.eup %7072  ;;  %v2978_v24 = vmul.f32 0.6931472, %v7071_v54  ;;  %v10181_v54 = vpack.c.bf16 %v8913_v23, %v8904_v60 }
 0x4c0   :  { %v2987_v15 = vmul.f32 0.6931472, %v7073_v39  ;;  %v10182_v39 = vld [vmem:[#allocation30_spill] sm:$0xff] }
 0x4c1   :  { %v2984_v14 = vsel %vm2983_vm5, %v2981_v42, %v2978_v24  ;;  %v10184_v24 = vld [vmem:[#allocation43_spill] sm:$0xff] }
 0x4c2   :  { %v2994_v1 = vsel %vm2968_vm6, %v6995_v33, %v2984_v14  ;;  %v2993_v30 = vsel %vm2992_vm7, %v2990_v46, %v2987_v15  ;;  %v10178_v33 = vpack.c.bf16 %v8865_v55, %v8854_v9  ;;  %v10185_v15 = vpack.c.bf16 %v8978_v51, %v8948_v12  ;;  %v10186_v46 = vld [vmem:[#allocation44_spill] sm:$0xff] }
 0x4c3   :  { %v9262_v13 = vand.u32 4294901760, %v2994_v1  ;;  %v2995_v63 = vsel %vm2969_vm8, %v6996_v16, %v2993_v30  ;;  %v10187_v14 = vpack.c.bf16 %v9004_v40, %v8984_v41  ;;  %v10189_v30 = vpack.c.bf16 %v9034_v21, %v9030_v57 }
 0x4c4   :  { %v3125_v2 = vand.u32 4294901760, %v2995_v63 }
 0x4c5   :  { %v3132_v11 = vsub.f32 %v2994_v1, %v9262_v13  ;;  %v10188_v1 = vld [vmem:[#allocation45_spill] sm:$0xff] }
 0x4c6   :  { %v3126_v59 = vsub.f32 %v2995_v63, %v3125_v2  ;;  %3366 = vmatprep.mubr.f32.mxu1 %v3125_v2  ;;  %v10177_v63 = vpack.c.bf16 %v8829_v32, %v8824_v36 }
 0x4c7   :  { %3368 = vmatmul.mubr.f32.vlgmr.msra.gmra.mrb[6].mxu1 %v9262_v13  ;;  %v3133_v34 = vand.u32 4294901760, %v3132_v11 }
 0x4c8   :  { %6755 = vmatpush3.bf16.msra.mxu1 %v8968_v5  ;;  %v3127_v61 = vand.u32 4294901760, %v3126_v59 }
 0x4c9   :  { %6757 = vmatprep.subr.bf16.mxu1 %v8997_v48  ;;  %v3134_v26 = vsub.f32 %v3132_v11, %v3133_v34 }
 0x4ca   :  { %3610 = vmatprep.mubr.f32.mxu1 %v3127_v61  ;;  %v3128_v42 = vsub.f32 %v3126_v59, %v3127_v61  ;;  %v10190_v61 = vpack.c.bf16 %v9063_v22, %v9059_v27 }
 0x4cb   :  { %v3135_v16 = vand.u32 4294901760, %v3134_v26  ;;  %v10191_v26 = vpack.c.bf16 %v9089_v20, %v9077_v38 }
 0x4cc   :  { %6759 = vmatpush3.bf16.msra.mxu1 %v9016_v8  ;;  %v3129_v6 = vand.u32 4294901760, %v3128_v42  ;;  %v10192_v42 = vpack.c.bf16 %v9131_v35, %v9122_v45 }
 0x4cd   :  { %6761 = vmatprep.subr.bf16.mxu1 %v9048_v49 }
 0x4ce   :  { %3130 = vmatprep.mubr.f32.mxu0 %v3129_v6  ;;  %v10193_v6 = vpack.c.bf16 %v9144_v25, %v9141_v17 }
 0x4cf   :  { %3136 = vmatmul.mubr.f32.vlgmr.msra.gmra.mrb[4].mxu0 %v3135_v16  ;;  %v10194_v16 = vpack.c.bf16 %v9163_v19, %v9161_v56 }
 0x4d0   :  { %6723 = vmatpush3.bf16.msra.mxu0 %v10177_v63  ;;  %6763 = vmatpush3.bf16.msra.mxu1 %v9056_v62  ;;  %v10195_v63 = vpack.c.bf16 %v9176_v37, %v9174_v7 }
 0x4d1   :  { %3503 = vmatprep.mubr.f32.mxu0 %v3126_v59  ;;  %6725 = vmatprep.subr.bf16.mxu0 %v10178_v33  ;;  %v10183_v59 = vpack.c.bf16 %v8934_v0, %v8925_v50  ;;  %v10196_v33 = vand.u32 4294901760, %v8814_v52  ;;  %v10202_v52 = vand.u32 4294901760, %v8854_v9  ;;  %v10208_v9 = vand.u32 4294901760, %v8925_v50 }
 0x4d2   :  { %6765 = vmatprep.subr.bf16.mxu1 %v9086_v3  ;;  %v10214_v50 = vand.u32 4294901760, %v9030_v57  ;;  %v10220_v57 = vand.u32 4294901760, %v9122_v45  ;;  %v10227_v45 = vld [vmem:[#allocation48_spill] sm:$0xff] }
 0x4d4   :  { %6727 = vmatpush3.bf16.msra.mxu0 %v10179_v43  ;;  %6767 = vmatpush3.bf16.msra.mxu1 %v10180_v10  ;;  %v10197_v43 = vand.u32 4294901760, %v8819_v18  ;;  %v10203_v18 = vand.u32 4294901760, %v8865_v55  ;;  %v10209_v55 = vand.u32 4294901760, %v8934_v0  ;;  %v10215_v0 = vand.u32 4294901760, %v9034_v21 }
 0x4d5   :  { %6729 = vmatprep.subr.bf16.mxu0 %v10181_v54  ;;  %6769 = vmatprep.subr.bf16.mxu1 %v10182_v39  ;;  %v10221_v21 = vand.u32 4294901760, %v9131_v35  ;;  %v10228_v35 = vmov 0.0|0.0  }
 0x4d6   :  { %v6784_v54 = vpack.c.bf16 %v10197_v43, %v10196_v33  ;;  %v6788_v7 = vpack.c.bf16 %v10203_v18, %v10202_v52  ;;  %v6794_v37 = vpack.c.bf16 %v10209_v55, %v10208_v9  ;;  %v10231_v9 = vld [vmem:[#allocation50_spill] sm:$0xff] }
 0x4d8   :  { %6731 = vmatpush3.bf16.msra.mxu0 %v10183_v59  ;;  %6771 = vmatpush3.bf16.msra.mxu1 %v10184_v24  ;;  %v10201_v59 = vand.u32 4294901760, %v8829_v32  ;;  %v10207_v32 = vand.u32 4294901760, %v8913_v23  ;;  %v10213_v23 = vand.u32 4294901760, %v9004_v40  ;;  %v10219_v40 = vand.u32 4294901760, %v9089_v20 }
 0x4d9   :  { %6733 = vmatprep.subr.bf16.mxu0 %v10185_v15  ;;  %6773 = vmatprep.subr.bf16.mxu1 %v10186_v46  ;;  %v10225_v20 = vand.u32 4294901760, %v9163_v19  ;;  %v3900_v19 = vld [vmem:[#allocation2 + $0x210] sm:$0xff] }
 0x4dc   :  { %6735 = vmatpush3.bf16.msra.mxu0 %v10187_v14  ;;  %6775 = vmatpush3.bf16.msra.mxu1 %v10188_v1  ;;  %v3921_v14 = vand.u32 4294901760, %v3900_v19 }
 0x4dd   :  { %6737 = vmatprep.subr.bf16.mxu0 %v10189_v30  ;;  %6777 = vmatprep.subr.bf16.mxu1 %v9195_v28 }
 0x4e0   :  { %6739 = vmatpush3.bf16.msra.mxu0 %v10190_v61  ;;  %6779 = vmatpush3.bf16.msra.mxu1 %v9197_v47 }
 0x4e1   :  { %6741 = vmatprep.subr.bf16.mxu0 %v10191_v26  ;;  %6781 = vmatprep.subr.bf16.mxu1 %v9199_v44 }
 0x4e4   :  { %6743 = vmatpush3.bf16.msra.mxu0 %v10192_v42  ;;  %6783 = vmatpush3.bf16.msra.mxu1 %v9205_v31  ;;  %v9411_v42 = vsub.f32 %v3900_v19, %v3921_v14  ;;  %v3907_v19 = vld [vmem:[#allocation2 + $0x248] sm:$0xff] }
 0x4e5   :  { %6745 = vmatprep.subr.bf16.mxu0 %v10193_v6  ;;  %6817 = vmatprep.subr.bf16.mxu1 %v8957_v4  ;;  %v10198_v4 = vld [vmem:[#allocation46_spill] sm:$0xff] }
 0x4e7   :  { %3614 = vmatmul.mubr.f32.vlgmr.msra.gmra.mrb[8].mxu1 %v3133_v34  ;;  %v10199_v34 = vpack.c.bf16 %v9193_v53, %v10198_v4 }
 0x4e8   :  { %6747 = vmatpush3.bf16.msra.mxu0 %v10194_v16  ;;  %6819 = vmatpush3.bf16.msra.mxu1 %v8968_v5  ;;  %v10200_v5 = vand.u32 4294901760, %v8824_v36  ;;  %v10206_v36 = vand.u32 4294901760, %v8904_v60  ;;  %v10212_v60 = vand.u32 4294901760, %v8984_v41  ;;  %v10218_v41 = vand.u32 4294901760, %v9077_v38 }
 0x4e9   :  { %3884 = vmatprep.mubr.f32.mxu1 %v3125_v2  ;;  %6749 = vmatprep.subr.bf16.mxu0 %v10195_v63  ;;  %v10224_v38 = vand.u32 4294901760, %v9161_v56  ;;  %v3899_v56 = vld [vmem:[#allocation2 + $0x208] sm:$0xff] }
 0x4ea   :  { %6821 = vmatprep.subr.bf16.mxu1 %v8997_v48  ;;  %v6786_v15 = vpack.c.bf16 %v10201_v59, %v10200_v5  ;;  %v10204_v48 = vand.u32 4294901760, %v8878_v29  ;;  %v10210_v29 = vand.u32 4294901760, %v8948_v12  ;;  %v10216_v12 = vand.u32 4294901760, %v9059_v27 }
 0x4eb   :  { %v10222_v27 = vand.u32 4294901760, %v9141_v17  ;;  %v10229_v17 = vmov 0.0  }
 0x4ec   :  { %6751 = vmatpush3.bf16.msra.mxu0 %v10199_v34  ;;  %6823 = vmatpush3.bf16.msra.mxu1 %v9016_v8  ;;  %v10205_v8 = vand.u32 4294901760, %v8888_v58  ;;  %v10211_v58 = vand.u32 4294901760, %v8978_v51  ;;  %v10217_v51 = vand.u32 4294901760, %v9063_v22  ;;  %v10223_v22 = vand.u32 4294901760, %v9144_v25  ;;  %v3898_v25 = vld [vmem:[#allocation2 + $0x200] sm:$0xff] }
 0x4ed   :  { %6785 = vmatprep.subr.bf16.mxu0 %v6784_v54  ;;  %6825 = vmatprep.subr.bf16.mxu1 %v9048_v49  ;;  %v6792_v49 = vpack.c.bf16 %v10207_v32, %v10206_v36  ;;  %v3028_v54 = vld [vmem:[%s9694_s3 + $0x3] ss:$0 sm:$0xff] }
 0x4ee   :  { %v6790_v53 = vpack.c.bf16 %v10205_v8, %v10204_v48  ;;  %v10230_v32 = vld [vmem:[#allocation49_spill] sm:$0xff] }
 0x4ef   :  { %3506 = vmatmul.mubr.f32.vlgmr.msra.gmra.mrb[6].mxu0 %v3132_v11  ;;  %v6802_v11 = vpack.c.bf16 %v10217_v51, %v10216_v12  ;;  %v2954_v51 = vld [vmem:[%s9694_s3 + $0x4] ss:$0 sm:$0xff] }
 0x4f0   :  { %6787 = vmatpush3.bf16.msra.mxu0 %v6786_v15  ;;  %3780 = vmatprep.mubr.f32.mxu0 %v3125_v2  ;;  %v6800_v2 = vpack.c.bf16 %v10215_v0, %v10214_v50 }
 0x4f1   :  { %6827 = vmatpush3.bf16.msra.mxu1 %v9056_v62  ;;  %6789 = vmatprep.subr.bf16.mxu0 %v6788_v7  ;;  %v6796_v62 = vpack.c.bf16 %v10211_v58, %v10210_v29 }
 0x4f2   :  { %6829 = vmatprep.subr.bf16.mxu1 %v9086_v3  ;;  %v6798_v3 = vpack.c.bf16 %v10213_v23, %v10212_v60 }
 0x4f4   :  { %6791 = vmatpush3.bf16.msra.mxu0 %v6790_v53 }
 0x4f5   :  { %6831 = vmatpush3.bf16.msra.mxu1 %v10180_v10  ;;  %6793 = vmatprep.subr.bf16.mxu0 %v6792_v49  ;;  %v6804_v10 = vpack.c.bf16 %v10219_v40, %v10218_v41  ;;  %v1451_v49 = vsub.s32 2, %v10230_v32 }
 0x4f6   :  { %6833 = vmatprep.subr.bf16.mxu1 %v10182_v39  ;;  %v6806_v39 = vpack.c.bf16 %v10221_v21, %v10220_v57  ;;  %v3902_v57 = vld [vmem:[#allocation2 + $0x220] sm:$0xff]  ;;  %v3903_v21 = vld [vmem:[#allocation2 + $0x228] sm:$0xff] }
 0x4f7   :  { %v1452_v55 = vrot.slane %v10231_v9, %v1451_v49  ;;  %v4022_v9 = vand.u32 4294901760, %v9411_v42 }
 0x4f8   :  { %6795 = vmatpush3.bf16.msra.mxu0 %v6794_v37  ;;  %v10232_v37 = vld [vmem:[#allocation51_spill] sm:$0xff] }
 0x4f9   :  { %6835 = vmatpush3.bf16.msra.mxu1 %v10184_v24  ;;  %6797 = vmatprep.subr.bf16.mxu0 %v6796_v62  ;;  %v6808_v24 = vpack.c.bf16 %v10223_v22, %v10222_v27  ;;  %v6997_v29 = vadd.f32 %v10232_v37, %v1452_v55  ;;  %v3930_v27 = vand.u32 4294901760, %v3903_v21 }
 0x4fa   :  { %6837 = vmatprep.subr.bf16.mxu1 %v10186_v46  ;;  %v3901_v46 = vld [vmem:[#allocation2 + $0x218] sm:$0xff] }
 0x4fb   :  { %7074 = vtanh.f32 %v6997_v29 }
 0x4fc   :  { %6799 = vmatpush3.bf16.msra.mxu0 %v6798_v3 }
 0x4fd   :  { %6839 = vmatpush3.bf16.msra.mxu1 %v10188_v1  ;;  %6801 = vmatprep.subr.bf16.mxu0 %v6800_v2  ;;  %v3924_v1 = vand.u32 4294901760, %v3901_v46 }
 0x4fe   :  { %6841 = vmatprep.subr.bf16.mxu1 %v9195_v28  ;;  %v6810_v28 = vpack.c.bf16 %v10225_v20, %v10224_v38  ;;  %v3905_v38 = vld [vmem:[#allocation2 + $0x238] sm:$0xff] }
 0x4ff   :  { %v9416_v6 = vpack.c.bf16 %v3924_v1, %v3921_v14  ;;  %v3908_v14 = vld [vmem:[#allocation2 + $0x250] sm:$0xff] }
 0x500   :  { %6803 = vmatpush3.bf16.msra.mxu0 %v6802_v11 }
 0x501   :  { %6843 = vmatpush3.bf16.msra.mxu1 %v9197_v47  ;;  %6805 = vmatprep.subr.bf16.mxu0 %v6804_v10  ;;  %v10226_v47 = vld [vmem:[#allocation47_spill] sm:$0xff] }
 0x502   :  { %6845 = vmatprep.subr.bf16.mxu1 %v9199_v44  ;;  %v3915_v44 = vand.u32 4294901760, %v3898_v25 }
 0x504   :  { %6807 = vmatpush3.bf16.msra.mxu0 %v6806_v39  ;;  %v9407_v61 = vsub.f32 %v3898_v25, %v3915_v44  ;;  %v3927_v39 = vand.u32 4294901760, %v3902_v57 }
 0x505   :  { %6847 = vmatpush3.bf16.msra.mxu1 %v9205_v31  ;;  %6809 = vmatprep.subr.bf16.mxu0 %v6808_v24  ;;  %v3918_v31 = vand.u32 4294901760, %v3899_v56  ;;  %v7075_v3 = vpop.eup %7074  ;;  %v3904_v24 = vld [vmem:[#allocation2 + $0x230] sm:$0xff] }
 0x506   :  { %v2953_v2 = vsub.f32 %v6997_v29, %v7075_v3  ;;  %v9433_v22 = vpack.c.bf16 %v3930_v27, %v3927_v39  ;;  %v3933_v20 = vand.u32 4294901760, %v3904_v24 }
 0x507   :  { %v9405_v30 = vpack.c.bf16 %v3918_v31, %v3915_v44  ;;  %v9409_v26 = vsub.f32 %v3899_v56, %v3918_v31  ;;  %v3906_v56 = vld [vmem:[#allocation2 + $0x240] sm:$0xff]  ;;  %v3942_v31 = vand.u32 4294901760, %v3907_v19 }
 0x508   :  { %3886 = vmatmul.mubr.f32.vlgmr.msra.gmra.mrb[10].mxu1 %v9262_v13  ;;  %6811 = vmatpush3.bf16.msra.mxu0 %v6810_v28  ;;  %v2955_v40 = vmul.f32 %v2954_v51, %v2953_v2  ;;  %v3936_v28 = vand.u32 4294901760, %v3905_v38  ;;  %v3939_v44 = vand.u32 4294901760, %v3906_v56  ;;  %v9470_v37 = vsub.f32 %v3904_v24, %v3933_v20 }
 0x509   :  { %6813 = vmatprep.subr.bf16.mxu0 %v10226_v47  ;;  %v9437_v47 = vsub.f32 %v3902_v57, %v3927_v39  ;;  %v4023_v51 = vsub.f32 %v9411_v42, %v4022_v9 }
 0x50a   :  { %v2957_v10 = vsel %vm2956_vm10, %v2955_v40, 0.0  ;;  %v9441_v25 = vpack.c.bf16 %v3936_v28, %v3933_v20  ;;  %v9472_v29 = vsub.f32 %v3905_v38, %v3936_v28  ;;  %v4050_v28 = vand.u32 4294901760, %v9470_v37 }
 0x50b   :  { %v4036_v40 = vand.u32 4294901760, %v9437_v47  ;;  %v4024_v57 = vand.u32 4294901760, %v4023_v51 }
 0x50c   :  { %6815 = vmatpush3.bf16.msra.mxu0 %v10227_v45  ;;  %v9439_v45 = vsub.f32 %v3903_v21, %v3930_v27 }
 0x50d   :  { %6848 = vmatprep.subr.bf16.mxu0 %v10228_v35  ;;  %v4037_v39 = vsub.f32 %v9437_v47, %v4036_v40 }
 0x50f   :  { %3782 = vmatmul.mubr.f32.vlgmr.msra.gmra.mrb[8].mxu0 %v9262_v13  ;;  %v9413_v13 = vsub.f32 %v3901_v46, %v3924_v1  ;;  %v9445_v46 = vpack.c.bf16 %v3942_v31, %v3939_v44  ;;  %v3909_v1 = vld [vmem:[#allocation2 + $0x258] sm:$0xff]  ;;  %v4038_v38 = vand.u32 4294901760, %v4037_v39 }
 0x510   :  { %5854 = vmatprep.mubr.msk.f32.mxu0 %vm7139_vm0, %v10229_v17  ;;  %6850 = vmatpush3.bf16.msra.mxu0 %v9405_v30 }
 0x511   :  { %6851 = vmatprep.subr.bf16.mxu0 %v10228_v35  ;;  %v4029_v55 = vand.u32 4294901760, %v9413_v13 }
 0x514   :  { %6853 = vmatpush3.bf16.msra.mxu0 %v9416_v6 }
 0x515   :  { %6854 = vmatprep.subr.bf16.mxu0 %v10228_v35 }
 0x518   :  { %6856 = vmatpush3.bf16.msra.mxu0 %v9433_v22 }
 0x519   :  { %6857 = vmatprep.subr.bf16.mxu0 %v10228_v35 }
 0x51c   :  { %6859 = vmatpush3.bf16.msra.mxu0 %v9441_v25 }
 0x51d   :  { %6860 = vmatprep.subr.bf16.mxu0 %v10228_v35 }
 0x520   :  { %6862 = vmatpush3.bf16.msra.mxu0 %v9445_v46 }
 0x521   :  { %6863 = vmatprep.subr.bf16.mxu0 %v10228_v35 }
 0x59a   :  { %v4947_v16 = vpop.f32.mrb[6].mxu1 }
 0x59b   :  { %v4948_v63 = vpop.f32.mrb[7].mxu1 }
 0x59c   :  { %v4949_v33 = vadd.f32 %v4948_v63, %v4947_v16  ;;  %v3945_v16 = vand.u32 4294901760, %v3908_v14  ;;  %v3948_v63 = vand.u32 4294901760, %v3909_v1 }
 0x5a2   :  { %v4912_v43 = vpop.f32.mrb[4].mxu0 }
 0x5a3   :  { %v4913_v4 = vpop.f32.mrb[5].mxu0 }
 0x5a4   :  { %v4914_v34 = vadd.f32 %v4913_v4, %v4912_v43  ;;  %v3910_v43 = vld [vmem:[#allocation2 + $0x260] sm:$0xff] }
 0x5a5   :  { %v3951_v4 = vand.u32 4294901760, %v3910_v43 }
 0x5a6   :  { %v3138_v5 = vadd.f32 %v4914_v34, %v3028_v54  ;;  %v3911_v54 = vld [vmem:[#allocation2 + $0x268] sm:$0xff] }
 0x5a7   :  { %v3954_v34 = vand.u32 4294901760, %v3911_v54  ;;  %v9483_v3 = vsub.f32 %v3910_v43, %v3951_v4 }
 0x5a8   :  { %v3370_v59 = vadd.f32 %v4949_v33, %v3138_v5  ;;  %v9449_v33 = vpack.c.bf16 %v3948_v63, %v3945_v16 }
 0x5a9   :  { %v9453_v5 = vpack.c.bf16 %v3954_v34, %v3951_v4 }
 0x5aa   :  { %6865 = vmatpush3.bf16.msra.mxu0 %v9449_v33 }
 0x5ab   :  { %6866 = vmatprep.subr.bf16.mxu0 %v10228_v35 }
 0x5ae   :  { %6868 = vmatpush3.bf16.msra.mxu0 %v9453_v5 }
 0x5af   :  { %6869 = vmatprep.subr.bf16.mxu0 %v10228_v35 }
 0x5ba   :  { %v5017_v15 = vpop.f32.mrb[8].mxu1 }
 0x5bb   :  { %v5018_v52 = vpop.f32.mrb[9].mxu1 }
 0x5bc   :  { %v5019_v18 = vadd.f32 %v5018_v52, %v5017_v15  ;;  %v3913_v15 = vld [vmem:[#allocation2 + $0x278] sm:$0xff] }
 0x5c2   :  { %v4982_v7 = vpop.f32.mrb[6].mxu0 }
 0x5c3   :  { %v4983_v48 = vpop.f32.mrb[7].mxu0 }
 0x5c4   :  { %v4984_v8 = vadd.f32 %v4983_v48, %v4982_v7  ;;  %v4008_v7 = vand.u32 4294901760, %v9407_v61  ;;  %v4015_v48 = vand.u32 4294901760, %v9409_v26 }
 0x5c6   :  { %v3508_v53 = vadd.f32 %v4984_v8, %v3370_v59  ;;  %v3912_v59 = vld [vmem:[#allocation2 + $0x270] sm:$0xff] }
 0x5c7   :  { %v3957_v52 = vand.u32 4294901760, %v3912_v59 }
 0x5c8   :  { %v3616_v36 = vadd.f32 %v5019_v18, %v3508_v53  ;;  %v3960_v18 = vand.u32 4294901760, %v3913_v15  ;;  %v4009_v53 = vsub.f32 %v9407_v61, %v4008_v7 }
 0x5ca   :  { %v9459_v8 = vpack.c.bf16 %v3960_v18, %v3957_v52  ;;  %v4010_v32 = vand.u32 4294901760, %v4009_v53  ;;  %v9489_v2 = vsub.f32 %v3913_v15, %v3960_v18 }
 0x5cc   :  { %6871 = vmatpush3.bf16.msra.mxu0 %v9459_v8 }
 0x5cd   :  { %6872 = vmatprep.subr.bf16.mxu0 %v10228_v35 }
 0x5db   :  { %v5087_v58 = vpop.f32.mrb[10].mxu1 }
 0x5dc   :  { %v5088_v62 = vpop.f32.mrb[11].mxu1 }
 0x5dd   :  { %v5089_v60 = vadd.f32 %v5088_v62, %v5087_v58  ;;  %v9474_v58 = vsub.f32 %v3906_v56, %v3939_v44  ;;  %v9476_v62 = vsub.f32 %v3907_v19, %v3942_v31  ;;  %v4057_v56 = vand.u32 4294901760, %v9472_v29 }
 0x5de   :  { %v7141_v19 = vmov 0   ;;  %v4051_v31 = vsub.f32 %v9470_v37, %v4050_v28 }
 0x5df   :  { %7056 = vset.pattern.permute.xlu1 %v7141_v19  ;;  %7057 = vset.pattern.permute.xlu0 %v7141_v19 }
 0x5e2   :  { %v5052_v23 = vpop.f32.mrb[8].mxu0 }
 0x5e3   :  { %v5053_v50 = vpop.f32.mrb[9].mxu0 }
 0x5e4   :  { %v5054_v0 = vadd.f32 %v5053_v50, %v5052_v23  ;;  %v9481_v23 = vsub.f32 %v3909_v1, %v3948_v63  ;;  %v9485_v50 = vsub.f32 %v3911_v54, %v3954_v34  ;;  %v4052_v1 = vand.u32 4294901760, %v4051_v31 }
 0x5e5   :  { %v9916_v63 = vand.u32 4294901760, %v9476_v62  ;;  %v9910_v31 = vand.u32 4294901760, %v9489_v2 }
 0x5e6   :  { %v3784_v12 = vadd.f32 %v5054_v0, %v3616_v36  ;;  %v4016_v36 = vsub.f32 %v9409_v26, %v4015_v48  ;;  %v9487_v0 = vsub.f32 %v3912_v59, %v3957_v52  ;;  %v9914_v18 = vand.u32 4294901760, %v9481_v23 }
 0x5e7   :  { %v4072_v4 = vsub.f32 %v9476_v62, %v9916_v63 }
 0x5e8   :  { %v9430_v11 = vadd.f32 %v5089_v60, %v3784_v12  ;;  %v4017_v49 = vand.u32 4294901760, %v4016_v36  ;;  %v9479_v60 = vsub.f32 %v3908_v14, %v3945_v16  ;;  %v4058_v14 = vsub.f32 %v9472_v29, %v4057_v56 }
 0x5e9   :  { %v4064_v16 = vand.u32 4294901760, %v9474_v58  ;;  %v4073_v15 = vand.u32 4294901760, %v4072_v4  ;;  %v9911_v19 = vand.u32 4294901760, %v9487_v0 }
 0x5ea   :  { %v3892_v41 = vsel %vm3891_vm9, %v9430_v11, -inf  ;;  %v9491_v12 = vpack.c.bf16 %v4017_v49, %v4010_v32  ;;  %v4059_v43 = vand.u32 4294901760, %v4058_v14  ;;  %v9915_v52 = vand.u32 4294901760, %v9479_v60 }
 0x5eb   :  { %3893 = vmax.xlane.f32.xlu0 %v3892_v41  ;;  %v4030_v41 = vsub.f32 %v9413_v13, %v4029_v55  ;;  %v4065_v54 = vsub.f32 %v9474_v58, %v4064_v16  ;;  %v4086_v32 = vsub.f32 %v9481_v23, %v9914_v18 }
 0x5ec   :  { %v6882_v34 = vpack.c.bf16 %v4059_v43, %v4052_v1  ;;  %v4079_v36 = vsub.f32 %v9479_v60, %v9915_v52  ;;  %v4107_v1 = vsub.f32 %v9487_v0, %v9911_v19  ;;  %v4114_v43 = vsub.f32 %v9489_v2, %v9910_v31 }
 0x5ed   :  { %v4031_v21 = vand.u32 4294901760, %v4030_v41  ;;  %v4066_v59 = vand.u32 4294901760, %v4065_v54  ;;  %v4087_v51 = vand.u32 4294901760, %v4086_v32  ;;  %v9913_v41 = vand.u32 4294901760, %v9483_v3 }
 0x5ee   :  { %v4080_v49 = vand.u32 4294901760, %v4079_v36  ;;  %v4108_v54 = vand.u32 4294901760, %v4107_v1  ;;  %v4115_v4 = vand.u32 4294901760, %v4114_v43  ;;  %v6900_v36 = vpack.c.bf16 %v9413_v13, %v9411_v42  ;;  %v2960_v43 = vld [vmem:[%s9694_s3 + $0x5] ss:$0 sm:$0xff] }
 0x5ef   :  { %2958 = vadd.xlane.f32.xlu0 %v2957_v10  ;;  %v4043_v10 = vand.u32 4294901760, %v9439_v45  ;;  %v9507_v24 = vpack.c.bf16 %v4031_v21, %v4024_v57  ;;  %v6885_v53 = vpack.c.bf16 %v4073_v15, %v4066_v59  ;;  %v9912_v57 = vand.u32 4294901760, %v9485_v50 }
 0x5f0   :  { %v6888_v21 = vpack.c.bf16 %v4087_v51, %v4080_v49  ;;  %v4093_v39 = vsub.f32 %v9483_v3, %v9913_v41  ;;  %v6894_v59 = vpack.c.bf16 %v4115_v4, %v4108_v54  ;;  %v6897_v15 = vpack.c.bf16 %v9409_v26, %v9407_v61 }
 0x5f1   :  { %v4044_v27 = vsub.f32 %v9439_v45, %v4043_v10  ;;  %v6903_v32 = vpack.c.bf16 %v9439_v45, %v9437_v47  ;;  %v6906_v49 = vpack.c.bf16 %v9472_v29, %v9470_v37  ;;  %v6909_v51 = vpack.c.bf16 %v9476_v62, %v9474_v58 }
 0x5f2   :  { %v6951_v61 = vpack.c.bf16 %v4043_v10, %v4036_v40  ;;  %v6954_v26 = vpack.c.bf16 %v4057_v56, %v4050_v28  ;;  %v10233_v42 = vand.u32 4294901760, %v9476_v62  ;;  %v10234_v47 = vand.u32 4294901760, %v9479_v60 }
 0x5f3   :  { %v4045_v20 = vand.u32 4294901760, %v4044_v27  ;;  %v4100_v27 = vsub.f32 %v9485_v50, %v9912_v57  ;;  %v10235_v45 = vand.u32 4294901760, %v9481_v23  ;;  %v10238_v37 = vand.u32 4294901760, %v9487_v0 }
 0x5f4   :  { %v6957_v13 = vpack.c.bf16 %v10233_v42, %v4064_v16  ;;  %v10239_v29 = vand.u32 4294901760, %v9489_v2 }
 0x5f5   :  { %v9511_v44 = vpack.c.bf16 %v4045_v20, %v4038_v38  ;;  %v4094_v38 = vand.u32 4294901760, %v4093_v39  ;;  %v4101_v20 = vand.u32 4294901760, %v4100_v27  ;;  %v6912_v39 = vpack.c.bf16 %v9481_v23, %v9479_v60 }
 0x5f6   :  { %v6915_v27 = vpack.c.bf16 %v9485_v50, %v9483_v3  ;;  %v6966_v58 = vpack.c.bf16 %v10239_v29, %v10238_v37 }
 0x5f7   :  { %v6891_v14 = vpack.c.bf16 %v4101_v20, %v4094_v38  ;;  %v6918_v38 = vpack.c.bf16 %v9489_v2, %v9487_v0 }
 0x678   :  { %v3894_v20 = vpop.xlane.xlu0 %3893 }
 0x679   :  { %v3895_v1 = vsub.f32 %v9430_v11, %v3894_v20 }
 0x67b   :  { %v3896_v54 = vmul.f32 1.442695, %v3895_v1 }
 0x67c   :  { %v2959_v4 = vpop.xlane.xlu0 %2958 }
 0x67d   :  { %7076 = vpow2.f32 %v3896_v54  ;;  %v2961_v31 = vadd.f32 %v2960_v43, %v2959_v4 }
 0x67f   :  { %v2962_v19 = vsub.f32 0.0, %v2961_v31 }
 0x681   :  { %v2963_v57 = vmul.f32 1.442695, %v2962_v19 }
 0x683   :  { %7078 = vpow2.f32 %v2963_v57 }
 0x687   :  { %v9571_v41 = vpop.eup %7076 }
 0x688   :  { %v9574_v18 = vand.u32 4294901760, %v9571_v41 }
 0x68a   :  { %v9578_v52 = vsub.f32 %v9571_v41, %v9574_v18 }
 0x68c   :  { %v3997_v11 = vand.u32 4294901760, %v9578_v52 }
 0x68d   :  { %v7079_v20 = vpop.eup %7078 }
 0x68e   :  { %v2965_v63 = vadd.f32 1.0, %v7079_v20  ;;  %v3998_v1 = vsub.f32 %v9578_v52, %v3997_v11 }
 0x690   :  { %7080 = vrcp.f32 %v2965_v63  ;;  %v3999_v43 = vand.u32 4294901760, %v3998_v1 }
 0x692   :  { %5855 = vmatmul.mubr.f32.vlgmr.msra.gmra.mrb[10].mxu0 %v3999_v43 }
 0x693   :  { %6874 = vmatpush3.bf16.msra.mxu0 %v9491_v12  ;;  %5889 = vmatprep.mubr.msk.f32.mxu0 %vm7139_vm0, %v10229_v17  ;;  %v6945_v12 = vpack.c.bf16 %v4015_v48, %v4008_v7  ;;  %v6960_v7 = vpack.c.bf16 %v10235_v45, %v10234_v47  ;;  %v10236_v48 = vand.u32 4294901760, %v9483_v3 }
 0x694   :  { %6875 = vmatprep.subr.bf16.mxu0 %v10228_v35 }
 0x697   :  { %6877 = vmatpush3.bf16.msra.mxu0 %v9507_v24  ;;  %v6948_v24 = vpack.c.bf16 %v4029_v55, %v4022_v9  ;;  %v10237_v9 = vand.u32 4294901760, %v9485_v50 }
 0x698   :  { %6878 = vmatprep.subr.bf16.mxu0 %v10228_v35 }
 0x699   :  { %v6963_v55 = vpack.c.bf16 %v10237_v9, %v10236_v48 }
 0x69a   :  { %v7081_v57 = vpop.eup %7080 }
 0x69b   :  { %6880 = vmatpush3.bf16.msra.mxu0 %v9511_v44  ;;  %4562 = vperm.xlu1 %7056, %v7081_v57  }
 0x69c   :  { %6881 = vmatprep.subr.bf16.mxu0 %v10228_v35 }
 0x69f   :  { %6883 = vmatpush3.bf16.msra.mxu0 %v6882_v34 }
 0x6a0   :  { %6884 = vmatprep.subr.bf16.mxu0 %v10228_v35 }
 0x6a3   :  { %6886 = vmatpush3.bf16.msra.mxu0 %v6885_v53 }
 0x6a4   :  { %6887 = vmatprep.subr.bf16.mxu0 %v10228_v35 }
 0x6a7   :  { %6889 = vmatpush3.bf16.msra.mxu0 %v6888_v21 }
 0x6a8   :  { %6890 = vmatprep.subr.bf16.mxu0 %v10228_v35 }
 0x6ab   :  { %6892 = vmatpush3.bf16.msra.mxu0 %v6891_v14 }
 0x6ac   :  { %6893 = vmatprep.subr.bf16.mxu0 %v10228_v35 }
 0x6af   :  { %6895 = vmatpush3.bf16.msra.mxu0 %v6894_v59 }
 0x6b0   :  { %6896 = vmatprep.subr.bf16.mxu0 %v10228_v35 }
 0x6b2   :  { %5890 = vmatmul.mubr.f32.vlgmr.msra.gmra.mrb[10].mxu0 %v9574_v18 }
 0x6b3   :  { %6898 = vmatpush3.bf16.msra.mxu0 %v6897_v15  ;;  %5924 = vmatprep.mubr.msk.f32.mxu0 %vm7139_vm0, %v10229_v17 }
 0x6b4   :  { %6899 = vmatprep.subr.bf16.mxu0 %v10228_v35 }
 0x6b7   :  { %6901 = vmatpush3.bf16.msra.mxu0 %v6900_v36 }
 0x6b8   :  { %6902 = vmatprep.subr.bf16.mxu0 %v10228_v35 }
 0x6bb   :  { %6904 = vmatpush3.bf16.msra.mxu0 %v6903_v32 }
 0x6bc   :  { %6905 = vmatprep.subr.bf16.mxu0 %v10228_v35 }
 0x6bf   :  { %6907 = vmatpush3.bf16.msra.mxu0 %v6906_v49 }
 0x6c0   :  { %6908 = vmatprep.subr.bf16.mxu0 %v10228_v35 }
 0x6c3   :  { %6910 = vmatpush3.bf16.msra.mxu0 %v6909_v51 }
 0x6c4   :  { %6911 = vmatprep.subr.bf16.mxu0 %v10228_v35 }
 0x6c7   :  { %6913 = vmatpush3.bf16.msra.mxu0 %v6912_v39 }
 0x6c8   :  { %6914 = vmatprep.subr.bf16.mxu0 %v10228_v35 }
 0x6cb   :  { %6916 = vmatpush3.bf16.msra.mxu0 %v6915_v27 }
 0x6cc   :  { %6917 = vmatprep.subr.bf16.mxu0 %v10228_v35 }
 0x6cf   :  { %6919 = vmatpush3.bf16.msra.mxu0 %v6918_v38 }
 0x6d0   :  { %6920 = vmatprep.subr.bf16.mxu0 %v10228_v35 }
 0x6d2   :  { %5925 = vmatmul.mubr.f32.vlgmr.msra.gmra.mrb[10].mxu0 %v9578_v52 }
 0x6d3   :  { %6922 = vmatpush3.bf16.msra.mxu0 %v9405_v30  ;;  %5959 = vmatprep.mubr.msk.f32.mxu0 %vm7139_vm0, %v10229_v17 }
 0x6d4   :  { %6923 = vmatprep.subr.bf16.mxu0 %v10228_v35 }
 0x6d7   :  { %6925 = vmatpush3.bf16.msra.mxu0 %v9416_v6 }
 0x6d8   :  { %6926 = vmatprep.subr.bf16.mxu0 %v10228_v35 }
 0x6db   :  { %6928 = vmatpush3.bf16.msra.mxu0 %v9433_v22 }
 0x6dc   :  { %6929 = vmatprep.subr.bf16.mxu0 %v10228_v35 }
 0x6df   :  { %6931 = vmatpush3.bf16.msra.mxu0 %v9441_v25 }
 0x6e0   :  { %6932 = vmatprep.subr.bf16.mxu0 %v10228_v35 }
 0x6e3   :  { %6934 = vmatpush3.bf16.msra.mxu0 %v9445_v46 }
 0x6e4   :  { %6935 = vmatprep.subr.bf16.mxu0 %v10228_v35 }
 0x6e7   :  { %6937 = vmatpush3.bf16.msra.mxu0 %v9449_v33 }
 0x6e8   :  { %6938 = vmatprep.subr.bf16.mxu0 %v10228_v35 }
 0x6eb   :  { %6940 = vmatpush3.bf16.msra.mxu0 %v9453_v5 }
 0x6ec   :  { %6941 = vmatprep.subr.bf16.mxu0 %v10228_v35 }
 0x6ef   :  { %6943 = vmatpush3.bf16.msra.mxu0 %v9459_v8 }
 0x6f0   :  { %6944 = vmatprep.subr.bf16.mxu0 %v10228_v35 }
 0x6f2   :  { %5960 = vmatmul.mubr.f32.vlgmr.msra.gmra.mrb[10].mxu0 %v3997_v11 }
 0x6f3   :  { %6946 = vmatpush3.bf16.msra.mxu0 %v6945_v12  ;;  %5994 = vmatprep.mubr.msk.f32.mxu0 %vm7139_vm0, %v10229_v17 }
 0x6f4   :  { %6947 = vmatprep.subr.bf16.mxu0 %v10228_v35 }
 0x6f7   :  { %6949 = vmatpush3.bf16.msra.mxu0 %v6948_v24 }
 0x6f8   :  { %6950 = vmatprep.subr.bf16.mxu0 %v10228_v35 }
 0x6fb   :  { %6952 = vmatpush3.bf16.msra.mxu0 %v6951_v61 }
 0x6fc   :  { %6953 = vmatprep.subr.bf16.mxu0 %v10228_v35 }
 0x6ff   :  { %6955 = vmatpush3.bf16.msra.mxu0 %v6954_v26 }
 0x700   :  { %6956 = vmatprep.subr.bf16.mxu0 %v10228_v35 }
 0x703   :  { %6958 = vmatpush3.bf16.msra.mxu0 %v6957_v13 }
 0x704   :  { %6959 = vmatprep.subr.bf16.mxu0 %v10228_v35 }
 0x707   :  { %6961 = vmatpush3.bf16.msra.mxu0 %v6960_v7 }
 0x708   :  { %6962 = vmatprep.subr.bf16.mxu0 %v10228_v35 }
 0x70b   :  { %6964 = vmatpush3.bf16.msra.mxu0 %v6963_v55 }
 0x70c   :  { %6965 = vmatprep.subr.bf16.mxu0 %v10228_v35 }
 0x70f   :  { %6967 = vmatpush3.bf16.msra.mxu0 %v6966_v58 }
 0x710   :  { %6968 = vmatprep.subr.bf16.mxu0 %v10228_v35 }
 0x712   :  { %5995 = vmatmul.mubr.f32.vlgmr.msra.gmra.mrb[10].mxu0 %v9574_v18 }
 0x713   :  { %6970 = vmatpush3.bf16.msra.mxu0 %v9405_v30  ;;  %6029 = vmatprep.mubr.msk.f32.mxu0 %vm7139_vm0, %v10229_v17 }
 0x714   :  { %6971 = vmatprep.subr.bf16.mxu0 %v10228_v35 }
 0x717   :  { %6973 = vmatpush3.bf16.msra.mxu0 %v9416_v6  ;;  %v10240_v6 = vlaneseq }
 0x718   :  { %6974 = vmatprep.subr.bf16.mxu0 %v10228_v35 }
 0x71b   :  { %6976 = vmatpush3.bf16.msra.mxu0 %v9433_v22  ;;  %v4558_v22 = vand.u32 127, %v10240_v6 }
 0x71c   :  { %6977 = vmatprep.subr.bf16.mxu0 %v10228_v35 }
 0x71d   :  { %vm4559_vm11 = vcmp.eq.s32.totalorder %v4558_v22, 100 }
 0x71f   :  { %6979 = vmatpush3.bf16.msra.mxu0 %v9441_v25 }
 0x720   :  { %6980 = vmatprep.subr.bf16.mxu0 %v10228_v35 }
 0x723   :  { %6982 = vmatpush3.bf16.msra.mxu0 %v9445_v46 }
 0x724   :  { %6983 = vmatprep.subr.bf16.mxu0 %v10228_v35 }
 0x727   :  { %6985 = vmatpush3.bf16.msra.mxu0 %v9449_v33  ;;  %v4563_v33 = vpop.permute.xlu1 %4562 }
 0x728   :  { %6986 = vmatprep.subr.bf16.mxu0 %v10228_v35 }
 0x72b   :  { %6988 = vmatpush3.bf16.msra.mxu0 %v9453_v5 }
 0x72c   :  { %6989 = vmatprep.subr.bf16.mxu0 %v10228_v35 }
 0x72f   :  { %6991 = vmatpush3.bf16.msra.mxu0 %v9459_v8 }
 0x732   :  { %6030 = vmatmul.mubr.f32.vlgmr.msra.gmra.mrb[10].mxu0 %v9574_v18 }
 0x805   :  { %v4551_v17 = vpop.f32.mrb[10].mxu0 }
 0x806   :  { %7082 = vrcp.f32 %v4551_v17  ;;  %v6031_v30 = vpop.f32.mrb[11].mxu0 }
 0x810   :  { %v7083_v25 = vpop.eup %7082 }
 0x811   :  { %v4556_v46 = vmul.f32 %v7083_v25, %v9571_v41 }
 0x813   :  { %v4565_v62 = vsel %vm4559_vm11, %v4563_v33, %v4556_v46 }
 0x814   :  { %4566 = vst [vmem:[%s9695_s4] sm:$0x1] %v4565_v62 }
 0x815   :  { %4571 = vsyncpa [#allocation3], 1 }
 0x816   :  { %4572 = vsyncpa [#allocation5], 1 }

</bundles_post_ra>
